<compile_context>
chip_gen: v6e
topology: v6e:2x2x1
jax: 0.10.0
libtpu: 0.0.40
codegen_flags: <defaults>
</compile_context>

<pallas_src>
import functools

import jax
import jax.numpy as jnp
from jax import lax
from jax.experimental import pallas as pl
from jax.experimental.pallas import tpu as pltpu


def _round_up(x, m):
    return ((x + m - 1) // m) * m


# ----------------------------------------------------------------------------
# Kernel 1: phase-decomposed deconv matmul + bias, with fused (masked) per-channel
#           sum / sum-of-squares partial reductions for BatchNorm.
# ----------------------------------------------------------------------------
def _deconv_stats_kernel(p_ref, w_ref, b_ref, ipos_ref, jpos_ref, phc_ref, pwc_ref,
                         z_ref, sum_ref, sq_ref, *, h_in, w_in):
    # p_ref: (TM, K) bf16; w_ref: (K, G) bf16; b_ref: (1, G) f32
    # ipos/jpos: (TM, 1) int32 (-1 on padded rows); phc/pwc: (1, G) int32
    acc = jnp.dot(p_ref[...], w_ref[...], preferred_element_type=jnp.float32)
    acc = acc + b_ref[...]
    z_ref[...] = acc

    # Validity mask: row r is patch position (i, j); output column c belongs to phase (ph, pw).
    # (i, j, ph, pw) is a real output pixel iff ph <= i <= H-1+ph and pw <= j <= W-1+pw.
    i_pos = ipos_ref[...]
    j_pos = jpos_ref[...]
    ph = phc_ref[...]
    pw = pwc_ref[...]
    valid = ((i_pos >= ph) & (i_pos <= ph + (h_in - 1)) &
             (j_pos >= pw) & (j_pos <= pw + (w_in - 1)))
    zm = jnp.where(valid, acc, 0.0)
    csum = jnp.sum(zm, axis=0, keepdims=True)
    csq = jnp.sum(zm * zm, axis=0, keepdims=True)
    # Per-tile partial stats written as an (8, G) sublane-aligned block (all rows identical),
    # so the grid axis can stay "parallel" (no resident accumulator).
    sum_ref[...] = jnp.broadcast_to(csum, sum_ref.shape)
    sq_ref[...] = jnp.broadcast_to(csq, sq_ref.shape)


def deconv_matmul_stats(patches, w_mat, bias_row, i_pos, j_pos, ph_col, pw_col,
                        *, h_in, w_in, tm):
    mp_pad, k = patches.shape
    g = w_mat.shape[1]
    nt = mp_pad // tm
    kernel = functools.partial(_deconv_stats_kernel, h_in=h_in, w_in=w_in)
    return pl.pallas_call(
        kernel,
        out_shape=(
            jax.ShapeDtypeStruct((mp_pad, g), jnp.float32),   # z = deconv + bias (phase layout)
            jax.ShapeDtypeStruct((nt * 8, g), jnp.float32),   # per-tile partial sums
            jax.ShapeDtypeStruct((nt * 8, g), jnp.float32),   # per-tile partial sum of squares
        ),
        grid_spec=pltpu.PrefetchScalarGridSpec(
            num_scalar_prefetch=0,
            grid=(nt,),
            in_specs=[
                pl.BlockSpec((tm, k), lambda i: (i, 0)),      # patches (bf16)
                pl.BlockSpec((k, g), lambda i: (0, 0)),       # weight matrix (bf16, resident)
                pl.BlockSpec((1, g), lambda i: (0, 0)),       # bias row (f32)
                pl.BlockSpec((tm, 1), lambda i: (i, 0)),      # i position per row
                pl.BlockSpec((tm, 1), lambda i: (i, 0)),      # j position per row
                pl.BlockSpec((1, g), lambda i: (0, 0)),       # phase-h per column
                pl.BlockSpec((1, g), lambda i: (0, 0)),       # phase-w per column
            ],
            out_specs=[
                pl.BlockSpec((tm, g), lambda i: (i, 0)),
                pl.BlockSpec((8, g), lambda i: (i, 0)),
                pl.BlockSpec((8, g), lambda i: (i, 0)),
            ],
        ),
        compiler_params=pltpu.CompilerParams(
            dimension_semantics=("parallel",),
            vmem_limit_bytes=32 * 1024 * 1024,
        ),
    )(patches, w_mat, bias_row, i_pos, j_pos, ph_col, pw_col)


# ----------------------------------------------------------------------------
# Kernel 2: fused affine normalization + ReLU (mem-bound, large lane-dense tiles)
# ----------------------------------------------------------------------------
def _norm_relu_kernel(z_ref, scale_ref, shift_ref, o_ref):
    o_ref[...] = jnp.maximum(z_ref[...] * scale_ref[...] + shift_ref[...], 0.0)


def norm_relu(z, scale_row, shift_row, *, tm):
    mp_pad, g = z.shape
    return pl.pallas_call(
        _norm_relu_kernel,
        out_shape=jax.ShapeDtypeStruct((mp_pad, g), jnp.float32),
        grid_spec=pltpu.PrefetchScalarGridSpec(
            num_scalar_prefetch=0,
            grid=(mp_pad // tm,),
            in_specs=[
                pl.BlockSpec((tm, g), lambda i: (i, 0)),
                pl.BlockSpec((1, g), lambda i: (0, 0)),
                pl.BlockSpec((1, g), lambda i: (0, 0)),
            ],
            out_specs=pl.BlockSpec((tm, g), lambda i: (i, 0)),
        ),
        compiler_params=pltpu.CompilerParams(
            dimension_semantics=("parallel",),
            vmem_limit_bytes=32 * 1024 * 1024,
        ),
    )(z, scale_row, shift_row)


# ----------------------------------------------------------------------------
# Wrapper: ConvTranspose2d(4, 2, 1) -> BatchNorm2d (training batch stats) -> ReLU
# ----------------------------------------------------------------------------
@jax.jit
def conv2d_transpose_block(x, weight, bias, gamma, beta, eps=1e-5):
    """x: [N, Cin, H, W] NCHW; weight: [Cin, Cout, 4, 4] (PyTorch ConvTranspose2d layout);
    bias/gamma/beta: [Cout].  Returns [N, Cout, 2H, 2W] NCHW."""
    N, Cin, H, W = x.shape
    Cout = weight.shape[1]
    assert weight.shape == (Cin, Cout, 4, 4)

    cout_pad = _round_up(Cout, 32)            # 4*cout_pad is a multiple of 128 -> lane-dense
    gpad = 4 * cout_pad
    K = 4 * Cin
    Mp = N * (H + 1) * (W + 1)

    tm = 512
    if Mp < tm:
        tm = _round_up(Mp, 8)
    mp_pad = _round_up(Mp, tm)

    # ---- patches: 4 shifted NHWC views concatenated on channels (single fused XLA pass) ----
    # Cast to bf16 up front so no f32 patch intermediate ever hits HBM (same numerics: the
    # reference conv also rounds its operands to bf16 before the MXU).
    x_nhwc = jnp.transpose(x, (0, 2, 3, 1)).astype(jnp.bfloat16)
    xp = jnp.pad(x_nhwc, ((0, 0), (1, 1), (1, 1), (0, 0)))
    views = [xp[:, dh:dh + H + 1, dw:dw + W + 1, :] for dh in range(2) for dw in range(2)]
    patches = jnp.concatenate(views, axis=-1).reshape(Mp, K)
    patches = jnp.pad(patches, ((0, mp_pad - Mp), (0, 0)))
    # TODO(synk): assemble the 2x2 patch tiles inside the matmul kernel (manual DMA with halo)
    # so `patches` never hits HBM at all.

    # ---- phase weight matrix: w[(dh,dw,ci), (ph,pw,co)] = W[ci, co, 3-ph-2dh, 3-pw-2dw] ----
    w_rows = []
    for dh in range(2):
        for dw in range(2):
            cols = []
            for ph in range(2):
                for pw in range(2):
                    sub = weight[:, :, 3 - ph - 2 * dh, 3 - pw - 2 * dw]    # [Cin, Cout]
                    cols.append(jnp.pad(sub, ((0, 0), (0, cout_pad - Cout))))
            w_rows.append(jnp.concatenate(cols, axis=1))
    w_mat = jnp.concatenate(w_rows, axis=0).astype(jnp.bfloat16)            # [4*Cin, gpad]
    bias_row = jnp.tile(jnp.pad(bias, (0, cout_pad - Cout)), 4).reshape(1, gpad).astype(jnp.float32)

    # ---- precomputed index helpers for the in-kernel validity mask (no in-kernel div/mod) ----
    r = jnp.arange(mp_pad, dtype=jnp.int32)
    rm = r % ((H + 1) * (W + 1))
    i_pos = jnp.where(r < Mp, rm // (W + 1), -1).reshape(mp_pad, 1)
    j_pos = jnp.where(r < Mp, rm % (W + 1), -1).reshape(mp_pad, 1)
    gcol = jnp.arange(gpad, dtype=jnp.int32) // cout_pad
    ph_col = (gcol // 2).reshape(1, gpad)
    pw_col = (gcol % 2).reshape(1, gpad)

    # ---- Pallas kernel 1: bf16 MXU matmul + bias + fused masked channel stats ----
    z, psum, psq = deconv_matmul_stats(patches, w_mat, bias_row, i_pos, j_pos,
                                       ph_col, pw_col, h_in=H, w_in=W, tm=tm)

    # ---- combine partial stats (tiny, XLA) -> BatchNorm scale/shift per channel ----
    nt = mp_pad // tm
    sums = psum.reshape(nt, 8, gpad)[:, 0, :].reshape(nt, 4, cout_pad)[:, :, :Cout]
    sqs = psq.reshape(nt, 8, gpad)[:, 0, :].reshape(nt, 4, cout_pad)[:, :, :Cout]
    count = jnp.asarray(4 * N * H * W, jnp.float32)           # = N * Ho * Wo
    mean = sums.sum(axis=(0, 1)) / count
    var = jnp.maximum(sqs.sum(axis=(0, 1)) / count - mean * mean, 0.0)      # biased var (PyTorch BN)
    inv_std = lax.rsqrt(var + eps)
    scale_c = gamma * inv_std
    shift_c = beta - mean * scale_c
    scale_row = jnp.tile(jnp.pad(scale_c, (0, cout_pad - Cout)), 4).reshape(1, gpad).astype(jnp.float32)
    shift_row = jnp.tile(jnp.pad(shift_c, (0, cout_pad - Cout)), 4).reshape(1, gpad).astype(jnp.float32)
    # TODO(synk): running_mean/running_var updates of nn.BatchNorm2d are not produced
    # (training-mode batch statistics only).

    # ---- Pallas kernel 2: fused normalize + ReLU on large row tiles ----
    tm_e = tm
    for cand in (2048, 1024):
        if cand <= mp_pad and mp_pad % cand == 0 and cand * gpad * 4 <= (4 << 20):
            tm_e = max(tm_e, cand)
            break
    out = norm_relu(z, scale_row, shift_row, tm=tm_e)

    # ---- depth-to-space (per-phase valid windows) + NCHW ----
    # TODO(synk): the interleaved phase scatter + NCHW transpose is not expressible with a
    # blocked index_map, so it stays in XLA.
    z5 = out[:Mp].reshape(N, H + 1, W + 1, 4, cout_pad)
    rows = []
    for ph in range(2):
        cols = []
        for pw in range(2):
            cols.append(z5[:, ph:ph + H, pw:pw + W, ph * 2 + pw, :Cout])    # [N, H, W, Cout]
        rows.append(jnp.stack(cols, axis=3))                                # [N, H, W, 2, Cout]
    y = jnp.stack(rows, axis=2)                                             # [N, H, 2, W, 2, Cout]
    y = jnp.transpose(y, (0, 5, 1, 2, 3, 4))                                # [N, Cout, H, 2, W, 2]
    return y.reshape(N, Cout, 2 * H, 2 * W)


# ----------------------------------------------------------------------------
# Pure-JAX reference (same numerics: bf16 conv operands, f32 accumulation, batch-stat BN)
# ----------------------------------------------------------------------------
@jax.jit
def reference_block(x, weight, bias, gamma, beta, eps=1e-5):
    w_flipped = jnp.flip(weight, axis=(2, 3))
    rhs = jnp.transpose(w_flipped, (1, 0, 2, 3))   # OIHW
    y = lax.conv_general_dilated(
        x.astype(jnp.bfloat16), rhs.astype(jnp.bfloat16),
        window_strides=(1, 1), padding=[(2, 2), (2, 2)],
        lhs_dilation=(2, 2), rhs_dilation=(1, 1),
        dimension_numbers=("NCHW", "OIHW", "NCHW"),
        preferred_element_type=jnp.float32)
    y = y + bias[None, :, None, None]
    mean = y.mean(axis=(0, 2, 3), keepdims=True)
    var = ((y - mean) ** 2).mean(axis=(0, 2, 3), keepdims=True)
    yn = (y - mean) * lax.rsqrt(var + eps) * gamma[None, :, None, None] + beta[None, :, None, None]
    return jnp.maximum(yn, 0.0)


if __name__ == "__main__":
    N, Cin, H, W = 2, 4, 16, 16
    Cout = 8

    key = jax.random.PRNGKey(0)
    kx, kw, kb = jax.random.split(key, 3)
    x = jax.random.normal(kx, (N, Cin, H, W), dtype=jnp.float32)
    weight = jax.random.normal(kw, (Cin, Cout, 4, 4), dtype=jnp.float32) * 0.1
    bias = jax.random.normal(kb, (Cout,), dtype=jnp.float32) * 0.1
    gamma = jnp.ones((Cout,), dtype=jnp.float32)   # BatchNorm2d default affine init
    beta = jnp.zeros((Cout,), dtype=jnp.float32)

    out = conv2d_transpose_block(x, weight, bias, gamma, beta)
    out = jax.block_until_ready(out)
    assert out.shape == (N, Cout, 2 * H, 2 * W), out.shape

    ref = reference_block(x, weight, bias, gamma, beta)
    err = float(jnp.max(jnp.abs(out - ref)))
    assert err < 2e-3, err

    print("KERNEL_OK")
</pallas_src>

<mosaic_0001>
module attributes {stable_mosaic.version = 11 : i64} {
  func.func @_deconv_stats_kernel(%arg0: i32, %arg1: memref<512x16xbf16, #tpu.memory_space<vmem>>, %arg2: memref<16x128xbf16, #tpu.memory_space<vmem>>, %arg3: memref<1x128xf32, #tpu.memory_space<vmem>>, %arg4: memref<512x1xi32, #tpu.memory_space<vmem>>, %arg5: memref<512x1xi32, #tpu.memory_space<vmem>>, %arg6: memref<1x128xi32, #tpu.memory_space<vmem>>, %arg7: memref<1x128xi32, #tpu.memory_space<vmem>>, %arg8: memref<512x128xf32, #tpu.memory_space<vmem>>, %arg9: memref<8x128xf32, #tpu.memory_space<vmem>>, %arg10: memref<8x128xf32, #tpu.memory_space<vmem>>) attributes {dimension_semantics = [#tpu.dimension_semantics<parallel>], iteration_bounds = array<i64: 2>, scalar_prefetch = 0 : i64, scratch_operands = 0 : i64, tpu.core_type = #tpu.core_type<tc>, window_params = [{transform_indices = @transform_0, window_bounds = array<i64: 512, 16>}, {pipeline_mode = #tpu.pipeline_mode<synchronous>, transform_indices = @transform_1, window_bounds = array<i64: 16, 128>}, {pipeline_mode = #tpu.pipeline_mode<synchronous>, transform_indices = @transform_2, window_bounds = array<i64: 1, 128>}, {transform_indices = @transform_3, window_bounds = array<i64: 512, 1>}, {transform_indices = @transform_4, window_bounds = array<i64: 512, 1>}, {pipeline_mode = #tpu.pipeline_mode<synchronous>, transform_indices = @transform_5, window_bounds = array<i64: 1, 128>}, {pipeline_mode = #tpu.pipeline_mode<synchronous>, transform_indices = @transform_6, window_bounds = array<i64: 1, 128>}, {transform_indices = @transform_7, window_bounds = array<i64: 512, 128>}, {transform_indices = @transform_8, window_bounds = array<i64: 8, 128>}, {transform_indices = @transform_9, window_bounds = array<i64: 8, 128>}]} {
    %c0 = arith.constant 0 : index
    %c0_0 = arith.constant 0 : index
    %0 = vector.load %arg1[%c0, %c0_0] : memref<512x16xbf16, #tpu.memory_space<vmem>>, vector<512x16xbf16>
    %c0_1 = arith.constant 0 : index
    %c0_2 = arith.constant 0 : index
    %1 = vector.load %arg2[%c0_1, %c0_2] : memref<16x128xbf16, #tpu.memory_space<vmem>>, vector<16x128xbf16>
    %cst = arith.constant dense<0.000000e+00> : vector<512x128xf32>
    %2 = tpu.matmul %0, %1, %cst {dimension_numbers = #tpu.dot_dimension_numbers<[1], [0], [0], [1], [0, 0, 1, 1], [], []>} : vector<512x16xbf16>, vector<16x128xbf16>, vector<512x128xf32> -> vector<512x128xf32>
    %c0_3 = arith.constant 0 : index
    %c0_4 = arith.constant 0 : index
    %3 = vector.load %arg3[%c0_3, %c0_4] : memref<1x128xf32, #tpu.memory_space<vmem>>, vector<1x128xf32>
    %4 = vector.broadcast %3 : vector<1x128xf32> to vector<512x128xf32>
    %5 = arith.addf %2, %4 : vector<512x128xf32>
    %c0_5 = arith.constant 0 : index
    %c0_6 = arith.constant 0 : index
    %6 = vector.load %arg8[%c0_5, %c0_6] : memref<512x128xf32, #tpu.memory_space<vmem>>, vector<512x128xf32>
    tpu.vector_store %arg8[%c0_5, %c0_6], %5 {strides = array<i32>} : memref<512x128xf32, #tpu.memory_space<vmem>>, vector<512x128xf32>,
    %c0_7 = arith.constant 0 : index
    %c0_8 = arith.constant 0 : index
    %7 = vector.load %arg4[%c0_7, %c0_8] : memref<512x1xi32, #tpu.memory_space<vmem>>, vector<512x1xi32>
    %c0_9 = arith.constant 0 : index
    %c0_10 = arith.constant 0 : index
    %8 = vector.load %arg5[%c0_9, %c0_10] : memref<512x1xi32, #tpu.memory_space<vmem>>, vector<512x1xi32>
    %c0_11 = arith.constant 0 : index
    %c0_12 = arith.constant 0 : index
    %9 = vector.load %arg6[%c0_11, %c0_12] : memref<1x128xi32, #tpu.memory_space<vmem>>, vector<1x128xi32>
    %c0_13 = arith.constant 0 : index
    %c0_14 = arith.constant 0 : index
    %10 = vector.load %arg7[%c0_13, %c0_14] : memref<1x128xi32, #tpu.memory_space<vmem>>, vector<1x128xi32>
    %11 = vector.broadcast %7 : vector<512x1xi32> to vector<512x128xi32>
    %12 = vector.broadcast %9 : vector<1x128xi32> to vector<512x128xi32>
    %13 = arith.cmpi sge, %11, %12 : vector<512x128xi32>
    %c15_i32 = arith.constant 15 : i32
    %14 = vector.broadcast %c15_i32 : i32 to vector<1x128xi32>
    %15 = arith.addi %9, %14 : vector<1x128xi32>
    %16 = vector.broadcast %7 : vector<512x1xi32> to vector<512x128xi32>
    %17 = vector.broadcast %15 : vector<1x128xi32> to vector<512x128xi32>
    %18 = arith.cmpi sle, %16, %17 : vector<512x128xi32>
    %19 = arith.andi %13, %18 : vector<512x128xi1>
    %20 = vector.broadcast %8 : vector<512x1xi32> to vector<512x128xi32>
    %21 = vector.broadcast %10 : vector<1x128xi32> to vector<512x128xi32>
    %22 = arith.cmpi sge, %20, %21 : vector<512x128xi32>
    %23 = arith.andi %19, %22 : vector<512x128xi1>
    %c15_i32_15 = arith.constant 15 : i32
    %24 = vector.broadcast %c15_i32_15 : i32 to vector<1x128xi32>
    %25 = arith.addi %10, %24 : vector<1x128xi32>
    %26 = vector.broadcast %8 : vector<512x1xi32> to vector<512x128xi32>
    %27 = vector.broadcast %25 : vector<1x128xi32> to vector<512x128xi32>
    %28 = arith.cmpi sle, %26, %27 : vector<512x128xi32>
    %29 = arith.andi %23, %28 : vector<512x128xi1>
    %cst_16 = arith.constant 0.000000e+00 : f32
    %30 = vector.broadcast %cst_16 : f32 to vector<512x128xf32>
    %31 = arith.select %29, %5, %30 : vector<512x128xi1>, vector<512x128xf32>
    %cst_17 = arith.constant dense<0.000000e+00> : vector<128xf32>
    %32 = vector.multi_reduction <add>, %31, %cst_17 [0] : vector<512x128xf32> to vector<128xf32>
    %33 = vector.shape_cast %32 : vector<128xf32> to vector<1x128xf32>
    %34 = arith.mulf %31, %31 : vector<512x128xf32>
    %cst_18 = arith.constant dense<0.000000e+00> : vector<128xf32>
    %35 = vector.multi_reduction <add>, %34, %cst_18 [0] : vector<512x128xf32> to vector<128xf32>
    %36 = vector.shape_cast %35 : vector<128xf32> to vector<1x128xf32>
    %37 = vector.shape_cast %33 : vector<1x128xf32> to vector<1x128xf32>
    %38 = vector.broadcast %37 : vector<1x128xf32> to vector<8x128xf32>
    %c0_19 = arith.constant 0 : index
    %c0_20 = arith.constant 0 : index
    %39 = vector.load %arg9[%c0_19, %c0_20] : memref<8x128xf32, #tpu.memory_space<vmem>>, vector<8x128xf32>
    tpu.vector_store %arg9[%c0_19, %c0_20], %38 {strides = array<i32>} : memref<8x128xf32, #tpu.memory_space<vmem>>, vector<8x128xf32>,
    %40 = vector.shape_cast %36 : vector<1x128xf32> to vector<1x128xf32>
    %41 = vector.broadcast %40 : vector<1x128xf32> to vector<8x128xf32>
    %c0_21 = arith.constant 0 : index
    %c0_22 = arith.constant 0 : index
    %42 = vector.load %arg10[%c0_21, %c0_22] : memref<8x128xf32, #tpu.memory_space<vmem>>, vector<8x128xf32>
    tpu.vector_store %arg10[%c0_21, %c0_22], %41 {strides = array<i32>} : memref<8x128xf32, #tpu.memory_space<vmem>>, vector<8x128xf32>,
    return
  }
  func.func @transform_0(%arg0: i32) -> (i32, i32) {
    %c0_i32 = arith.constant 0 : i32
    %c0_i32_0 = arith.constant 0 : i32
    return %arg0, %c0_i32 : i32, i32
  }
  func.func @transform_1(%arg0: i32) -> (i32, i32) {
    %c0_i32 = arith.constant 0 : i32
    %c0_i32_0 = arith.constant 0 : i32
    %c0_i32_1 = arith.constant 0 : i32
    return %c0_i32, %c0_i32_0 : i32, i32
  }
  func.func @transform_2(%arg0: i32) -> (i32, i32) {
    %c0_i32 = arith.constant 0 : i32
    %c0_i32_0 = arith.constant 0 : i32
    %c0_i32_1 = arith.constant 0 : i32
    return %c0_i32, %c0_i32_0 : i32, i32
  }
  func.func @transform_3(%arg0: i32) -> (i32, i32) {
    %c0_i32 = arith.constant 0 : i32
    %c0_i32_0 = arith.constant 0 : i32
    return %arg0, %c0_i32 : i32, i32
  }
  func.func @transform_4(%arg0: i32) -> (i32, i32) {
    %c0_i32 = arith.constant 0 : i32
    %c0_i32_0 = arith.constant 0 : i32
    return %arg0, %c0_i32 : i32, i32
  }
  func.func @transform_5(%arg0: i32) -> (i32, i32) {
    %c0_i32 = arith.constant 0 : i32
    %c0_i32_0 = arith.constant 0 : i32
    %c0_i32_1 = arith.constant 0 : i32
    return %c0_i32, %c0_i32_0 : i32, i32
  }
  func.func @transform_6(%arg0: i32) -> (i32, i32) {
    %c0_i32 = arith.constant 0 : i32
    %c0_i32_0 = arith.constant 0 : i32
    %c0_i32_1 = arith.constant 0 : i32
    return %c0_i32, %c0_i32_0 : i32, i32
  }
  func.func @transform_7(%arg0: i32) -> (i32, i32) {
    %c0_i32 = arith.constant 0 : i32
    %c0_i32_0 = arith.constant 0 : i32
    return %arg0, %c0_i32 : i32, i32
  }
  func.func @transform_8(%arg0: i32) -> (i32, i32) {
    %c0_i32 = arith.constant 0 : i32
    %c0_i32_0 = arith.constant 0 : i32
    return %arg0, %c0_i32 : i32, i32
  }
  func.func @transform_9(%arg0: i32) -> (i32, i32) {
    %c0_i32 = arith.constant 0 : i32
    %c0_i32_0 = arith.constant 0 : i32
    return %arg0, %c0_i32 : i32, i32
  }
}

module attributes {stable_mosaic.version = 11 : i64} {
  func.func @_norm_relu_kernel(%arg0: i32, %arg1: memref<1024x128xf32, #tpu.memory_space<vmem>>, %arg2: memref<1x128xf32, #tpu.memory_space<vmem>>, %arg3: memref<1x128xf32, #tpu.memory_space<vmem>>, %arg4: memref<1024x128xf32, #tpu.memory_space<vmem>>) attributes {dimension_semantics = [#tpu.dimension_semantics<parallel>], iteration_bounds = array<i64: 1>, scalar_prefetch = 0 : i64, scratch_operands = 0 : i64, tpu.core_type = #tpu.core_type<tc>, window_params = [{transform_indices = @transform_0, window_bounds = array<i64: 1024, 128>}, {pipeline_mode = #tpu.pipeline_mode<synchronous>, transform_indices = @transform_1, window_bounds = array<i64: 1, 128>}, {pipeline_mode = #tpu.pipeline_mode<synchronous>, transform_indices = @transform_2, window_bounds = array<i64: 1, 128>}, {transform_indices = @transform_3, window_bounds = array<i64: 1024, 128>}]} {
    %c0 = arith.constant 0 : index
    %c0_0 = arith.constant 0 : index
    %0 = vector.load %arg1[%c0, %c0_0] : memref<1024x128xf32, #tpu.memory_space<vmem>>, vector<1024x128xf32>
    %c0_1 = arith.constant 0 : index
    %c0_2 = arith.constant 0 : index
    %1 = vector.load %arg2[%c0_1, %c0_2] : memref<1x128xf32, #tpu.memory_space<vmem>>, vector<1x128xf32>
    %2 = vector.broadcast %1 : vector<1x128xf32> to vector<1024x128xf32>
    %3 = arith.mulf %0, %2 : vector<1024x128xf32>
    %c0_3 = arith.constant 0 : index
    %c0_4 = arith.constant 0 : index
    %4 = vector.load %arg3[%c0_3, %c0_4] : memref<1x128xf32, #tpu.memory_space<vmem>>, vector<1x128xf32>
    %5 = vector.broadcast %4 : vector<1x128xf32> to vector<1024x128xf32>
    %6 = arith.addf %3, %5 : vector<1024x128xf32>
    %cst = arith.constant 0.000000e+00 : f32
    %7 = vector.broadcast %cst : f32 to vector<1024x128xf32>
    %8 = arith.maximumf %6, %7 : vector<1024x128xf32>
    %c0_5 = arith.constant 0 : index
    %c0_6 = arith.constant 0 : index
    %9 = vector.load %arg4[%c0_5, %c0_6] : memref<1024x128xf32, #tpu.memory_space<vmem>>, vector<1024x128xf32>
    tpu.vector_store %arg4[%c0_5, %c0_6], %8 {strides = array<i32>} : memref<1024x128xf32, #tpu.memory_space<vmem>>, vector<1024x128xf32>,
    return
  }
  func.func @transform_0(%arg0: i32) -> (i32, i32) {
    %c0_i32 = arith.constant 0 : i32
    %c0_i32_0 = arith.constant 0 : i32
    return %arg0, %c0_i32 : i32, i32
  }
  func.func @transform_1(%arg0: i32) -> (i32, i32) {
    %c0_i32 = arith.constant 0 : i32
    %c0_i32_0 = arith.constant 0 : i32
    %c0_i32_1 = arith.constant 0 : i32
    return %c0_i32, %c0_i32_0 : i32, i32
  }
  func.func @transform_2(%arg0: i32) -> (i32, i32) {
    %c0_i32 = arith.constant 0 : i32
    %c0_i32_0 = arith.constant 0 : i32
    %c0_i32_1 = arith.constant 0 : i32
    return %c0_i32, %c0_i32_0 : i32, i32
  }
  func.func @transform_3(%arg0: i32) -> (i32, i32) {
    %c0_i32 = arith.constant 0 : i32
    %c0_i32_0 = arith.constant 0 : i32
    return %arg0, %c0_i32 : i32, i32
  }
}

</mosaic_0001>

<bundles_post_ra>
// kernel: tile.18
= control target key start
LH: loop header
LB: loop body
LE: loop exit
PB: predicated region body
PF: predicated region fallthrough
CT: control target
= control target key end

     0   :  { %s22_s0 = inlined_call_operand.vmem [shape: f32[32], index: 0, kind: input, shape index: {}]   ;;  %s23_s1 = inlined_call_operand.vmem [shape: f32[4,32], index: 1, kind: output, shape index: {}]  }
   0x1   :  { %v4_v0 = vld [vmem:[%s22_s0] ss:$0 sm:$0xff] }
   0x2   :  { %5 = vst [vmem:[%s23_s1] sm:$0xf] %v4_v0 }

// kernel: tile.19
= control target key start
LH: loop header
LB: loop body
LE: loop exit
PB: predicated region body
PF: predicated region fallthrough
CT: control target
= control target key end

     0   :  { %vm8_vm0 = vcmask 261120   ;;  %s40_s8 = smov 32   ;;  %s41_s9 = smov 64   ;;  %vm14_vm1 = vcmask 1048320   ;;  %vm20_vm2 = vcmask 785920   ;;  %vm26_vm3 = vcmask 523520   ;;  %s58_s0 = inlined_call_operand.vmem [shape: f32[4,32], index: 0, kind: input, shape index: {}]   ;;  %s59_s1 = inlined_call_operand.vmem [shape: f32[1,128], index: 1, kind: output, shape index: {}]  }
   0x1   :  { %v5_v0 = vld [vmem:[%s58_s0] sm:$0xf]  ;;  %s39_s0 = smov 96  }
   0x2   :  { %6 = vst [vmem:[#allocation1] sm:$0xf] %v5_v0 }
   0x9   :  { %v11_v1 = vld [vmem:[#allocation1 + $0x3] sm:$0x1]   ;;  %v23_v2 = vld [vmem:[#allocation1 + $0x1] sm:$0x1]   ;;  %v7_v3 = vld [vmem:[#allocation1] sm:$0x1]  }
   0xa   :  { %12 = vrot.lane.b32.xlu0 %v11_v1, %s39_s0  ;;  %24 = vrot.lane.b32.xlu1 %v23_v2, %s40_s8  ;;  %v17_v4 = vld [vmem:[#allocation1 + $0x2] sm:$0x1]   ;;  %9 = vst.msk [vmem:[#allocation0] sm:$0x1] %vm8_vm0, %v7_v3  }
   0xe   :  { %18 = vrot.lane.b32.xlu0 %v17_v4, %s41_s9 }
  0x7c   :  { %v13_v5 = vpop.permute.xlu0 %12   ;;  %v25_v6 = vpop.permute.xlu1 %24  }
  0x7d   :  { %15 = vst.msk [vmem:[#allocation0] sm:$0x1] %vm14_vm1, %v13_v5  }
  0x80   :  { %v19_v7 = vpop.permute.xlu0 %18  }
  0x81   :  { %21 = vst.msk [vmem:[#allocation0] sm:$0x1] %vm20_vm2, %v19_v7  }
  0x82   :  { %27 = vst.msk [vmem:[#allocation0] sm:$0x1] %vm26_vm3, %v25_v6  }
  0x89   :  { %v32_v8 = vld [vmem:[#allocation0] sm:$0x1] }
  0x8a   :  { %35 = vst [vmem:[%s59_s1] sm:$0x1] %v32_v8 }

// kernel: squeeze.34
= control target key start
LH: loop header
LB: loop body
LE: loop exit
PB: predicated region body
PF: predicated region fallthrough
CT: control target
= control target key end

     0   :  { %s47_s8 = smov 32   ;;  %vm8_vm0 = vcmask 261120   ;;  %s48_s9 = smov 64   ;;  %s68_s0 = inlined_call_operand.vmem [shape: f32[2,128], index: 0, kind: input, shape index: {}]   ;;  %s69_s1 = inlined_call_operand.vmem [shape: f32[2,4,32], index: 1, kind: output, shape index: {}]  }
   0x1   :  { %v5_v0 = vld [vmem:[%s68_s0] sm:$0x3]  ;;  %s46_s0 = smov 96  }
   0x2   :  { %6 = vst [vmem:[#allocation1] sm:$0x3] %v5_v0 }
   0x9   :  { %v10_v1 = vld [vmem:[#allocation1] sm:$0x3]  }
   0xa   :  { %v22_v2 = vld [vmem:[#allocation1] sm:$0x3]   ;;  %11 = vrot.lane.b32.xlu0 %v10_v1, %s46_s0 }
   0xb   :  { %23 = vrot.lane.b32.xlu1 %v22_v2, %s47_s8  ;;  %v7_v3 = vld [vmem:[#allocation1] sm:$0x3]  }
   0xc   :  { %v16_v4 = vld [vmem:[#allocation1] sm:$0x3]   ;;  %9 = vst.msk [vmem:[#allocation0] ss:$8 sm:$0x3] %vm8_vm0, %v7_v3  }
   0xe   :  { %17 = vrot.lane.b32.xlu0 %v16_v4, %s48_s9 }
  0x7c   :  { %v12_v5 = vpop.permute.xlu0 %11  }
  0x7d   :  { %v24_v6 = vpop.permute.xlu1 %23   ;;  %15 = vst.msk [vmem:[#allocation0 + $0x1] ss:$8 sm:$0x3] %vm8_vm0, %v12_v5  }
  0x7e   :  { %27 = vst.msk [vmem:[#allocation0 + $0x3] ss:$8 sm:$0x3] %vm8_vm0, %v24_v6  }
  0x80   :  { %v18_v7 = vpop.permute.xlu0 %17  }
  0x81   :  { %21 = vst.msk [vmem:[#allocation0 + $0x2] ss:$8 sm:$0x3] %vm8_vm0, %v18_v7  }
  0x88   :  { %v32_v8 = vld [vmem:[#allocation0] sm:$0xf]  ;;  %v37_v9 = vld [vmem:[#allocation0 + $0x8] sm:$0xf] }
  0x89   :  { %35 = vst [vmem:[%s69_s1] sm:$0xf] %v32_v8  ;;  %42 = vst [vmem:[%s69_s1 + $0x4] sm:$0xf] %v37_v9 }

// kernel: conv2d_transpose_block.3
= control target key start
LH: loop header
LB: loop body
LE: loop exit
PB: predicated region body
PF: predicated region fallthrough
CT: control target
= control target key end

     0   :  { %s1740_s0 = inlined_call_operand.vmem [shape: f32[1024,128], index: 0, kind: input, shape index: {}]   ;;  %s1741_s1 = inlined_call_operand.vmem [shape: f32[1,128], index: 1, kind: input, shape index: {}]   ;;  %s1742_s2 = inlined_call_operand.vmem [shape: f32[1,128], index: 2, kind: input, shape index: {}]   ;;  %s1743_s3 = inlined_call_operand.vmem [shape: f32[1024,128], index: 3, kind: output, shape index: {}]  }
   0x1   :  { %v14_v0 = vld [vmem:[%s1740_s0] sm:$0xff]  ;;  %v15_v4 = vld [vmem:[%s1740_s0 + $0x8] sm:$0xff]  ;;  %v16_v5 = vld [vmem:[%s1740_s0 + $0x10] sm:$0xff] }
   0x2   :  { %v702_v1 = vld [vmem:[%s1741_s1] ss:$0 sm:$0xff]  ;;  %v17_v6 = vld [vmem:[%s1740_s0 + $0x18] sm:$0xff]  ;;  %v19_v11 = vld [vmem:[%s1740_s0 + $0x28] sm:$0xff] }
   0x3   :  { %v707_v2 = vld [vmem:[%s1742_s2] ss:$0 sm:$0xff]  ;;  %v149_v3 = vmul.f32 %v702_v1, %v14_v0  ;;  %v150_v7 = vmul.f32 %v702_v1, %v15_v4  ;;  %v151_v8 = vmul.f32 %v702_v1, %v16_v5  ;;  %v152_v9 = vmul.f32 %v702_v1, %v17_v6  ;;  %v20_v12 = vld [vmem:[%s1740_s0 + $0x30] sm:$0xff]  ;;  %v21_v17 = vld [vmem:[%s1740_s0 + $0x38] sm:$0xff] }
   0x4   :  { %v18_v10 = vld [vmem:[%s1740_s0 + $0x20] sm:$0xff]  ;;  %v154_v15 = vmul.f32 %v702_v1, %v19_v11  ;;  %v155_v16 = vmul.f32 %v702_v1, %v20_v12  ;;  %v156_v21 = vmul.f32 %v702_v1, %v21_v17  ;;  %v23_v27 = vld [vmem:[%s1740_s0 + $0x48] sm:$0xff]  ;;  %v24_v28 = vld [vmem:[%s1740_s0 + $0x50] sm:$0xff] }
   0x5   :  { %v284_v13 = vadd.f32 %v707_v2, %v149_v3  ;;  %v153_v14 = vmul.f32 %v702_v1, %v18_v10  ;;  %v285_v18 = vadd.f32 %v707_v2, %v150_v7  ;;  %v286_v19 = vadd.f32 %v707_v2, %v151_v8  ;;  %v22_v22 = vld [vmem:[%s1740_s0 + $0x40] sm:$0xff]  ;;  %v25_v29 = vld [vmem:[%s1740_s0 + $0x58] sm:$0xff]  ;;  %v27_v35 = vld [vmem:[%s1740_s0 + $0x68] sm:$0xff] }
   0x6   :  { %v287_v20 = vadd.f32 %v707_v2, %v152_v9  ;;  %v289_v25 = vadd.f32 %v707_v2, %v154_v15  ;;  %v290_v26 = vadd.f32 %v707_v2, %v155_v16  ;;  %v291_v33 = vadd.f32 %v707_v2, %v156_v21  ;;  %v26_v34 = vld [vmem:[%s1740_s0 + $0x60] sm:$0xff]  ;;  %v28_v36 = vld [vmem:[%s1740_s0 + $0x70] sm:$0xff]  ;;  %v29_v41 = vld [vmem:[%s1740_s0 + $0x78] sm:$0xff] }
   0x7   :  { %v412_v23 = vmax.f32 %v284_v13, 0.0  ;;  %v288_v24 = vadd.f32 %v707_v2, %v153_v14  ;;  %v413_v30 = vmax.f32 %v285_v18, 0.0  ;;  %v414_v31 = vmax.f32 %v286_v19, 0.0  ;;  %v30_v54 = vld [vmem:[%s1740_s0 + $0x80] sm:$0xff]  ;;  %v31_v59 = vld [vmem:[%s1740_s0 + $0x88] sm:$0xff]  ;;  %v32_v60 = vld [vmem:[%s1740_s0 + $0x90] sm:$0xff] }
   0x8   :  { %v415_v32 = vmax.f32 %v287_v20, 0.0  ;;  %v417_v38 = vmax.f32 %v289_v25, 0.0  ;;  %v418_v39 = vmax.f32 %v290_v26, 0.0  ;;  %v157_v40 = vmul.f32 %v702_v1, %v22_v22  ;;  %v33_v61 = vld [vmem:[%s1740_s0 + $0x98] sm:$0xff]  ;;  %v34_v4 = vld [vmem:[%s1740_s0 + $0xa0] sm:$0xff]  ;;  %v35_v5 = vld [vmem:[%s1740_s0 + $0xa8] sm:$0xff] }
   0x9   :  { %540 = vst [vmem:[%s1743_s3] sm:$0xff] %v412_v23  ;;  %v416_v37 = vmax.f32 %v288_v24, 0.0  ;;  %541 = vst [vmem:[%s1743_s3 + $0x8] sm:$0xff] %v413_v30  ;;  %v419_v42 = vmax.f32 %v291_v33, 0.0  ;;  %v158_v43 = vmul.f32 %v702_v1, %v23_v27  ;;  %v159_v44 = vmul.f32 %v702_v1, %v24_v28  ;;  %v36_v6 = vld [vmem:[%s1740_s0 + $0xb0] sm:$0xff]  ;;  %v37_v11 = vld [vmem:[%s1740_s0 + $0xb8] sm:$0xff] }
   0xa   :  { %542 = vst [vmem:[%s1743_s3 + $0x10] sm:$0xff] %v414_v31  ;;  %543 = vst [vmem:[%s1743_s3 + $0x18] sm:$0xff] %v415_v32  ;;  %v160_v45 = vmul.f32 %v702_v1, %v25_v29  ;;  %v292_v46 = vadd.f32 %v707_v2, %v157_v40  ;;  %v161_v47 = vmul.f32 %v702_v1, %v26_v34  ;;  %v38_v24 = vld [vmem:[%s1740_s0 + $0xc0] sm:$0xff]  ;;  %v39_v29 = vld [vmem:[%s1740_s0 + $0xc8] sm:$0xff] }
   0xb   :  { %544 = vst [vmem:[%s1743_s3 + $0x20] sm:$0xff] %v416_v37  ;;  %545 = vst [vmem:[%s1743_s3 + $0x28] sm:$0xff] %v417_v38  ;;  %v162_v48 = vmul.f32 %v702_v1, %v27_v35  ;;  %v163_v49 = vmul.f32 %v702_v1, %v28_v36  ;;  %v293_v50 = vadd.f32 %v707_v2, %v158_v43  ;;  %v40_v30 = vld [vmem:[%s1740_s0 + $0xd0] sm:$0xff]  ;;  %v41_v31 = vld [vmem:[%s1740_s0 + $0xd8] sm:$0xff] }
   0xc   :  { %546 = vst [vmem:[%s1743_s3 + $0x30] sm:$0xff] %v418_v39  ;;  %547 = vst [vmem:[%s1743_s3 + $0x38] sm:$0xff] %v419_v42  ;;  %v294_v51 = vadd.f32 %v707_v2, %v159_v44  ;;  %v295_v52 = vadd.f32 %v707_v2, %v160_v45  ;;  %v164_v53 = vmul.f32 %v702_v1, %v29_v41  ;;  %v420_v55 = vmax.f32 %v292_v46, 0.0  ;;  %v42_v36 = vld [vmem:[%s1740_s0 + $0xe0] sm:$0xff]  ;;  %v43_v37 = vld [vmem:[%s1740_s0 + $0xe8] sm:$0xff] }
   0xd   :  { %v296_v56 = vadd.f32 %v707_v2, %v161_v47  ;;  %v297_v57 = vadd.f32 %v707_v2, %v162_v48  ;;  %v298_v58 = vadd.f32 %v707_v2, %v163_v49  ;;  %v421_v62 = vmax.f32 %v293_v50, 0.0  ;;  %v44_v38 = vld [vmem:[%s1740_s0 + $0xf0] sm:$0xff]  ;;  %v45_v43 = vld [vmem:[%s1740_s0 + $0xf8] sm:$0xff] }
   0xe   :  { %v422_v63 = vmax.f32 %v294_v51, 0.0  ;;  %v423_v0 = vmax.f32 %v295_v52, 0.0  ;;  %v299_v3 = vadd.f32 %v707_v2, %v164_v53  ;;  %548 = vst [vmem:[%s1743_s3 + $0x40] sm:$0xff] %v420_v55  ;;  %v165_v10 = vmul.f32 %v702_v1, %v30_v54 }
   0xf   :  { %v424_v7 = vmax.f32 %v296_v56, 0.0  ;;  %v425_v8 = vmax.f32 %v297_v57, 0.0  ;;  %v426_v9 = vmax.f32 %v298_v58, 0.0  ;;  %549 = vst [vmem:[%s1743_s3 + $0x48] sm:$0xff] %v421_v62  ;;  %v166_v13 = vmul.f32 %v702_v1, %v31_v59  ;;  %v46_v56 = vld [vmem:[%s1740_s0 + $0x100] sm:$0xff]  ;;  %v48_v62 = vld [vmem:[%s1740_s0 + $0x110] sm:$0xff] }
  0x10   :  { %550 = vst [vmem:[%s1743_s3 + $0x50] sm:$0xff] %v422_v63  ;;  %551 = vst [vmem:[%s1743_s3 + $0x58] sm:$0xff] %v423_v0  ;;  %v427_v12 = vmax.f32 %v299_v3, 0.0  ;;  %v167_v14 = vmul.f32 %v702_v1, %v32_v60  ;;  %v168_v15 = vmul.f32 %v702_v1, %v33_v61  ;;  %v300_v16 = vadd.f32 %v707_v2, %v165_v10  ;;  %v47_v61 = vld [vmem:[%s1740_s0 + $0x108] sm:$0xff]  ;;  %v49_v63 = vld [vmem:[%s1740_s0 + $0x118] sm:$0xff] }
  0x11   :  { %552 = vst [vmem:[%s1743_s3 + $0x60] sm:$0xff] %v424_v7  ;;  %553 = vst [vmem:[%s1743_s3 + $0x68] sm:$0xff] %v425_v8  ;;  %v169_v17 = vmul.f32 %v702_v1, %v34_v4  ;;  %v170_v18 = vmul.f32 %v702_v1, %v35_v5  ;;  %v171_v19 = vmul.f32 %v702_v1, %v36_v6  ;;  %v50_v6 = vld [vmem:[%s1740_s0 + $0x120] sm:$0xff]  ;;  %v51_v7 = vld [vmem:[%s1740_s0 + $0x128] sm:$0xff] }
  0x12   :  { %554 = vst [vmem:[%s1743_s3 + $0x70] sm:$0xff] %v426_v9  ;;  %555 = vst [vmem:[%s1743_s3 + $0x78] sm:$0xff] %v427_v12  ;;  %v301_v20 = vadd.f32 %v707_v2, %v166_v13  ;;  %v302_v21 = vadd.f32 %v707_v2, %v167_v14  ;;  %v303_v22 = vadd.f32 %v707_v2, %v168_v15  ;;  %v428_v25 = vmax.f32 %v300_v16, 0.0  ;;  %v52_v8 = vld [vmem:[%s1740_s0 + $0x130] sm:$0xff]  ;;  %v53_v13 = vld [vmem:[%s1740_s0 + $0x138] sm:$0xff] }
  0x13   :  { %v172_v23 = vmul.f32 %v702_v1, %v37_v11  ;;  %v304_v26 = vadd.f32 %v707_v2, %v169_v17  ;;  %v305_v27 = vadd.f32 %v707_v2, %v170_v18  ;;  %v306_v28 = vadd.f32 %v707_v2, %v171_v19 }
  0x14   :  { %v429_v32 = vmax.f32 %v301_v20, 0.0  ;;  %v430_v33 = vmax.f32 %v302_v21, 0.0  ;;  %v431_v34 = vmax.f32 %v303_v22, 0.0  ;;  %556 = vst [vmem:[%s1743_s3 + $0x80] sm:$0xff] %v428_v25  ;;  %v173_v42 = vmul.f32 %v702_v1, %v38_v24 }
  0x15   :  { %v307_v35 = vadd.f32 %v707_v2, %v172_v23  ;;  %v432_v39 = vmax.f32 %v304_v26, 0.0  ;;  %v433_v40 = vmax.f32 %v305_v27, 0.0  ;;  %v434_v41 = vmax.f32 %v306_v28, 0.0  ;;  %v54_v26 = vld [vmem:[%s1740_s0 + $0x140] sm:$0xff] }
  0x16   :  { %557 = vst [vmem:[%s1743_s3 + $0x88] sm:$0xff] %v429_v32  ;;  %558 = vst [vmem:[%s1743_s3 + $0x90] sm:$0xff] %v430_v33  ;;  %v174_v45 = vmul.f32 %v702_v1, %v39_v29  ;;  %v175_v46 = vmul.f32 %v702_v1, %v40_v30  ;;  %v176_v47 = vmul.f32 %v702_v1, %v41_v31  ;;  %v55_v31 = vld [vmem:[%s1740_s0 + $0x148] sm:$0xff]  ;;  %v56_v32 = vld [vmem:[%s1740_s0 + $0x150] sm:$0xff] }
  0x17   :  { %559 = vst [vmem:[%s1743_s3 + $0x98] sm:$0xff] %v431_v34  ;;  %v435_v44 = vmax.f32 %v307_v35, 0.0  ;;  %560 = vst [vmem:[%s1743_s3 + $0xa0] sm:$0xff] %v432_v39  ;;  %v308_v48 = vadd.f32 %v707_v2, %v173_v42  ;;  %v177_v49 = vmul.f32 %v702_v1, %v42_v36  ;;  %v178_v50 = vmul.f32 %v702_v1, %v43_v37  ;;  %v57_v33 = vld [vmem:[%s1740_s0 + $0x158] sm:$0xff]  ;;  %v59_v39 = vld [vmem:[%s1740_s0 + $0x168] sm:$0xff] }
  0x18   :  { %561 = vst [vmem:[%s1743_s3 + $0xa8] sm:$0xff] %v433_v40  ;;  %562 = vst [vmem:[%s1743_s3 + $0xb0] sm:$0xff] %v434_v41  ;;  %v179_v51 = vmul.f32 %v702_v1, %v44_v38  ;;  %v309_v52 = vadd.f32 %v707_v2, %v174_v45  ;;  %v310_v53 = vadd.f32 %v707_v2, %v175_v46  ;;  %v58_v38 = vld [vmem:[%s1740_s0 + $0x160] sm:$0xff]  ;;  %v60_v40 = vld [vmem:[%s1740_s0 + $0x170] sm:$0xff] }
  0x19   :  { %563 = vst [vmem:[%s1743_s3 + $0xb8] sm:$0xff] %v435_v44  ;;  %v311_v54 = vadd.f32 %v707_v2, %v176_v47  ;;  %v180_v55 = vmul.f32 %v702_v1, %v45_v43  ;;  %v436_v57 = vmax.f32 %v308_v48, 0.0  ;;  %v312_v58 = vadd.f32 %v707_v2, %v177_v49  ;;  %v61_v45 = vld [vmem:[%s1740_s0 + $0x178] sm:$0xff] }
  0x1a   :  { %v313_v59 = vadd.f32 %v707_v2, %v178_v50  ;;  %v314_v60 = vadd.f32 %v707_v2, %v179_v51  ;;  %v437_v0 = vmax.f32 %v309_v52, 0.0  ;;  %v438_v3 = vmax.f32 %v310_v53, 0.0 }
  0x1b   :  { %v439_v4 = vmax.f32 %v311_v54, 0.0  ;;  %v315_v5 = vadd.f32 %v707_v2, %v180_v55  ;;  %564 = vst [vmem:[%s1743_s3 + $0xc0] sm:$0xff] %v436_v57  ;;  %v440_v9 = vmax.f32 %v312_v58, 0.0  ;;  %v181_v12 = vmul.f32 %v702_v1, %v46_v56  ;;  %v62_v58 = vld [vmem:[%s1740_s0 + $0x180] sm:$0xff] }
  0x1c   :  { %v441_v10 = vmax.f32 %v313_v59, 0.0  ;;  %v442_v11 = vmax.f32 %v314_v60, 0.0  ;;  %565 = vst [vmem:[%s1743_s3 + $0xc8] sm:$0xff] %v437_v0  ;;  %566 = vst [vmem:[%s1743_s3 + $0xd0] sm:$0xff] %v438_v3  ;;  %v182_v15 = vmul.f32 %v702_v1, %v47_v61  ;;  %v183_v16 = vmul.f32 %v702_v1, %v48_v62  ;;  %v64_v0 = vld [vmem:[%s1740_s0 + $0x190] sm:$0xff]  ;;  %v65_v3 = vld [vmem:[%s1740_s0 + $0x198] sm:$0xff] }
  0x1d   :  { %567 = vst [vmem:[%s1743_s3 + $0xd8] sm:$0xff] %v439_v4  ;;  %v443_v14 = vmax.f32 %v315_v5, 0.0  ;;  %v184_v17 = vmul.f32 %v702_v1, %v49_v63  ;;  %568 = vst [vmem:[%s1743_s3 + $0xe0] sm:$0xff] %v440_v9  ;;  %v316_v18 = vadd.f32 %v707_v2, %v181_v12  ;;  %v185_v19 = vmul.f32 %v702_v1, %v50_v6  ;;  %v63_v63 = vld [vmem:[%s1740_s0 + $0x188] sm:$0xff] }
  0x1e   :  { %569 = vst [vmem:[%s1743_s3 + $0xe8] sm:$0xff] %v441_v10  ;;  %570 = vst [vmem:[%s1743_s3 + $0xf0] sm:$0xff] %v442_v11  ;;  %v186_v20 = vmul.f32 %v702_v1, %v51_v7  ;;  %v187_v21 = vmul.f32 %v702_v1, %v52_v8  ;;  %v317_v22 = vadd.f32 %v707_v2, %v182_v15  ;;  %v66_v8 = vld [vmem:[%s1740_s0 + $0x1a0] sm:$0xff]  ;;  %v67_v9 = vld [vmem:[%s1740_s0 + $0x1a8] sm:$0xff] }
  0x1f   :  { %571 = vst [vmem:[%s1743_s3 + $0xf8] sm:$0xff] %v443_v14  ;;  %v318_v23 = vadd.f32 %v707_v2, %v183_v16  ;;  %v319_v24 = vadd.f32 %v707_v2, %v184_v17  ;;  %v188_v25 = vmul.f32 %v702_v1, %v53_v13  ;;  %v444_v27 = vmax.f32 %v316_v18, 0.0  ;;  %v68_v10 = vld [vmem:[%s1740_s0 + $0x1b0] sm:$0xff]  ;;  %v69_v15 = vld [vmem:[%s1740_s0 + $0x1b8] sm:$0xff] }
  0x20   :  { %v320_v28 = vadd.f32 %v707_v2, %v185_v19  ;;  %v321_v29 = vadd.f32 %v707_v2, %v186_v20  ;;  %v322_v30 = vadd.f32 %v707_v2, %v187_v21  ;;  %v445_v34 = vmax.f32 %v317_v22, 0.0 }
  0x21   :  { %v446_v35 = vmax.f32 %v318_v23, 0.0  ;;  %v447_v36 = vmax.f32 %v319_v24, 0.0  ;;  %v323_v37 = vadd.f32 %v707_v2, %v188_v25  ;;  %572 = vst [vmem:[%s1743_s3 + $0x100] sm:$0xff] %v444_v27  ;;  %v189_v44 = vmul.f32 %v702_v1, %v54_v26 }
  0x22   :  { %v448_v41 = vmax.f32 %v320_v28, 0.0  ;;  %v449_v42 = vmax.f32 %v321_v29, 0.0  ;;  %v450_v43 = vmax.f32 %v322_v30, 0.0  ;;  %573 = vst [vmem:[%s1743_s3 + $0x108] sm:$0xff] %v445_v34  ;;  %v190_v47 = vmul.f32 %v702_v1, %v55_v31  ;;  %v70_v28 = vld [vmem:[%s1740_s0 + $0x1c0] sm:$0xff]  ;;  %v72_v34 = vld [vmem:[%s1740_s0 + $0x1d0] sm:$0xff] }
  0x23   :  { %574 = vst [vmem:[%s1743_s3 + $0x110] sm:$0xff] %v446_v35  ;;  %575 = vst [vmem:[%s1743_s3 + $0x118] sm:$0xff] %v447_v36  ;;  %v451_v46 = vmax.f32 %v323_v37, 0.0  ;;  %v191_v48 = vmul.f32 %v702_v1, %v56_v32  ;;  %v192_v49 = vmul.f32 %v702_v1, %v57_v33  ;;  %v324_v50 = vadd.f32 %v707_v2, %v189_v44  ;;  %v71_v33 = vld [vmem:[%s1740_s0 + $0x1c8] sm:$0xff]  ;;  %v73_v35 = vld [vmem:[%s1740_s0 + $0x1d8] sm:$0xff] }
  0x24   :  { %576 = vst [vmem:[%s1743_s3 + $0x120] sm:$0xff] %v448_v41  ;;  %577 = vst [vmem:[%s1743_s3 + $0x128] sm:$0xff] %v449_v42  ;;  %v193_v51 = vmul.f32 %v702_v1, %v58_v38  ;;  %v194_v52 = vmul.f32 %v702_v1, %v59_v39  ;;  %v195_v53 = vmul.f32 %v702_v1, %v60_v40  ;;  %v74_v40 = vld [vmem:[%s1740_s0 + $0x1e0] sm:$0xff]  ;;  %v75_v41 = vld [vmem:[%s1740_s0 + $0x1e8] sm:$0xff] }
  0x25   :  { %578 = vst [vmem:[%s1743_s3 + $0x130] sm:$0xff] %v450_v43  ;;  %579 = vst [vmem:[%s1743_s3 + $0x138] sm:$0xff] %v451_v46  ;;  %v325_v54 = vadd.f32 %v707_v2, %v190_v47  ;;  %v326_v55 = vadd.f32 %v707_v2, %v191_v48  ;;  %v327_v56 = vadd.f32 %v707_v2, %v192_v49  ;;  %v452_v59 = vmax.f32 %v324_v50, 0.0  ;;  %v76_v42 = vld [vmem:[%s1740_s0 + $0x1f0] sm:$0xff]  ;;  %v77_v47 = vld [vmem:[%s1740_s0 + $0x1f8] sm:$0xff] }
  0x26   :  { %v196_v57 = vmul.f32 %v702_v1, %v61_v45  ;;  %v328_v60 = vadd.f32 %v707_v2, %v193_v51  ;;  %v329_v61 = vadd.f32 %v707_v2, %v194_v52  ;;  %v330_v62 = vadd.f32 %v707_v2, %v195_v53 }
  0x27   :  { %v453_v4 = vmax.f32 %v325_v54, 0.0  ;;  %v454_v5 = vmax.f32 %v326_v55, 0.0  ;;  %v455_v6 = vmax.f32 %v327_v56, 0.0  ;;  %580 = vst [vmem:[%s1743_s3 + $0x140] sm:$0xff] %v452_v59  ;;  %v197_v14 = vmul.f32 %v702_v1, %v62_v58 }
  0x28   :  { %v331_v7 = vadd.f32 %v707_v2, %v196_v57  ;;  %v456_v11 = vmax.f32 %v328_v60, 0.0  ;;  %v457_v12 = vmax.f32 %v329_v61, 0.0  ;;  %v458_v13 = vmax.f32 %v330_v62, 0.0  ;;  %v78_v60 = vld [vmem:[%s1740_s0 + $0x200] sm:$0xff] }
  0x29   :  { %581 = vst [vmem:[%s1743_s3 + $0x148] sm:$0xff] %v453_v4  ;;  %582 = vst [vmem:[%s1743_s3 + $0x150] sm:$0xff] %v454_v5  ;;  %v198_v17 = vmul.f32 %v702_v1, %v63_v63  ;;  %v199_v18 = vmul.f32 %v702_v1, %v64_v0  ;;  %v200_v19 = vmul.f32 %v702_v1, %v65_v3  ;;  %v79_v3 = vld [vmem:[%s1740_s0 + $0x208] sm:$0xff]  ;;  %v80_v4 = vld [vmem:[%s1740_s0 + $0x210] sm:$0xff] }
  0x2a   :  { %583 = vst [vmem:[%s1743_s3 + $0x158] sm:$0xff] %v455_v6  ;;  %v459_v16 = vmax.f32 %v331_v7, 0.0  ;;  %584 = vst [vmem:[%s1743_s3 + $0x160] sm:$0xff] %v456_v11  ;;  %v332_v20 = vadd.f32 %v707_v2, %v197_v14  ;;  %v201_v21 = vmul.f32 %v702_v1, %v66_v8  ;;  %v202_v22 = vmul.f32 %v702_v1, %v67_v9  ;;  %v81_v5 = vld [vmem:[%s1740_s0 + $0x218] sm:$0xff]  ;;  %v83_v11 = vld [vmem:[%s1740_s0 + $0x228] sm:$0xff] }
  0x2b   :  { %585 = vst [vmem:[%s1743_s3 + $0x168] sm:$0xff] %v457_v12  ;;  %586 = vst [vmem:[%s1743_s3 + $0x170] sm:$0xff] %v458_v13  ;;  %v203_v23 = vmul.f32 %v702_v1, %v68_v10  ;;  %v333_v24 = vadd.f32 %v707_v2, %v198_v17  ;;  %v334_v25 = vadd.f32 %v707_v2, %v199_v18  ;;  %v82_v10 = vld [vmem:[%s1740_s0 + $0x220] sm:$0xff]  ;;  %v84_v12 = vld [vmem:[%s1740_s0 + $0x230] sm:$0xff] }
  0x2c   :  { %587 = vst [vmem:[%s1743_s3 + $0x178] sm:$0xff] %v459_v16  ;;  %v335_v26 = vadd.f32 %v707_v2, %v200_v19  ;;  %v204_v27 = vmul.f32 %v702_v1, %v69_v15  ;;  %v460_v29 = vmax.f32 %v332_v20, 0.0  ;;  %v336_v30 = vadd.f32 %v707_v2, %v201_v21  ;;  %v85_v17 = vld [vmem:[%s1740_s0 + $0x238] sm:$0xff] }
  0x2d   :  { %v337_v31 = vadd.f32 %v707_v2, %v202_v22  ;;  %v338_v32 = vadd.f32 %v707_v2, %v203_v23  ;;  %v461_v36 = vmax.f32 %v333_v24, 0.0  ;;  %v462_v37 = vmax.f32 %v334_v25, 0.0 }
  0x2e   :  { %v463_v38 = vmax.f32 %v335_v26, 0.0  ;;  %v339_v39 = vadd.f32 %v707_v2, %v204_v27  ;;  %588 = vst [vmem:[%s1743_s3 + $0x180] sm:$0xff] %v460_v29  ;;  %v464_v43 = vmax.f32 %v336_v30, 0.0  ;;  %v205_v46 = vmul.f32 %v702_v1, %v70_v28  ;;  %v86_v30 = vld [vmem:[%s1740_s0 + $0x240] sm:$0xff] }
  0x2f   :  { %v465_v44 = vmax.f32 %v337_v31, 0.0  ;;  %v466_v45 = vmax.f32 %v338_v32, 0.0  ;;  %589 = vst [vmem:[%s1743_s3 + $0x188] sm:$0xff] %v461_v36  ;;  %590 = vst [vmem:[%s1743_s3 + $0x190] sm:$0xff] %v462_v37  ;;  %v206_v49 = vmul.f32 %v702_v1, %v71_v33  ;;  %v207_v50 = vmul.f32 %v702_v1, %v72_v34  ;;  %v88_v36 = vld [vmem:[%s1740_s0 + $0x250] sm:$0xff]  ;;  %v89_v37 = vld [vmem:[%s1740_s0 + $0x258] sm:$0xff] }
  0x30   :  { %591 = vst [vmem:[%s1743_s3 + $0x198] sm:$0xff] %v463_v38  ;;  %v467_v48 = vmax.f32 %v339_v39, 0.0  ;;  %v208_v51 = vmul.f32 %v702_v1, %v73_v35  ;;  %592 = vst [vmem:[%s1743_s3 + $0x1a0] sm:$0xff] %v464_v43  ;;  %v340_v52 = vadd.f32 %v707_v2, %v205_v46  ;;  %v209_v53 = vmul.f32 %v702_v1, %v74_v40  ;;  %v87_v35 = vld [vmem:[%s1740_s0 + $0x248] sm:$0xff] }
  0x31   :  { %593 = vst [vmem:[%s1743_s3 + $0x1a8] sm:$0xff] %v465_v44  ;;  %594 = vst [vmem:[%s1743_s3 + $0x1b0] sm:$0xff] %v466_v45  ;;  %v210_v54 = vmul.f32 %v702_v1, %v75_v41  ;;  %v211_v55 = vmul.f32 %v702_v1, %v76_v42  ;;  %v341_v56 = vadd.f32 %v707_v2, %v206_v49  ;;  %v90_v42 = vld [vmem:[%s1740_s0 + $0x260] sm:$0xff]  ;;  %v91_v43 = vld [vmem:[%s1740_s0 + $0x268] sm:$0xff] }
  0x32   :  { %595 = vst [vmem:[%s1743_s3 + $0x1b8] sm:$0xff] %v467_v48  ;;  %v342_v57 = vadd.f32 %v707_v2, %v207_v50  ;;  %v343_v58 = vadd.f32 %v707_v2, %v208_v51  ;;  %v212_v59 = vmul.f32 %v702_v1, %v77_v47  ;;  %v468_v61 = vmax.f32 %v340_v52, 0.0  ;;  %v92_v44 = vld [vmem:[%s1740_s0 + $0x270] sm:$0xff]  ;;  %v93_v49 = vld [vmem:[%s1740_s0 + $0x278] sm:$0xff] }
  0x33   :  { %v344_v62 = vadd.f32 %v707_v2, %v209_v53  ;;  %v345_v63 = vadd.f32 %v707_v2, %v210_v54  ;;  %v346_v0 = vadd.f32 %v707_v2, %v211_v55  ;;  %v469_v6 = vmax.f32 %v341_v56, 0.0 }
  0x34   :  { %v470_v7 = vmax.f32 %v342_v57, 0.0  ;;  %v471_v8 = vmax.f32 %v343_v58, 0.0  ;;  %v347_v9 = vadd.f32 %v707_v2, %v212_v59  ;;  %596 = vst [vmem:[%s1743_s3 + $0x1c0] sm:$0xff] %v468_v61  ;;  %v213_v16 = vmul.f32 %v702_v1, %v78_v60 }
  0x35   :  { %v472_v13 = vmax.f32 %v344_v62, 0.0  ;;  %v473_v14 = vmax.f32 %v345_v63, 0.0  ;;  %v474_v15 = vmax.f32 %v346_v0, 0.0  ;;  %597 = vst [vmem:[%s1743_s3 + $0x1c8] sm:$0xff] %v469_v6  ;;  %v214_v19 = vmul.f32 %v702_v1, %v79_v3  ;;  %v94_v62 = vld [vmem:[%s1740_s0 + $0x280] sm:$0xff]  ;;  %v96_v6 = vld [vmem:[%s1740_s0 + $0x290] sm:$0xff] }
  0x36   :  { %598 = vst [vmem:[%s1743_s3 + $0x1d0] sm:$0xff] %v470_v7  ;;  %599 = vst [vmem:[%s1743_s3 + $0x1d8] sm:$0xff] %v471_v8  ;;  %v475_v18 = vmax.f32 %v347_v9, 0.0  ;;  %v215_v20 = vmul.f32 %v702_v1, %v80_v4  ;;  %v216_v21 = vmul.f32 %v702_v1, %v81_v5  ;;  %v348_v22 = vadd.f32 %v707_v2, %v213_v16  ;;  %v95_v5 = vld [vmem:[%s1740_s0 + $0x288] sm:$0xff]  ;;  %v97_v7 = vld [vmem:[%s1740_s0 + $0x298] sm:$0xff] }
  0x37   :  { %600 = vst [vmem:[%s1743_s3 + $0x1e0] sm:$0xff] %v472_v13  ;;  %601 = vst [vmem:[%s1743_s3 + $0x1e8] sm:$0xff] %v473_v14  ;;  %v217_v23 = vmul.f32 %v702_v1, %v82_v10  ;;  %v218_v24 = vmul.f32 %v702_v1, %v83_v11  ;;  %v219_v25 = vmul.f32 %v702_v1, %v84_v12  ;;  %v98_v12 = vld [vmem:[%s1740_s0 + $0x2a0] sm:$0xff]  ;;  %v99_v13 = vld [vmem:[%s1740_s0 + $0x2a8] sm:$0xff] }
  0x38   :  { %602 = vst [vmem:[%s1743_s3 + $0x1f0] sm:$0xff] %v474_v15  ;;  %603 = vst [vmem:[%s1743_s3 + $0x1f8] sm:$0xff] %v475_v18  ;;  %v349_v26 = vadd.f32 %v707_v2, %v214_v19  ;;  %v350_v27 = vadd.f32 %v707_v2, %v215_v20  ;;  %v351_v28 = vadd.f32 %v707_v2, %v216_v21  ;;  %v476_v31 = vmax.f32 %v348_v22, 0.0  ;;  %v100_v14 = vld [vmem:[%s1740_s0 + $0x2b0] sm:$0xff]  ;;  %v101_v19 = vld [vmem:[%s1740_s0 + $0x2b8] sm:$0xff] }
  0x39   :  { %v220_v29 = vmul.f32 %v702_v1, %v85_v17  ;;  %v352_v32 = vadd.f32 %v707_v2, %v217_v23  ;;  %v353_v33 = vadd.f32 %v707_v2, %v218_v24  ;;  %v354_v34 = vadd.f32 %v707_v2, %v219_v25 }
  0x3a   :  { %v477_v38 = vmax.f32 %v349_v26, 0.0  ;;  %v478_v39 = vmax.f32 %v350_v27, 0.0  ;;  %v479_v40 = vmax.f32 %v351_v28, 0.0  ;;  %604 = vst [vmem:[%s1743_s3 + $0x200] sm:$0xff] %v476_v31  ;;  %v221_v48 = vmul.f32 %v702_v1, %v86_v30 }
  0x3b   :  { %v355_v41 = vadd.f32 %v707_v2, %v220_v29  ;;  %v480_v45 = vmax.f32 %v352_v32, 0.0  ;;  %v481_v46 = vmax.f32 %v353_v33, 0.0  ;;  %v482_v47 = vmax.f32 %v354_v34, 0.0  ;;  %v102_v32 = vld [vmem:[%s1740_s0 + $0x2c0] sm:$0xff] }
  0x3c   :  { %605 = vst [vmem:[%s1743_s3 + $0x208] sm:$0xff] %v477_v38  ;;  %606 = vst [vmem:[%s1743_s3 + $0x210] sm:$0xff] %v478_v39  ;;  %v222_v51 = vmul.f32 %v702_v1, %v87_v35  ;;  %v223_v52 = vmul.f32 %v702_v1, %v88_v36  ;;  %v224_v53 = vmul.f32 %v702_v1, %v89_v37  ;;  %v103_v37 = vld [vmem:[%s1740_s0 + $0x2c8] sm:$0xff]  ;;  %v104_v38 = vld [vmem:[%s1740_s0 + $0x2d0] sm:$0xff] }
  0x3d   :  { %607 = vst [vmem:[%s1743_s3 + $0x218] sm:$0xff] %v479_v40  ;;  %v483_v50 = vmax.f32 %v355_v41, 0.0  ;;  %608 = vst [vmem:[%s1743_s3 + $0x220] sm:$0xff] %v480_v45  ;;  %v356_v54 = vadd.f32 %v707_v2, %v221_v48  ;;  %v225_v55 = vmul.f32 %v702_v1, %v90_v42  ;;  %v226_v56 = vmul.f32 %v702_v1, %v91_v43  ;;  %v105_v39 = vld [vmem:[%s1740_s0 + $0x2d8] sm:$0xff]  ;;  %v107_v45 = vld [vmem:[%s1740_s0 + $0x2e8] sm:$0xff] }
  0x3e   :  { %609 = vst [vmem:[%s1743_s3 + $0x228] sm:$0xff] %v481_v46  ;;  %610 = vst [vmem:[%s1743_s3 + $0x230] sm:$0xff] %v482_v47  ;;  %v227_v57 = vmul.f32 %v702_v1, %v92_v44  ;;  %v357_v58 = vadd.f32 %v707_v2, %v222_v51  ;;  %v358_v59 = vadd.f32 %v707_v2, %v223_v52  ;;  %v106_v44 = vld [vmem:[%s1740_s0 + $0x2e0] sm:$0xff]  ;;  %v108_v46 = vld [vmem:[%s1740_s0 + $0x2f0] sm:$0xff] }
  0x3f   :  { %611 = vst [vmem:[%s1743_s3 + $0x238] sm:$0xff] %v483_v50  ;;  %v359_v60 = vadd.f32 %v707_v2, %v224_v53  ;;  %v228_v61 = vmul.f32 %v702_v1, %v93_v49  ;;  %v484_v63 = vmax.f32 %v356_v54, 0.0  ;;  %v360_v0 = vadd.f32 %v707_v2, %v225_v55  ;;  %v109_v51 = vld [vmem:[%s1740_s0 + $0x2f8] sm:$0xff] }
  0x40   :  { %v361_v3 = vadd.f32 %v707_v2, %v226_v56  ;;  %v362_v4 = vadd.f32 %v707_v2, %v227_v57  ;;  %v485_v8 = vmax.f32 %v357_v58, 0.0  ;;  %v486_v9 = vmax.f32 %v358_v59, 0.0 }
  0x41   :  { %v487_v10 = vmax.f32 %v359_v60, 0.0  ;;  %v363_v11 = vadd.f32 %v707_v2, %v228_v61  ;;  %612 = vst [vmem:[%s1743_s3 + $0x240] sm:$0xff] %v484_v63  ;;  %v488_v15 = vmax.f32 %v360_v0, 0.0  ;;  %v229_v18 = vmul.f32 %v702_v1, %v94_v62  ;;  %v110_v0 = vld [vmem:[%s1740_s0 + $0x300] sm:$0xff] }
  0x42   :  { %v489_v16 = vmax.f32 %v361_v3, 0.0  ;;  %v490_v17 = vmax.f32 %v362_v4, 0.0  ;;  %613 = vst [vmem:[%s1743_s3 + $0x248] sm:$0xff] %v485_v8  ;;  %614 = vst [vmem:[%s1743_s3 + $0x250] sm:$0xff] %v486_v9  ;;  %v230_v21 = vmul.f32 %v702_v1, %v95_v5  ;;  %v231_v22 = vmul.f32 %v702_v1, %v96_v6  ;;  %v112_v8 = vld [vmem:[%s1740_s0 + $0x310] sm:$0xff]  ;;  %v113_v9 = vld [vmem:[%s1740_s0 + $0x318] sm:$0xff] }
  0x43   :  { %615 = vst [vmem:[%s1743_s3 + $0x258] sm:$0xff] %v487_v10  ;;  %v491_v20 = vmax.f32 %v363_v11, 0.0  ;;  %v232_v23 = vmul.f32 %v702_v1, %v97_v7  ;;  %616 = vst [vmem:[%s1743_s3 + $0x260] sm:$0xff] %v488_v15  ;;  %v364_v24 = vadd.f32 %v707_v2, %v229_v18  ;;  %v233_v25 = vmul.f32 %v702_v1, %v98_v12  ;;  %v111_v7 = vld [vmem:[%s1740_s0 + $0x308] sm:$0xff] }
  0x44   :  { %617 = vst [vmem:[%s1743_s3 + $0x268] sm:$0xff] %v489_v16  ;;  %618 = vst [vmem:[%s1743_s3 + $0x270] sm:$0xff] %v490_v17  ;;  %v234_v26 = vmul.f32 %v702_v1, %v99_v13  ;;  %v235_v27 = vmul.f32 %v702_v1, %v100_v14  ;;  %v365_v28 = vadd.f32 %v707_v2, %v230_v21  ;;  %v114_v14 = vld [vmem:[%s1740_s0 + $0x320] sm:$0xff]  ;;  %v115_v15 = vld [vmem:[%s1740_s0 + $0x328] sm:$0xff] }
  0x45   :  { %619 = vst [vmem:[%s1743_s3 + $0x278] sm:$0xff] %v491_v20  ;;  %v366_v29 = vadd.f32 %v707_v2, %v231_v22  ;;  %v367_v30 = vadd.f32 %v707_v2, %v232_v23  ;;  %v236_v31 = vmul.f32 %v702_v1, %v101_v19  ;;  %v492_v33 = vmax.f32 %v364_v24, 0.0  ;;  %v116_v16 = vld [vmem:[%s1740_s0 + $0x330] sm:$0xff]  ;;  %v117_v21 = vld [vmem:[%s1740_s0 + $0x338] sm:$0xff] }
  0x46   :  { %v368_v34 = vadd.f32 %v707_v2, %v233_v25  ;;  %v369_v35 = vadd.f32 %v707_v2, %v234_v26  ;;  %v370_v36 = vadd.f32 %v707_v2, %v235_v27  ;;  %v493_v40 = vmax.f32 %v365_v28, 0.0 }
  0x47   :  { %v494_v41 = vmax.f32 %v366_v29, 0.0  ;;  %v495_v42 = vmax.f32 %v367_v30, 0.0  ;;  %v371_v43 = vadd.f32 %v707_v2, %v236_v31  ;;  %620 = vst [vmem:[%s1743_s3 + $0x280] sm:$0xff] %v492_v33  ;;  %v237_v50 = vmul.f32 %v702_v1, %v102_v32 }
  0x48   :  { %v496_v47 = vmax.f32 %v368_v34, 0.0  ;;  %v497_v48 = vmax.f32 %v369_v35, 0.0  ;;  %v498_v49 = vmax.f32 %v370_v36, 0.0  ;;  %621 = vst [vmem:[%s1743_s3 + $0x288] sm:$0xff] %v493_v40  ;;  %v238_v53 = vmul.f32 %v702_v1, %v103_v37  ;;  %v118_v34 = vld [vmem:[%s1740_s0 + $0x340] sm:$0xff]  ;;  %v120_v40 = vld [vmem:[%s1740_s0 + $0x350] sm:$0xff] }
  0x49   :  { %622 = vst [vmem:[%s1743_s3 + $0x290] sm:$0xff] %v494_v41  ;;  %623 = vst [vmem:[%s1743_s3 + $0x298] sm:$0xff] %v495_v42  ;;  %v499_v52 = vmax.f32 %v371_v43, 0.0  ;;  %v239_v54 = vmul.f32 %v702_v1, %v104_v38  ;;  %v240_v55 = vmul.f32 %v702_v1, %v105_v39  ;;  %v372_v56 = vadd.f32 %v707_v2, %v237_v50  ;;  %v119_v39 = vld [vmem:[%s1740_s0 + $0x348] sm:$0xff] }
  0x4a   :  { %624 = vst [vmem:[%s1743_s3 + $0x2a0] sm:$0xff] %v496_v47  ;;  %625 = vst [vmem:[%s1743_s3 + $0x2a8] sm:$0xff] %v497_v48  ;;  %v241_v57 = vmul.f32 %v702_v1, %v106_v44  ;;  %v242_v58 = vmul.f32 %v702_v1, %v107_v45  ;;  %v243_v59 = vmul.f32 %v702_v1, %v108_v46  ;;  %v1528_v44 = vld [vmem:[%s1742_s2] ss:$0 sm:$0xff]  ;;  %v123_v46 = vld [vmem:[%s1740_s0 + $0x368] sm:$0xff] }
  0x4b   :  { %626 = vst [vmem:[%s1743_s3 + $0x2b0] sm:$0xff] %v498_v49  ;;  %627 = vst [vmem:[%s1743_s3 + $0x2b8] sm:$0xff] %v499_v52  ;;  %v373_v60 = vadd.f32 %v707_v2, %v238_v53  ;;  %v374_v61 = vadd.f32 %v707_v2, %v239_v54  ;;  %v375_v62 = vadd.f32 %v707_v2, %v240_v55  ;;  %v500_v3 = vmax.f32 %v372_v56, 0.0  ;;  %v122_v45 = vld [vmem:[%s1740_s0 + $0x360] sm:$0xff]  ;;  %v124_v47 = vld [vmem:[%s1740_s0 + $0x370] sm:$0xff] }
  0x4c   :  { %v244_v63 = vmul.f32 %v702_v1, %v109_v51  ;;  %v376_v4 = vadd.f32 %v707_v2, %v241_v57  ;;  %v377_v5 = vadd.f32 %v707_v2, %v242_v58  ;;  %v378_v6 = vadd.f32 %v707_v2, %v243_v59  ;;  %v1546_v51 = vld [vmem:[%s1741_s1] ss:$0 sm:$0xff]  ;;  %v125_v53 = vld [vmem:[%s1740_s0 + $0x378] sm:$0xff] }
  0x4d   :  { %v501_v10 = vmax.f32 %v373_v60, 0.0  ;;  %v502_v11 = vmax.f32 %v374_v61, 0.0  ;;  %v503_v12 = vmax.f32 %v375_v62, 0.0  ;;  %628 = vst [vmem:[%s1743_s3 + $0x2c0] sm:$0xff] %v500_v3  ;;  %v245_v20 = vmul.f32 %v702_v1, %v110_v0 }
  0x4e   :  { %v379_v13 = vadd.f32 %v707_v2, %v244_v63  ;;  %v504_v17 = vmax.f32 %v376_v4, 0.0  ;;  %v505_v18 = vmax.f32 %v377_v5, 0.0  ;;  %v506_v19 = vmax.f32 %v378_v6, 0.0  ;;  %v126_v4 = vld [vmem:[%s1740_s0 + $0x380] sm:$0xff] }
  0x4f   :  { %629 = vst [vmem:[%s1743_s3 + $0x2c8] sm:$0xff] %v501_v10  ;;  %630 = vst [vmem:[%s1743_s3 + $0x2d0] sm:$0xff] %v502_v11  ;;  %v246_v23 = vmul.f32 %v702_v1, %v111_v7  ;;  %v247_v24 = vmul.f32 %v702_v1, %v112_v8  ;;  %v248_v25 = vmul.f32 %v702_v1, %v113_v9  ;;  %v127_v9 = vld [vmem:[%s1740_s0 + $0x388] sm:$0xff]  ;;  %v128_v10 = vld [vmem:[%s1740_s0 + $0x390] sm:$0xff] }
  0x50   :  { %631 = vst [vmem:[%s1743_s3 + $0x2d8] sm:$0xff] %v503_v12  ;;  %v507_v22 = vmax.f32 %v379_v13, 0.0  ;;  %632 = vst [vmem:[%s1743_s3 + $0x2e0] sm:$0xff] %v504_v17  ;;  %v380_v26 = vadd.f32 %v707_v2, %v245_v20  ;;  %v249_v27 = vmul.f32 %v702_v1, %v114_v14  ;;  %v250_v28 = vmul.f32 %v702_v1, %v115_v15  ;;  %v129_v11 = vld [vmem:[%s1740_s0 + $0x398] sm:$0xff]  ;;  %v131_v17 = vld [vmem:[%s1740_s0 + $0x3a8] sm:$0xff] }
  0x51   :  { %633 = vst [vmem:[%s1743_s3 + $0x2e8] sm:$0xff] %v505_v18  ;;  %634 = vst [vmem:[%s1743_s3 + $0x2f0] sm:$0xff] %v506_v19  ;;  %v251_v29 = vmul.f32 %v702_v1, %v116_v16  ;;  %v381_v30 = vadd.f32 %v707_v2, %v246_v23  ;;  %v382_v31 = vadd.f32 %v707_v2, %v247_v24  ;;  %v130_v16 = vld [vmem:[%s1740_s0 + $0x3a0] sm:$0xff]  ;;  %v132_v18 = vld [vmem:[%s1740_s0 + $0x3b0] sm:$0xff] }
  0x52   :  { %635 = vst [vmem:[%s1743_s3 + $0x2f8] sm:$0xff] %v507_v22  ;;  %v383_v32 = vadd.f32 %v707_v2, %v248_v25  ;;  %v252_v33 = vmul.f32 %v702_v1, %v117_v21  ;;  %v508_v35 = vmax.f32 %v380_v26, 0.0  ;;  %v384_v36 = vadd.f32 %v707_v2, %v249_v27  ;;  %v121_v1 = vld [vmem:[%s1740_s0 + $0x358] sm:$0xff] }
  0x53   :  { %v385_v37 = vadd.f32 %v707_v2, %v250_v28  ;;  %v386_v38 = vadd.f32 %v707_v2, %v251_v29  ;;  %v509_v41 = vmax.f32 %v381_v30, 0.0  ;;  %v510_v42 = vmax.f32 %v382_v31, 0.0  ;;  %v133_v23 = vld [vmem:[%s1740_s0 + $0x3b8] sm:$0xff] }
  0x54   :  { %v511_v43 = vmax.f32 %v383_v32, 0.0  ;;  %v387_v2 = vadd.f32 %v1528_v44, %v252_v33  ;;  %636 = vst [vmem:[%s1743_s3 + $0x300] sm:$0xff] %v508_v35  ;;  %v512_v48 = vmax.f32 %v384_v36, 0.0  ;;  %v253_v52 = vmul.f32 %v1546_v51, %v118_v34  ;;  %v134_v36 = vld [vmem:[%s1740_s0 + $0x3c0] sm:$0xff] }
  0x55   :  { %v513_v49 = vmax.f32 %v385_v37, 0.0  ;;  %v514_v50 = vmax.f32 %v386_v38, 0.0  ;;  %637 = vst [vmem:[%s1743_s3 + $0x308] sm:$0xff] %v509_v41  ;;  %638 = vst [vmem:[%s1743_s3 + $0x310] sm:$0xff] %v510_v42  ;;  %v254_v55 = vmul.f32 %v1546_v51, %v119_v39  ;;  %v255_v56 = vmul.f32 %v1546_v51, %v120_v40  ;;  %v136_v41 = vld [vmem:[%s1740_s0 + $0x3d0] sm:$0xff]  ;;  %v137_v42 = vld [vmem:[%s1740_s0 + $0x3d8] sm:$0xff] }
  0x56   :  { %639 = vst [vmem:[%s1743_s3 + $0x318] sm:$0xff] %v511_v43  ;;  %v515_v54 = vmax.f32 %v387_v2, 0.0  ;;  %v256_v57 = vmul.f32 %v1546_v51, %v121_v1  ;;  %640 = vst [vmem:[%s1743_s3 + $0x320] sm:$0xff] %v512_v48  ;;  %v388_v58 = vadd.f32 %v1528_v44, %v253_v52  ;;  %v257_v59 = vmul.f32 %v1546_v51, %v122_v45  ;;  %v135_v1 = vld [vmem:[%s1740_s0 + $0x3c8] sm:$0xff] }
  0x57   :  { %641 = vst [vmem:[%s1743_s3 + $0x328] sm:$0xff] %v513_v49  ;;  %642 = vst [vmem:[%s1743_s3 + $0x330] sm:$0xff] %v514_v50  ;;  %v258_v60 = vmul.f32 %v1546_v51, %v123_v46  ;;  %v259_v61 = vmul.f32 %v1546_v51, %v124_v47  ;;  %v389_v62 = vadd.f32 %v1528_v44, %v254_v55  ;;  %v138_v47 = vld [vmem:[%s1740_s0 + $0x3e0] sm:$0xff]  ;;  %v139_v48 = vld [vmem:[%s1740_s0 + $0x3e8] sm:$0xff] }
  0x58   :  { %643 = vst [vmem:[%s1743_s3 + $0x338] sm:$0xff] %v515_v54  ;;  %v390_v63 = vadd.f32 %v1528_v44, %v255_v56  ;;  %v391_v0 = vadd.f32 %v1528_v44, %v256_v57  ;;  %v260_v3 = vmul.f32 %v1546_v51, %v125_v53  ;;  %v516_v5 = vmax.f32 %v388_v58, 0.0  ;;  %v140_v49 = vld [vmem:[%s1740_s0 + $0x3f0] sm:$0xff]  ;;  %v141_v55 = vld [vmem:[%s1740_s0 + $0x3f8] sm:$0xff] }
  0x59   :  { %v392_v6 = vadd.f32 %v1528_v44, %v257_v59  ;;  %v393_v7 = vadd.f32 %v1528_v44, %v258_v60  ;;  %v394_v8 = vadd.f32 %v1528_v44, %v259_v61  ;;  %v517_v12 = vmax.f32 %v389_v62, 0.0 }
  0x5a   :  { %v518_v13 = vmax.f32 %v390_v63, 0.0  ;;  %v519_v14 = vmax.f32 %v391_v0, 0.0  ;;  %v395_v15 = vadd.f32 %v1528_v44, %v260_v3  ;;  %644 = vst [vmem:[%s1743_s3 + $0x340] sm:$0xff] %v516_v5  ;;  %v261_v22 = vmul.f32 %v1546_v51, %v126_v4 }
  0x5b   :  { %v520_v19 = vmax.f32 %v392_v6, 0.0  ;;  %v521_v20 = vmax.f32 %v393_v7, 0.0  ;;  %v522_v21 = vmax.f32 %v394_v8, 0.0  ;;  %645 = vst [vmem:[%s1743_s3 + $0x348] sm:$0xff] %v517_v12  ;;  %v262_v25 = vmul.f32 %v1546_v51, %v127_v9 }
  0x5c   :  { %646 = vst [vmem:[%s1743_s3 + $0x350] sm:$0xff] %v518_v13  ;;  %647 = vst [vmem:[%s1743_s3 + $0x358] sm:$0xff] %v519_v14  ;;  %v523_v24 = vmax.f32 %v395_v15, 0.0  ;;  %v263_v26 = vmul.f32 %v1546_v51, %v128_v10  ;;  %v264_v27 = vmul.f32 %v1546_v51, %v129_v11  ;;  %v396_v28 = vadd.f32 %v1528_v44, %v261_v22 }
  0x5d   :  { %648 = vst [vmem:[%s1743_s3 + $0x360] sm:$0xff] %v520_v19  ;;  %649 = vst [vmem:[%s1743_s3 + $0x368] sm:$0xff] %v521_v20  ;;  %v265_v29 = vmul.f32 %v1546_v51, %v130_v16  ;;  %v266_v30 = vmul.f32 %v1546_v51, %v131_v17  ;;  %v267_v31 = vmul.f32 %v1546_v51, %v132_v18 }
  0x5e   :  { %650 = vst [vmem:[%s1743_s3 + $0x370] sm:$0xff] %v522_v21  ;;  %651 = vst [vmem:[%s1743_s3 + $0x378] sm:$0xff] %v523_v24  ;;  %v397_v32 = vadd.f32 %v1528_v44, %v262_v25  ;;  %v398_v33 = vadd.f32 %v1528_v44, %v263_v26  ;;  %v399_v34 = vadd.f32 %v1528_v44, %v264_v27  ;;  %v524_v37 = vmax.f32 %v396_v28, 0.0 }
  0x5f   :  { %v268_v35 = vmul.f32 %v1546_v51, %v133_v23  ;;  %v400_v38 = vadd.f32 %v1528_v44, %v265_v29  ;;  %v401_v39 = vadd.f32 %v1528_v44, %v266_v30  ;;  %v402_v40 = vadd.f32 %v1528_v44, %v267_v31 }
  0x60   :  { %v525_v43 = vmax.f32 %v397_v32, 0.0  ;;  %v526_v2 = vmax.f32 %v398_v33, 0.0  ;;  %v527_v45 = vmax.f32 %v399_v34, 0.0  ;;  %652 = vst [vmem:[%s1743_s3 + $0x380] sm:$0xff] %v524_v37  ;;  %v269_v54 = vmul.f32 %v1546_v51, %v134_v36 }
  0x61   :  { %v403_v46 = vadd.f32 %v1528_v44, %v268_v35  ;;  %v528_v50 = vmax.f32 %v400_v38, 0.0  ;;  %v529_v52 = vmax.f32 %v401_v39, 0.0  ;;  %v530_v53 = vmax.f32 %v402_v40, 0.0 }
  0x62   :  { %653 = vst [vmem:[%s1743_s3 + $0x388] sm:$0xff] %v525_v43  ;;  %654 = vst [vmem:[%s1743_s3 + $0x390] sm:$0xff] %v526_v2  ;;  %v270_v57 = vmul.f32 %v1546_v51, %v135_v1  ;;  %v271_v58 = vmul.f32 %v1546_v51, %v136_v41  ;;  %v272_v59 = vmul.f32 %v1546_v51, %v137_v42 }
  0x63   :  { %655 = vst [vmem:[%s1743_s3 + $0x398] sm:$0xff] %v527_v45  ;;  %v531_v56 = vmax.f32 %v403_v46, 0.0  ;;  %656 = vst [vmem:[%s1743_s3 + $0x3a0] sm:$0xff] %v528_v50  ;;  %v404_v60 = vadd.f32 %v1528_v44, %v269_v54  ;;  %v273_v61 = vmul.f32 %v1546_v51, %v138_v47  ;;  %v274_v62 = vmul.f32 %v1546_v51, %v139_v48 }
  0x64   :  { %657 = vst [vmem:[%s1743_s3 + $0x3a8] sm:$0xff] %v529_v52  ;;  %658 = vst [vmem:[%s1743_s3 + $0x3b0] sm:$0xff] %v530_v53  ;;  %v275_v63 = vmul.f32 %v1546_v51, %v140_v49  ;;  %v405_v0 = vadd.f32 %v1528_v44, %v270_v57  ;;  %v406_v3 = vadd.f32 %v1528_v44, %v271_v58 }
  0x65   :  { %659 = vst [vmem:[%s1743_s3 + $0x3b8] sm:$0xff] %v531_v56  ;;  %v407_v4 = vadd.f32 %v1528_v44, %v272_v59  ;;  %v276_v5 = vmul.f32 %v1546_v51, %v141_v55  ;;  %v532_v6 = vmax.f32 %v404_v60, 0.0  ;;  %v408_v7 = vadd.f32 %v1528_v44, %v273_v61 }
  0x66   :  { %v409_v8 = vadd.f32 %v1528_v44, %v274_v62  ;;  %v410_v9 = vadd.f32 %v1528_v44, %v275_v63  ;;  %v533_v10 = vmax.f32 %v405_v0, 0.0  ;;  %v534_v11 = vmax.f32 %v406_v3, 0.0 }
  0x67   :  { %v535_v12 = vmax.f32 %v407_v4, 0.0  ;;  %v411_v13 = vadd.f32 %v1528_v44, %v276_v5  ;;  %660 = vst [vmem:[%s1743_s3 + $0x3c0] sm:$0xff] %v532_v6  ;;  %v536_v14 = vmax.f32 %v408_v7, 0.0 }
  0x68   :  { %v537_v15 = vmax.f32 %v409_v8, 0.0  ;;  %v538_v16 = vmax.f32 %v410_v9, 0.0  ;;  %661 = vst [vmem:[%s1743_s3 + $0x3c8] sm:$0xff] %v533_v10  ;;  %662 = vst [vmem:[%s1743_s3 + $0x3d0] sm:$0xff] %v534_v11 }
  0x69   :  { %663 = vst [vmem:[%s1743_s3 + $0x3d8] sm:$0xff] %v535_v12  ;;  %v539_v44 = vmax.f32 %v411_v13, 0.0  ;;  %664 = vst [vmem:[%s1743_s3 + $0x3e0] sm:$0xff] %v536_v14 }
  0x6a   :  { %665 = vst [vmem:[%s1743_s3 + $0x3e8] sm:$0xff] %v537_v15  ;;  %666 = vst [vmem:[%s1743_s3 + $0x3f0] sm:$0xff] %v538_v16 }
  0x6b   :  { %667 = vst [vmem:[%s1743_s3 + $0x3f8] sm:$0xff] %v539_v44 }

// kernel: conv2d_transpose_block.2
= control target key start
LH: loop header
LB: loop body
LE: loop exit
PB: predicated region body
PF: predicated region fallthrough
CT: control target
= control target key end

     0   :  { %s2792_s30 = smov 0   ;;  %s4718_s0 = inlined_call_operand.vmem [shape: bf16[1024,16], index: 0, kind: input, shape index: {}]   ;;  %s4719_s1 = inlined_call_operand.vmem [shape: bf16[16,128], index: 1, kind: input, shape index: {}]   ;;  %s4720_s2 = inlined_call_operand.vmem [shape: f32[1,128], index: 2, kind: input, shape index: {}]   ;;  %s4721_s3 = inlined_call_operand.vmem [shape: s32[1024,1], index: 3, kind: input, shape index: {}]   ;;  %s4722_s4 = inlined_call_operand.vmem [shape: s32[1024,1], index: 4, kind: input, shape index: {}]   ;;  %s4723_s5 = inlined_call_operand.vmem [shape: s32[1,128], index: 5, kind: input, shape index: {}]   ;;  %s4724_s6 = inlined_call_operand.vmem [shape: s32[1,128], index: 6, kind: input, shape index: {}]   ;;  %s4725_s7 = inlined_call_operand.vmem [shape: f32[1024,128], index: 7, kind: output, shape index: {0}]   ;;  %s4726_s8 = inlined_call_operand.vmem [shape: f32[16,128], index: 8, kind: output, shape index: {1}]   ;;  %s4727_s9 = inlined_call_operand.vmem [shape: f32[16,128], index: 9, kind: output, shape index: {2}]  }
   0x1 LB: > { %s2798_s10 = sadd.s32 4294967295, %s2739_s30   ;;  %p2485_p0 = scmp.ge.s32.totalorder %s2739_s30, 1  ;;  %s2739_s30 = sphi %s2792_s30, %s20_s30  }
   0x2   : > { %p315_p1 = scmp.lt.s32.totalorder %s2739_s30, 3 }
   0x4   : > { %p316_p2 = pnand %p2485_p0, %p315_p1 }
   0x6   : > { %319 = sbr.rel (%p316_p2) target bundleno = 478 (0x1de), region = 48 }
   0xb   : > { %s2486_s11 = sshll.u32 %s2798_s10, 6  ;;  %v2741_v0 = vmov 0   ;;  %v2676_v1 = vld [vmem:[%s4719_s1] sm:$0xff]   ;;  %vm641_vm0 = vcmask 130048   ;;  %p393_p4 = scmp.lt.s32.totalorder %s2798_s10, 1 }
   0xc   : > { %2675 = vset.pattern.permute.xlu1 %v2741_v0  ;;  %2674 = vset.pattern.permute.xlu0 %v2741_v0  ;;  %p370_p3 = scmp.lt.s32.totalorder %s2486_s11, 127 }
   0xd   : > { %2597 = vmatprep.subr.bf16.mxu0 %v2676_v1  ;;  %2663 = vmatprep.subr.bf16.mxu1 %v2676_v1  ;;  %s5050_s10 = smov (!%p393_p4, %s2798_s10), 1 }
   0xe   : > { %s5048_s11 = smov (!%p370_p3, %s2486_s11), 127  ;;  %2598 = vmatpush3.bf16.msra.mxu0 %v2676_v1  ;;  %2664 = vmatpush3.bf16.msra.mxu1 %v2676_v1 }
   0xf   : > { %s2806_s14 = sshll.u32 %s5048_s11, 3  ;;  %s2487_s18 = sshll.u32 %s5048_s11, 2 }
  0x10   : > { %s2812_s17 = scalar_lea.vmem %s4721_s3, %s2806_s14  ;;  %s2823_s21 = scalar_lea.vmem %s4718_s0, %s2487_s18 }
  0x11   : > { %v1093_v2 = vld [vmem:[%s2812_s17 + $0x10] sm:$0xff]  ;;  %v1091_v3 = vld [vmem:[%s2812_s17] sm:$0xff]  ;;  %v1094_v4 = vld [vmem:[%s2812_s17 + $0x18] sm:$0xff]  ;;  %s2951_s24 = scalar_lea.vmem %s4722_s4, %s2806_s14  ;;  %s3086_s29 = scalar_lea.vmem %s4725_s7, %s2806_s14 }
  0x12   : > { %1228 = vperm.xlu1 %2675, %v1093_v2   ;;  %1222 = vperm.xlu0 %2674, %v1091_v3   ;;  %v1092_v5 = vld [vmem:[%s2812_s17 + $0x8] sm:$0xff]  ;;  %v1095_v7 = vld [vmem:[%s2812_s17 + $0x20] sm:$0xff]  ;;  %v1098_v8 = vld [vmem:[%s2812_s17 + $0x38] sm:$0xff] }
  0x13   : > { %v1096_v6 = vld [vmem:[%s2812_s17 + $0x28] sm:$0xff]  ;;  %v2677_v9 = vld [vmem:[%s2823_s21] sm:$0xff]   ;;  %v1097_v10 = vld [vmem:[%s2812_s17 + $0x30] sm:$0xff] }
  0x14   : > { %v2678_v11 = vld [vmem:[%s2823_s21 + $0x8] sm:$0xff]   ;;  %2599 = vmatprep.mubr.msk.bf16.mxu0 %vm641_vm0, %v2677_v9  ;;  %v2679_v12 = vld [vmem:[%s2823_s21 + $0x10] sm:$0xff]   ;;  %v1099_v14 = vld [vmem:[%s2812_s17 + $0x40] sm:$0xff] }
  0x15   : > { %2600 = vmatmul.mubr.msk.bf16.vlgmr.msra.gmra.mxu0 %vm641_vm0, %v2678_v11  ;;  %v1100_v13 = vld [vmem:[%s2812_s17 + $0x48] sm:$0xff]  ;;  %v2680_v15 = vld [vmem:[%s2823_s21 + $0x18] sm:$0xff]   ;;  %v1101_v17 = vld [vmem:[%s2812_s17 + $0x50] sm:$0xff] }
  0x16   : > { %1231 = vperm.xlu1 %2675, %v1094_v4   ;;  %1225 = vperm.xlu0 %2674, %v1092_v5   ;;  %v1102_v16 = vld [vmem:[%s2812_s17 + $0x58] sm:$0xff]  ;;  %v2681_v18 = vld [vmem:[%s2823_s21 + $0x20] sm:$0xff]   ;;  %v1104_v19 = vld [vmem:[%s2812_s17 + $0x68] sm:$0xff] }
  0x17   : > { %2603 = vmatprep.mubr.msk.bf16.mxu0 %vm641_vm0, %v2679_v12  ;;  %v1103_v20 = vld [vmem:[%s2812_s17 + $0x60] sm:$0xff]  ;;  %v1106_v21 = vld [vmem:[%s2812_s17 + $0x78] sm:$0xff]  ;;  %v2682_v22 = vld [vmem:[%s2823_s21 + $0x28] sm:$0xff]  }
  0x18   : > { %v1105_v23 = vld [vmem:[%s2812_s17 + $0x70] sm:$0xff]  ;;  %v1108_v25 = vld [vmem:[%s2812_s17 + $0x88] sm:$0xff]  ;;  %v1107_v26 = vld [vmem:[%s2812_s17 + $0x80] sm:$0xff] }
  0x19   : > { %v2683_v24 = vld [vmem:[%s2823_s21 + $0x30] sm:$0xff]   ;;  %v2684_v27 = vld [vmem:[%s2823_s21 + $0x38] sm:$0xff]   ;;  %v2685_v30 = vld [vmem:[%s2823_s21 + $0x40] sm:$0xff]  }
  0x1a   : > { %1237 = vperm.xlu1 %2675, %v1096_v6   ;;  %1234 = vperm.xlu0 %2674, %v1095_v7   ;;  %v1110_v28 = vld [vmem:[%s2812_s17 + $0x98] sm:$0xff]  ;;  %v1109_v29 = vld [vmem:[%s2812_s17 + $0x90] sm:$0xff]  ;;  %v2693_v31 = vld [vmem:[%s2823_s21 + $0x80] sm:$0xff]  }
  0x1b   : > { %v2694_v32 = vld [vmem:[%s2823_s21 + $0x88] sm:$0xff]   ;;  %v1111_v34 = vld [vmem:[%s2812_s17 + $0xa0] sm:$0xff]  ;;  %2631 = vmatprep.mubr.msk.bf16.mxu1 %vm641_vm0, %v2693_v31  ;;  %v2695_v35 = vld [vmem:[%s2823_s21 + $0x90] sm:$0xff]  }
  0x1c   : > { %v1112_v33 = vld [vmem:[%s2812_s17 + $0xa8] sm:$0xff]  ;;  %2632 = vmatmul.mubr.msk.bf16.vlgmr.msra.gmra.mxu1 %vm641_vm0, %v2694_v32  ;;  %v1114_v37 = vld [vmem:[%s2812_s17 + $0xb8] sm:$0xff]  ;;  %v1113_v38 = vld [vmem:[%s2812_s17 + $0xb0] sm:$0xff] }
  0x1d   : > { %2604 = vmatmul.mubr.msk.bf16.gmra.mxu0 %vm641_vm0, %v2680_v15  ;;  %v2686_v36 = vld [vmem:[%s2823_s21 + $0x48] sm:$0xff]   ;;  %v2687_v39 = vld [vmem:[%s2823_s21 + $0x50] sm:$0xff]   ;;  %2635 = vmatprep.mubr.msk.bf16.mxu1 %vm641_vm0, %v2695_v35  ;;  %v2696_v40 = vld [vmem:[%s2823_s21 + $0x98] sm:$0xff]  }
  0x1e   : > { %1243 = vperm.xlu1 %2675, %v1098_v8   ;;  %1240 = vperm.xlu0 %2674, %v1097_v10   ;;  %v2697_v41 = vld [vmem:[%s2823_s21 + $0xa0] sm:$0xff]   ;;  %v1116_v42 = vld [vmem:[%s2812_s17 + $0xc8] sm:$0xff]  ;;  %v2688_v44 = vld [vmem:[%s2823_s21 + $0x58] sm:$0xff]  }
  0x1f   : > { %2607 = vmatprep.mubr.msk.bf16.mxu0 %vm641_vm0, %v2681_v18  ;;  %v1115_v43 = vld [vmem:[%s2812_s17 + $0xc0] sm:$0xff]  ;;  %v1118_v45 = vld [vmem:[%s2812_s17 + $0xd8] sm:$0xff]  ;;  %v1117_v46 = vld [vmem:[%s2812_s17 + $0xd0] sm:$0xff] }
  0x20   : > { %v2689_v47 = vld [vmem:[%s2823_s21 + $0x60] sm:$0xff]   ;;  %v2698_v48 = vld [vmem:[%s2823_s21 + $0xa8] sm:$0xff]   ;;  %v2699_v49 = vld [vmem:[%s2823_s21 + $0xb0] sm:$0xff]  }
  0x21   : > { %v1120_v50 = vld [vmem:[%s2812_s17 + $0xe8] sm:$0xff]  ;;  %v1119_v51 = vld [vmem:[%s2812_s17 + $0xe0] sm:$0xff]  ;;  %v1122_v53 = vld [vmem:[%s2812_s17 + $0xf8] sm:$0xff] }
  0x22   : > { %1249 = vperm.xlu1 %2675, %v1100_v13   ;;  %1246 = vperm.xlu0 %2674, %v1099_v14   ;;  %v2690_v52 = vld [vmem:[%s2823_s21 + $0x68] sm:$0xff]   ;;  %v1121_v54 = vld [vmem:[%s2812_s17 + $0xf0] sm:$0xff]  ;;  %v2700_v56 = vld [vmem:[%s2823_s21 + $0xb8] sm:$0xff]  }
  0x23   : > { %v2691_v55 = vld [vmem:[%s2823_s21 + $0x70] sm:$0xff]   ;;  %v2701_v57 = vld [vmem:[%s2823_s21 + $0xc0] sm:$0xff]   ;;  %v1124_v58 = vld [vmem:[%s2812_s17 + $0x108] sm:$0xff] }
  0x24   : > { %2636 = vmatmul.mubr.msk.bf16.gmra.mxu1 %vm641_vm0, %v2696_v40  ;;  %v1123_v59 = vld [vmem:[%s2812_s17 + $0x100] sm:$0xff]  ;;  %v2692_v60 = vld [vmem:[%s2823_s21 + $0x78] sm:$0xff]   ;;  %v1125_v62 = vld [vmem:[%s2812_s17 + $0x110] sm:$0xff] }
  0x25   : > { %2608 = vmatmul.mubr.msk.bf16.gmra.mxu0 %vm641_vm0, %v2682_v22  ;;  %2639 = vmatprep.mubr.msk.bf16.mxu1 %vm641_vm0, %v2697_v41  ;;  %v1126_v61 = vld [vmem:[%s2812_s17 + $0x118] sm:$0xff]  ;;  %v2702_v63 = vld [vmem:[%s2823_s21 + $0xc8] sm:$0xff]   ;;  %v2703_v0 = vld [vmem:[%s2823_s21 + $0xd0] sm:$0xff]  }
  0x26   : > { %1255 = vperm.xlu1 %2675, %v1102_v16   ;;  %1252 = vperm.xlu0 %2674, %v1101_v17   ;;  %v1128_v1 = vld [vmem:[%s2812_s17 + $0x128] sm:$0xff]  ;;  %v1127_v2 = vld [vmem:[%s2812_s17 + $0x120] sm:$0xff]  ;;  %v1130_v3 = vld [vmem:[%s2812_s17 + $0x138] sm:$0xff] }
  0x27   : > { %2611 = vmatprep.mubr.msk.bf16.mxu0 %vm641_vm0, %v2683_v24  ;;  %v1129_v4 = vld [vmem:[%s2812_s17 + $0x130] sm:$0xff]  ;;  %v2704_v5 = vld [vmem:[%s2823_s21 + $0xd8] sm:$0xff]   ;;  %v2705_v6 = vld [vmem:[%s2823_s21 + $0xe0] sm:$0xff]  }
  0x28   : > { %v1132_v7 = vld [vmem:[%s2812_s17 + $0x148] sm:$0xff]  ;;  %v1131_v8 = vld [vmem:[%s2812_s17 + $0x140] sm:$0xff]  ;;  %v1134_v9 = vld [vmem:[%s2812_s17 + $0x158] sm:$0xff] }
  0x29   : > { %v1133_v10 = vld [vmem:[%s2812_s17 + $0x150] sm:$0xff]  ;;  %v2706_v11 = vld [vmem:[%s2823_s21 + $0xe8] sm:$0xff]   ;;  %v1135_v14 = vld [vmem:[%s2812_s17 + $0x160] sm:$0xff] }
  0x2a   : > { %1261 = vperm.xlu1 %2675, %v1104_v19   ;;  %1258 = vperm.xlu0 %2674, %v1103_v20   ;;  %v2707_v12 = vld [vmem:[%s2823_s21 + $0xf0] sm:$0xff]   ;;  %v1136_v13 = vld [vmem:[%s2812_s17 + $0x168] sm:$0xff]  ;;  %v1138_v15 = vld [vmem:[%s2812_s17 + $0x178] sm:$0xff] }
  0x2b   : > { %v1137_v16 = vld [vmem:[%s2812_s17 + $0x170] sm:$0xff]  ;;  %v2708_v17 = vld [vmem:[%s2823_s21 + $0xf8] sm:$0xff]   ;;  %v1140_v18 = vld [vmem:[%s2812_s17 + $0x188] sm:$0xff] }
  0x2c   : > { %2640 = vmatmul.mubr.msk.bf16.gmra.mxu1 %vm641_vm0, %v2698_v48  ;;  %v1139_v19 = vld [vmem:[%s2812_s17 + $0x180] sm:$0xff]  ;;  %v1142_v20 = vld [vmem:[%s2812_s17 + $0x198] sm:$0xff]  ;;  %v1144_v22 = vld [vmem:[%s2812_s17 + $0x1a8] sm:$0xff] }
  0x2d   : > { %2612 = vmatmul.mubr.msk.bf16.gmra.mxu0 %vm641_vm0, %v2684_v27  ;;  %2643 = vmatprep.mubr.msk.bf16.mxu1 %vm641_vm0, %v2699_v49  ;;  %v1146_v24 = vld [vmem:[%s2812_s17 + $0x1b8] sm:$0xff]  ;;  %v1147_v27 = vld [vmem:[%s2812_s17 + $0x1c0] sm:$0xff]  ;;  %v1157_v41 = vld [vmem:[%s2951_s24 + $0x10] sm:$0xff] }
  0x2e   : > { %1267 = vperm.xlu1 %2675, %v1106_v21   ;;  %1264 = vperm.xlu0 %2674, %v1105_v23   ;;  %v1141_v21 = vld [vmem:[%s2812_s17 + $0x190] sm:$0xff]  ;;  %v1143_v23 = vld [vmem:[%s2812_s17 + $0x1a0] sm:$0xff]  ;;  %v1154_v32 = vld [vmem:[%s2812_s17 + $0x1f8] sm:$0xff] }
  0x2f   : > { %2615 = vmatprep.mubr.msk.bf16.mxu0 %vm641_vm0, %v2685_v30  ;;  %v1152_v30 = vld [vmem:[%s2812_s17 + $0x1e8] sm:$0xff]  ;;  %v1151_v31 = vld [vmem:[%s2812_s17 + $0x1e0] sm:$0xff]  ;;  %v1158_v40 = vld [vmem:[%s2951_s24 + $0x18] sm:$0xff] }
  0x30   : > { %v1162_v48 = vld [vmem:[%s2951_s24 + $0x38] sm:$0xff]  ;;  %v1161_v49 = vld [vmem:[%s2951_s24 + $0x30] sm:$0xff] }
  0x32   : > { %1273 = vperm.xlu1 %2675, %v1108_v25   ;;  %1270 = vperm.xlu0 %2674, %v1107_v26   ;;  %v1145_v25 = vld [vmem:[%s2812_s17 + $0x1b0] sm:$0xff]  ;;  %v1148_v26 = vld [vmem:[%s2812_s17 + $0x1c8] sm:$0xff] }
  0x34   : > { %2644 = vmatmul.mubr.msk.bf16.gmra.mxu1 %vm641_vm0, %v2700_v56  ;;  %v1166_v56 = vld [vmem:[%s2951_s24 + $0x58] sm:$0xff] }
  0x35   : > { %2616 = vmatmul.mubr.msk.bf16.gmra.mxu0 %vm641_vm0, %v2686_v36  ;;  %2647 = vmatprep.mubr.msk.bf16.mxu1 %vm641_vm0, %v2701_v57  ;;  %v1156_v36 = vld [vmem:[%s2951_s24 + $0x8] sm:$0xff]  ;;  %v1165_v57 = vld [vmem:[%s2951_s24 + $0x50] sm:$0xff] }
  0x36   : > { %1279 = vperm.xlu1 %2675, %v1110_v28   ;;  %1276 = vperm.xlu0 %2674, %v1109_v29   ;;  %v1150_v28 = vld [vmem:[%s2812_s17 + $0x1d8] sm:$0xff]  ;;  %v1149_v29 = vld [vmem:[%s2812_s17 + $0x1d0] sm:$0xff] }
  0x37   : > { %2619 = vmatprep.mubr.msk.bf16.mxu0 %vm641_vm0, %v2687_v39 }
  0x3a   : > { %1285 = vperm.xlu1 %2675, %v1112_v33   ;;  %1282 = vperm.xlu0 %2674, %v1111_v34   ;;  %v1153_v33 = vld [vmem:[%s2812_s17 + $0x1f0] sm:$0xff]  ;;  %s2494_s17 = sshll.u32 %s5050_s10, 3 }
  0x3b   : > { %s396_s20 = scalar_lea.vmem %s4726_s8, %s2494_s17  ;;  %s400_s23 = scalar_lea.vmem %s4727_s9, %s2494_s17 }
  0x3c   : > { %2648 = vmatmul.mubr.msk.bf16.gmra.mxu1 %vm641_vm0, %v2702_v63 }
  0x3d   : > { %2620 = vmatmul.mubr.msk.bf16.gmra.mxu0 %vm641_vm0, %v2688_v44  ;;  %2651 = vmatprep.mubr.msk.bf16.mxu1 %vm641_vm0, %v2703_v0  ;;  %v1160_v44 = vld [vmem:[%s2951_s24 + $0x28] sm:$0xff]  ;;  %v1170_v0 = vld [vmem:[%s2951_s24 + $0x78] sm:$0xff] }
  0x3e   : > { %1291 = vperm.xlu1 %2675, %v1114_v37   ;;  %1288 = vperm.xlu0 %2674, %v1113_v38   ;;  %v1155_v37 = vld [vmem:[%s2951_s24] sm:$0xff] }
  0x3f   : > { %2623 = vmatprep.mubr.msk.bf16.mxu0 %vm641_vm0, %v2689_v47 }
  0x42   : > { %1297 = vperm.xlu1 %2675, %v1116_v42   ;;  %1294 = vperm.xlu0 %2674, %v1115_v43  }
  0x44   : > { %2652 = vmatmul.mubr.msk.bf16.gmra.mxu1 %vm641_vm0, %v2704_v5  ;;  %v1171_v5 = vld [vmem:[%s2951_s24 + $0x80] sm:$0xff] }
  0x45   : > { %2624 = vmatmul.mubr.msk.bf16.gmra.mxu0 %vm641_vm0, %v2690_v52  ;;  %2655 = vmatprep.mubr.msk.bf16.mxu1 %vm641_vm0, %v2705_v6  ;;  %v1164_v52 = vld [vmem:[%s2951_s24 + $0x48] sm:$0xff] }
  0x46   : > { %1303 = vperm.xlu1 %2675, %v1118_v45   ;;  %1300 = vperm.xlu0 %2674, %v1117_v46   ;;  %v1159_v45 = vld [vmem:[%s2951_s24 + $0x20] sm:$0xff] }
  0x47   : > { %2627 = vmatprep.mubr.msk.bf16.mxu0 %vm641_vm0, %v2691_v55 }
  0x4a   : > { %1309 = vperm.xlu1 %2675, %v1120_v50   ;;  %1306 = vperm.xlu0 %2674, %v1119_v51  }
  0x4c   : > { %2656 = vmatmul.mubr.msk.bf16.gmra.mxu1 %vm641_vm0, %v2706_v11 }
  0x4d   : > { %2628 = vmatmul.mubr.msk.bf16.gmra.mxu0 %vm641_vm0, %v2692_v60  ;;  %2659 = vmatprep.mubr.msk.bf16.mxu1 %vm641_vm0, %v2707_v12  ;;  %v1168_v60 = vld [vmem:[%s2951_s24 + $0x68] sm:$0xff] }
  0x4e   : > { %1315 = vperm.xlu1 %2675, %v1122_v53   ;;  %1312 = vperm.xlu0 %2674, %v1121_v54   ;;  %v1163_v53 = vld [vmem:[%s2951_s24 + $0x40] sm:$0xff]  ;;  %v1176_v12 = vld [vmem:[%s2951_s24 + $0xa8] sm:$0xff] }
  0x52   : > { %1321 = vperm.xlu1 %2675, %v1124_v58   ;;  %1318 = vperm.xlu0 %2674, %v1123_v59  }
  0x54   : > { %2660 = vmatmul.mubr.msk.bf16.gmra.mxu1 %vm641_vm0, %v2708_v17  ;;  %v1177_v17 = vld [vmem:[%s2951_s24 + $0xb0] sm:$0xff] }
  0x56   : > { %1327 = vperm.xlu1 %2675, %v1126_v61   ;;  %1324 = vperm.xlu0 %2674, %v1125_v62   ;;  %v1167_v61 = vld [vmem:[%s2951_s24 + $0x60] sm:$0xff] }
  0x5a   : > { %1333 = vperm.xlu1 %2675, %v1128_v1   ;;  %1330 = vperm.xlu0 %2674, %v1127_v2   ;;  %v1169_v1 = vld [vmem:[%s2951_s24 + $0x70] sm:$0xff] }
  0x5e   : > { %1339 = vperm.xlu1 %2675, %v1130_v3   ;;  %1336 = vperm.xlu0 %2674, %v1129_v4   ;;  %v1172_v4 = vld [vmem:[%s2951_s24 + $0x88] sm:$0xff] }
  0x62   : > { %1345 = vperm.xlu1 %2675, %v1132_v7   ;;  %1342 = vperm.xlu0 %2674, %v1131_v8   ;;  %v1174_v8 = vld [vmem:[%s2951_s24 + $0x98] sm:$0xff] }
  0x66   : > { %1351 = vperm.xlu1 %2675, %v1134_v9   ;;  %1348 = vperm.xlu0 %2674, %v1133_v10   ;;  %v1173_v9 = vld [vmem:[%s2951_s24 + $0x90] sm:$0xff] }
  0x6a   : > { %1357 = vperm.xlu1 %2675, %v1136_v13   ;;  %1354 = vperm.xlu0 %2674, %v1135_v14   ;;  %v1175_v13 = vld [vmem:[%s2951_s24 + $0xa0] sm:$0xff] }
  0x6e   : > { %1363 = vperm.xlu1 %2675, %v1138_v15   ;;  %1360 = vperm.xlu0 %2674, %v1137_v16   ;;  %v1178_v16 = vld [vmem:[%s2951_s24 + $0xb8] sm:$0xff] }
  0x72   : > { %1369 = vperm.xlu1 %2675, %v1140_v18   ;;  %1366 = vperm.xlu0 %2674, %v1139_v19  }
  0x76   : > { %1375 = vperm.xlu1 %2675, %v1142_v20   ;;  %1372 = vperm.xlu0 %2674, %v1141_v21   ;;  %v1180_v20 = vld [vmem:[%s2951_s24 + $0xc8] sm:$0xff]  ;;  %v1179_v21 = vld [vmem:[%s2951_s24 + $0xc0] sm:$0xff] }
  0x7a   : > { %1381 = vperm.xlu1 %2675, %v1144_v22   ;;  %1378 = vperm.xlu0 %2674, %v1143_v23  }
  0x7e   : > { %1387 = vperm.xlu1 %2675, %v1146_v24   ;;  %1384 = vperm.xlu0 %2674, %v1145_v25   ;;  %v1182_v24 = vld [vmem:[%s2951_s24 + $0xd8] sm:$0xff]  ;;  %v1181_v25 = vld [vmem:[%s2951_s24 + $0xd0] sm:$0xff] }
  0x82   : > { %1393 = vperm.xlu1 %2675, %v1148_v26   ;;  %1390 = vperm.xlu0 %2674, %v1147_v27  }
  0x86   : > { %1399 = vperm.xlu1 %2675, %v1150_v28   ;;  %1396 = vperm.xlu0 %2674, %v1149_v29   ;;  %v1184_v28 = vld [vmem:[%s2951_s24 + $0xe8] sm:$0xff]  ;;  %v1183_v29 = vld [vmem:[%s2951_s24 + $0xe0] sm:$0xff] }
  0x8a   : > { %1405 = vperm.xlu1 %2675, %v1152_v30   ;;  %1402 = vperm.xlu0 %2674, %v1151_v31  }
  0x8d   : > { %v2953_v34 = vpop.permute.xlu1 %1228  ;;  %v2955_v35 = vpop.permute.xlu0 %1222 }
  0x8e   : > { %1411 = vperm.xlu1 %2675, %v1154_v32   ;;  %1408 = vperm.xlu0 %2674, %v1153_v33   ;;  %v1186_v32 = vld [vmem:[%s2951_s24 + $0xf8] sm:$0xff]  ;;  %v1185_v33 = vld [vmem:[%s2951_s24 + $0xf0] sm:$0xff] }
  0x91   : > { %v2959_v38 = vpop.permute.xlu1 %1231  ;;  %v2961_v39 = vpop.permute.xlu0 %1225 }
  0x92   : > { %1618 = vperm.xlu1 %2675, %v1156_v36   ;;  %1615 = vperm.xlu0 %2674, %v1155_v37  }
  0x95   : > { %v2965_v42 = vpop.permute.xlu1 %1237  ;;  %v2967_v43 = vpop.permute.xlu0 %1234 }
  0x96   : > { %1624 = vperm.xlu1 %2675, %v1158_v40   ;;  %1621 = vperm.xlu0 %2674, %v1157_v41   ;;  %v1188_v40 = vld [vmem:[%s2951_s24 + $0x108] sm:$0xff]  ;;  %v1187_v41 = vld [vmem:[%s2951_s24 + $0x100] sm:$0xff] }
  0x99   : > { %v2971_v46 = vpop.permute.xlu1 %1243  ;;  %v2973_v47 = vpop.permute.xlu0 %1240 }
  0x9a   : > { %1630 = vperm.xlu1 %2675, %v1160_v44   ;;  %1627 = vperm.xlu0 %2674, %v1159_v45  }
  0x9d   : > { %v2977_v50 = vpop.permute.xlu1 %1249  ;;  %v2979_v51 = vpop.permute.xlu0 %1246 }
  0x9e   : > { %1636 = vperm.xlu1 %2675, %v1162_v48   ;;  %1633 = vperm.xlu0 %2674, %v1161_v49   ;;  %v1190_v48 = vld [vmem:[%s2951_s24 + $0x118] sm:$0xff]  ;;  %v1189_v49 = vld [vmem:[%s2951_s24 + $0x110] sm:$0xff] }
  0xa1   : > { %v2983_v54 = vpop.permute.xlu1 %1255  ;;  %v2985_v55 = vpop.permute.xlu0 %1252 }
  0xa2   : > { %1642 = vperm.xlu1 %2675, %v1164_v52   ;;  %1639 = vperm.xlu0 %2674, %v1163_v53  }
  0xa5   : > { %v2989_v58 = vpop.permute.xlu1 %1261  ;;  %v2991_v59 = vpop.permute.xlu0 %1258 }
  0xa6   : > { %1648 = vperm.xlu1 %2675, %v1166_v56   ;;  %1645 = vperm.xlu0 %2674, %v1165_v57   ;;  %v1192_v56 = vld [vmem:[%s2951_s24 + $0x128] sm:$0xff]  ;;  %v1191_v57 = vld [vmem:[%s2951_s24 + $0x120] sm:$0xff] }
  0xa9   : > { %v2995_v62 = vpop.permute.xlu1 %1267  ;;  %v2997_v63 = vpop.permute.xlu0 %1264 }
  0xaa   : > { %1654 = vperm.xlu1 %2675, %v1168_v60   ;;  %1651 = vperm.xlu0 %2674, %v1167_v61  }
  0xad   : > { %v3001_v2 = vpop.permute.xlu1 %1273  ;;  %v3003_v3 = vpop.permute.xlu0 %1270 }
  0xae   : > { %1660 = vperm.xlu1 %2675, %v1170_v0   ;;  %1657 = vperm.xlu0 %2674, %v1169_v1   ;;  %v1194_v0 = vld [vmem:[%s2951_s24 + $0x138] sm:$0xff]  ;;  %v1193_v1 = vld [vmem:[%s2951_s24 + $0x130] sm:$0xff] }
  0xb1   : > { %v3007_v6 = vpop.permute.xlu1 %1279  ;;  %v3009_v7 = vpop.permute.xlu0 %1276 }
  0xb2   : > { %1666 = vperm.xlu1 %2675, %v1172_v4   ;;  %1663 = vperm.xlu0 %2674, %v1171_v5   ;;  %v3076_v4 = vld [vmem:[%s4720_s2] ss:$0 sm:$0xff] }
  0xb5   : > { %v3013_v10 = vpop.permute.xlu1 %1285  ;;  %v3015_v11 = vpop.permute.xlu0 %1282 }
  0xb6   : > { %1672 = vperm.xlu1 %2675, %v1174_v8   ;;  %1669 = vperm.xlu0 %2674, %v1173_v9  }
  0xb9   : > { %v3019_v14 = vpop.permute.xlu1 %1291  ;;  %v3021_v15 = vpop.permute.xlu0 %1288 }
  0xba   : > { %1678 = vperm.xlu1 %2675, %v1176_v12   ;;  %1675 = vperm.xlu0 %2674, %v1175_v13   ;;  %v1196_v12 = vld [vmem:[%s2951_s24 + $0x148] sm:$0xff] }
  0xbd   : > { %v3025_v18 = vpop.permute.xlu1 %1297  ;;  %v3027_v19 = vpop.permute.xlu0 %1294 }
  0xbe   : > { %1684 = vperm.xlu1 %2675, %v1178_v16   ;;  %1681 = vperm.xlu0 %2674, %v1177_v17   ;;  %v1195_v16 = vld [vmem:[%s2951_s24 + $0x140] sm:$0xff] }
  0xc1   : > { %v3031_v22 = vpop.permute.xlu1 %1303  ;;  %v3033_v23 = vpop.permute.xlu0 %1300 }
  0xc2   : > { %1690 = vperm.xlu1 %2675, %v1180_v20   ;;  %1687 = vperm.xlu0 %2674, %v1179_v21  }
  0xc5   : > { %v3037_v26 = vpop.permute.xlu1 %1309  ;;  %v3039_v27 = vpop.permute.xlu0 %1306 }
  0xc6   : > { %4769 = vst [vmem:[#allocation2_spill] sm:$0xff] %v3037_v26  ;;  %4770 = vst [vmem:[#allocation3_spill] sm:$0xff] %v3039_v27  ;;  %1696 = vperm.xlu1 %2675, %v1182_v24   ;;  %1693 = vperm.xlu0 %2674, %v1181_v25  }
  0xc9   : > { %v3043_v30 = vpop.permute.xlu1 %1315  ;;  %v3045_v31 = vpop.permute.xlu0 %1312 }
  0xca   : > { %4771 = vst [vmem:[#allocation4_spill] sm:$0xff] %v3043_v30  ;;  %4772 = vst [vmem:[#allocation5_spill] sm:$0xff] %v3045_v31  ;;  %1702 = vperm.xlu1 %2675, %v1184_v28   ;;  %1699 = vperm.xlu0 %2674, %v1183_v29   ;;  %v1198_v28 = vld [vmem:[%s2951_s24 + $0x158] sm:$0xff] }
  0xcb   : > { %v1214_v31 = vld [vmem:[%s2951_s24 + $0x1d8] sm:$0xff] }
  0xcd   : > { %v3049_v36 = vpop.permute.xlu1 %1321  ;;  %v3051_v37 = vpop.permute.xlu0 %1318 }
  0xce   : > { %4773 = vst [vmem:[#allocation6_spill] sm:$0xff] %v3049_v36  ;;  %4774 = vst [vmem:[#allocation7_spill] sm:$0xff] %v3051_v37  ;;  %1708 = vperm.xlu1 %2675, %v1186_v32   ;;  %1705 = vperm.xlu0 %2674, %v1185_v33   ;;  %v1197_v32 = vld [vmem:[%s2951_s24 + $0x150] sm:$0xff] }
  0xd1   : > { %v3055_v44 = vpop.permute.xlu1 %1327  ;;  %v3057_v45 = vpop.permute.xlu0 %1324 }
  0xd2   : > { %4775 = vst [vmem:[#allocation8_spill] sm:$0xff] %v3055_v44  ;;  %4776 = vst [vmem:[#allocation9_spill] sm:$0xff] %v3057_v45  ;;  %1714 = vperm.xlu1 %2675, %v1188_v40   ;;  %1711 = vperm.xlu0 %2674, %v1187_v41   ;;  %v1212_v44 = vld [vmem:[%s2951_s24 + $0x1c8] sm:$0xff] }
  0xd5   : > { %v3061_v52 = vpop.permute.xlu1 %1333  ;;  %v3063_v53 = vpop.permute.xlu0 %1330 }
  0xd6   : > { %4777 = vst [vmem:[#allocation10_spill] sm:$0xff] %v3061_v52  ;;  %4778 = vst [vmem:[#allocation11_spill] sm:$0xff] %v3063_v53  ;;  %1720 = vperm.xlu1 %2675, %v1190_v48   ;;  %1717 = vperm.xlu0 %2674, %v1189_v49   ;;  %v2601_v9 = vpop.f32.mrf.mxu0  ;;  %v1209_v53 = vld [vmem:[%s2951_s24 + $0x1b0] sm:$0xff] }
  0xd7   : > { %v3090_v13 = vadd.f32 %v2601_v9, %v3076_v4 }
  0xd8   : > { %v772_v17 = vpop.f32.mrf.mxu0 }
  0xd9   : > { %v3067_v60 = vpop.permute.xlu1 %1339  ;;  %v3069_v61 = vpop.permute.xlu0 %1336  ;;  %1029 = vst [vmem:[%s3086_s29 + $0x10] sm:$0xff] %v3090_v13  ;;  %v3100_v24 = vadd.f32 %v3076_v4, %v772_v17 }
  0xda   : > { %4779 = vst [vmem:[#allocation12_spill] sm:$0xff] %v3067_v60  ;;  %4780 = vst [vmem:[#allocation13_spill] sm:$0xff] %v3069_v61  ;;  %1726 = vperm.xlu1 %2675, %v1192_v56   ;;  %1723 = vperm.xlu0 %2674, %v1191_v57   ;;  %v2602_v25 = vpop.f32.mrf.mxu0  ;;  %v1200_v56 = vld [vmem:[%s2951_s24 + $0x168] sm:$0xff]  ;;  %v1210_v60 = vld [vmem:[%s2951_s24 + $0x1b8] sm:$0xff] }
  0xdb   : > { %1027 = vst [vmem:[%s3086_s29] sm:$0xff] %v3100_v24  ;;  %v3106_v29 = vadd.f32 %v2602_v25, %v3076_v4  ;;  %v1202_v25 = vld [vmem:[%s2951_s24 + $0x178] sm:$0xff] }
  0xdc   : > { %v775_v33 = vpop.f32.mrf.mxu0 }
  0xdd   : > { %v3078_v5 = vpop.permute.xlu1 %1345  ;;  %v3080_v8 = vpop.permute.xlu0 %1342  ;;  %1030 = vst [vmem:[%s3086_s29 + $0x18] sm:$0xff] %v3106_v29  ;;  %v3116_v48 = vadd.f32 %v3076_v4, %v775_v33 }
  0xde   : > { %4781 = vst [vmem:[#allocation14_spill] sm:$0xff] %v3078_v5  ;;  %4782 = vst [vmem:[#allocation15_spill] sm:$0xff] %v3080_v8  ;;  %1732 = vperm.xlu1 %2675, %v1194_v0   ;;  %1729 = vperm.xlu0 %2674, %v1193_v1   ;;  %v2605_v49 = vpop.f32.mrf.mxu0  ;;  %v1199_v0 = vld [vmem:[%s2951_s24 + $0x160] sm:$0xff]  ;;  %v2633_v8 = vpop.f32.mrf.mxu1 }
  0xdf   : > { %1028 = vst [vmem:[%s3086_s29 + $0x8] sm:$0xff] %v3116_v48  ;;  %v3122_v57 = vadd.f32 %v2605_v49, %v3076_v4 }
  0xe0   : > { %v788_v1 = vpop.f32.mrf.mxu0  ;;  %v900_v61 = vpop.f32.mrf.mxu1 }
  0xe1   : > { %v3093_v20 = vpop.permute.xlu1 %1351  ;;  %v3095_v21 = vpop.permute.xlu0 %1348  ;;  %1033 = vst [vmem:[%s3086_s29 + $0x30] sm:$0xff] %v3122_v57 }
  0xe2   : > { %4783 = vst [vmem:[#allocation16_spill] sm:$0xff] %v3093_v20  ;;  %4784 = vst [vmem:[#allocation17_spill] sm:$0xff] %v3095_v21  ;;  %1738 = vperm.xlu1 %2675, %v1196_v12   ;;  %1735 = vperm.xlu0 %2674, %v1195_v16   ;;  %v3132_v16 = vadd.f32 %v3076_v4, %v788_v1  ;;  %v2606_v17 = vpop.f32.mrf.mxu0  ;;  %v1204_v1 = vld [vmem:[%s2951_s24 + $0x188] sm:$0xff]  ;;  %v1207_v20 = vld [vmem:[%s2951_s24 + $0x1a0] sm:$0xff] }
  0xe4   : > { %1031 = vst [vmem:[%s3086_s29 + $0x20] sm:$0xff] %v3132_v16  ;;  %v791_v33 = vpop.f32.mrf.mxu0 }
  0xe5   : > { %v3109_v40 = vpop.permute.xlu1 %1357  ;;  %v3111_v41 = vpop.permute.xlu0 %1354 }
  0xe6   : > { %4785 = vst [vmem:[#allocation18_spill] sm:$0xff] %v3109_v40  ;;  %4786 = vst [vmem:[#allocation19_spill] sm:$0xff] %v3111_v41  ;;  %1744 = vperm.xlu1 %2675, %v1198_v28   ;;  %1741 = vperm.xlu0 %2674, %v1197_v32   ;;  %v3138_v28 = vadd.f32 %v2606_v17, %v3076_v4  ;;  %v1201_v32 = vld [vmem:[%s2951_s24 + $0x170] sm:$0xff] }
  0xe8   : > { %1034 = vst [vmem:[%s3086_s29 + $0x38] sm:$0xff] %v3138_v28 }
  0xe9   : > { %v3125_v9 = vpop.permute.xlu1 %1363  ;;  %v3127_v12 = vpop.permute.xlu0 %1360 }
  0xea   : > { %4787 = vst [vmem:[#allocation20_spill] sm:$0xff] %v3125_v9  ;;  %4788 = vst [vmem:[#allocation21_spill] sm:$0xff] %v3127_v12  ;;  %1750 = vperm.xlu1 %2675, %v1200_v56   ;;  %1747 = vperm.xlu0 %2674, %v1199_v0   ;;  %v3148_v56 = vadd.f32 %v3076_v4, %v791_v33  ;;  %v2609_v0 = vpop.f32.mrf.mxu0  ;;  %v1206_v33 = vld [vmem:[%s2951_s24 + $0x198] sm:$0xff] }
  0xeb   : > { %v3154_v17 = vadd.f32 %v2609_v0, %v3076_v4 }
  0xec   : > { %1032 = vst [vmem:[%s3086_s29 + $0x28] sm:$0xff] %v3148_v56 }
  0xed   : > { %v3141_v49 = vpop.permute.xlu1 %1369  ;;  %v3143_v12 = vpop.permute.xlu0 %1366  ;;  %1037 = vst [vmem:[%s3086_s29 + $0x50] sm:$0xff] %v3154_v17 }
  0xee   : > { %4789 = vst [vmem:[#allocation22_spill] sm:$0xff] %v3141_v49  ;;  %4790 = vst [vmem:[#allocation23_spill] sm:$0xff] %v3143_v12  ;;  %1756 = vperm.xlu1 %2675, %v1202_v25   ;;  %1753 = vperm.xlu0 %2674, %v1201_v32   ;;  %v1203_v49 = vld [vmem:[%s2951_s24 + $0x180] sm:$0xff]  ;;  %v804_v12 = vpop.f32.mrf.mxu0 }
  0xef   : > { %v3164_v25 = vadd.f32 %v3076_v4, %v804_v12 }
  0xf0   : > { %v2610_v32 = vpop.f32.mrf.mxu0 }
  0xf1   : > { %v3157_v9 = vpop.permute.xlu1 %1375  ;;  %v3159_v41 = vpop.permute.xlu0 %1372  ;;  %1035 = vst [vmem:[%s3086_s29 + $0x40] sm:$0xff] %v3164_v25  ;;  %v3170_v0 = vadd.f32 %v2610_v32, %v3076_v4 }
  0xf2   : > { %4791 = vst [vmem:[#allocation24_spill] sm:$0xff] %v3157_v9  ;;  %4792 = vst [vmem:[#allocation25_spill] sm:$0xff] %v3159_v41  ;;  %1762 = vperm.xlu1 %2675, %v1204_v1   ;;  %1759 = vperm.xlu0 %2674, %v1203_v49   ;;  %v1205_v9 = vld [vmem:[%s2951_s24 + $0x190] sm:$0xff]  ;;  %v807_v40 = vpop.f32.mrf.mxu0  ;;  %v1208_v1 = vld [vmem:[%s2951_s24 + $0x1a8] sm:$0xff] }
  0xf3   : > { %1038 = vst [vmem:[%s3086_s29 + $0x58] sm:$0xff] %v3170_v0  ;;  %v3180_v12 = vadd.f32 %v3076_v4, %v807_v40 }
  0xf4   : > { %v2613_v49 = vpop.f32.mrf.mxu0 }
  0xf5   : > { %v3173_v41 = vpop.permute.xlu1 %1381  ;;  %v3175_v21 = vpop.permute.xlu0 %1378  ;;  %1036 = vst [vmem:[%s3086_s29 + $0x48] sm:$0xff] %v3180_v12  ;;  %v3186_v32 = vadd.f32 %v2613_v49, %v3076_v4 }
  0xf6   : > { %4793 = vst [vmem:[#allocation26_spill] sm:$0xff] %v3173_v41  ;;  %4794 = vst [vmem:[#allocation27_spill] sm:$0xff] %v3175_v21  ;;  %1768 = vperm.xlu1 %2675, %v1206_v33   ;;  %1765 = vperm.xlu0 %2674, %v1205_v9   ;;  %v1413_v41 = vlaneseq  ;;  %v820_v21 = vpop.f32.mrf.mxu0  ;;  %v909_v33 = vadd.f32 %v2633_v8, %v3076_v4 }
  0xf7   : > { %1041 = vst [vmem:[%s3086_s29 + $0x70] sm:$0xff] %v3186_v32  ;;  %v3196_v9 = vadd.f32 %v3076_v4, %v820_v21 }
  0xf8   : > { %v2614_v49 = vpop.f32.mrf.mxu0  ;;  %1061 = vst [vmem:[%s3086_s29 + $0x110] sm:$0xff] %v909_v33  ;;  %v1414_v21 = vshrl.u32 %v1413_v41, 7 }
  0xf9   : > { %v3189_v5 = vpop.permute.xlu1 %1387  ;;  %v3191_v40 = vpop.permute.xlu0 %1384  ;;  %1039 = vst [vmem:[%s3086_s29 + $0x60] sm:$0xff] %v3196_v9 }
  0xfa   : > { %4795 = vst [vmem:[#allocation28_spill] sm:$0xff] %v3189_v5  ;;  %4796 = vst [vmem:[#allocation29_spill] sm:$0xff] %v3191_v40  ;;  %1774 = vperm.xlu1 %2675, %v1208_v1   ;;  %1771 = vperm.xlu0 %2674, %v1207_v20   ;;  %v3203_v5 = vadd.f32 %v2614_v49, %v3076_v4  ;;  %v901_v40 = vadd.f32 %v3076_v4, %v900_v61  ;;  %v823_v8 = vpop.f32.mrf.mxu0  ;;  %v2634_v1 = vpop.f32.mrf.mxu1  ;;  %v1219_v20 = vld [vmem:[%s4723_s5] sm:$0x1] }
  0xfb   : > { %v3218_v61 = vadd.f32 %v3076_v4, %v823_v8  ;;  %v912_v41 = vadd.f32 %v2634_v1, %v3076_v4  ;;  %v1415_v8 = vsub.s32 0, %v1414_v21  ;;  %v1211_v1 = vld [vmem:[%s2951_s24 + $0x1c0] sm:$0xff] }
  0xfc   : > { %1042 = vst [vmem:[%s3086_s29 + $0x78] sm:$0xff] %v3203_v5  ;;  %1059 = vst [vmem:[%s3086_s29 + $0x100] sm:$0xff] %v901_v40  ;;  %v2617_v33 = vpop.f32.mrf.mxu0  ;;  %v903_v49 = vpop.f32.mrf.mxu1  ;;  %v1481_v40 = vadd.s32 15, %v1219_v20 }
  0xfd   : > { %v3211_v52 = vpop.permute.xlu1 %1393  ;;  %v3213_v45 = vpop.permute.xlu0 %1390  ;;  %1040 = vst [vmem:[%s3086_s29 + $0x68] sm:$0xff] %v3218_v61  ;;  %1062 = vst [vmem:[%s3086_s29 + $0x118] sm:$0xff] %v912_v41 }
  0xfe   : > { %4797 = vst [vmem:[#allocation30_spill] sm:$0xff] %v3211_v52  ;;  %4798 = vst [vmem:[#allocation31_spill] sm:$0xff] %v3213_v45  ;;  %1780 = vperm.xlu1 %2675, %v1210_v60   ;;  %1777 = vperm.xlu0 %2674, %v1209_v53   ;;  %v3226_v45 = vadd.f32 %v2617_v33, %v3076_v4  ;;  %v904_v52 = vadd.f32 %v3076_v4, %v903_v49  ;;  %v836_v60 = vpop.f32.mrf.mxu0  ;;  %v2637_v37 = vpop.f32.mrf.mxu1 }
  0xff   : > { %v3238_v33 = vadd.f32 %v3076_v4, %v836_v60  ;;  %v925_v41 = vadd.f32 %v2637_v37, %v3076_v4  ;;  %v3253_v37 = vrot.slane %v1219_v20, %v1415_v8 }
 0x100   : > { %4799 = vst [vmem:[#allocation32_spill] sm:$0xff] %v3226_v45  ;;  %1045 = vst [vmem:[%s3086_s29 + $0x90] sm:$0xff] %v3226_v45  ;;  %v2618_v21 = vpop.f32.mrf.mxu0  ;;  %v916_v49 = vpop.f32.mrf.mxu1  ;;  %v1216_v45 = vld [vmem:[%s2951_s24 + $0x1e8] sm:$0xff] }
 0x101   : > { %v3231_v36 = vpop.permute.xlu1 %1399  ;;  %v3233_v53 = vpop.permute.xlu0 %1396  ;;  %1060 = vst [vmem:[%s3086_s29 + $0x108] sm:$0xff] %v904_v52  ;;  %1043 = vst [vmem:[%s3086_s29 + $0x80] sm:$0xff] %v3238_v33  ;;  %v917_v52 = vadd.f32 %v3076_v4, %v916_v49  ;;  %vm1419_vm1 = vcmp.ge.s32.totalorder %v2953_v34, %v3253_v37  ;;  %vm1417_vm3 = vcmp.ge.s32.totalorder %v2955_v35, %v3253_v37 }
 0x102   : > { %4800 = vst [vmem:[#allocation33_spill] sm:$0xff] %v3231_v36  ;;  %4801 = vst [vmem:[#allocation34_spill] sm:$0xff] %v3233_v53  ;;  %1786 = vperm.xlu1 %2675, %v1212_v44   ;;  %1783 = vperm.xlu0 %2674, %v1211_v1   ;;  %v1220_v53 = vld [vmem:[%s4724_s6] sm:$0x1]  ;;  %v3249_v36 = vadd.f32 %v2618_v21, %v3076_v4  ;;  %v3255_v44 = vrot.slane %v1481_v40, %v1415_v8  ;;  %v1213_v1 = vld [vmem:[%s2951_s24 + $0x1d0] sm:$0xff]  ;;  %v839_v60 = vpop.f32.mrf.mxu0  ;;  %v2638_v30 = vpop.f32.mrf.mxu1 }
 0x103   : > { %1065 = vst [vmem:[%s3086_s29 + $0x130] sm:$0xff] %v925_v41  ;;  %v3265_v41 = vadd.f32 %v3076_v4, %v839_v60  ;;  %1063 = vst [vmem:[%s3086_s29 + $0x120] sm:$0xff] %v917_v52  ;;  %v928_v20 = vadd.f32 %v2638_v30, %v3076_v4  ;;  %v1938_v40 = vadd.s32 15, %v1220_v53  ;;  %v1215_v30 = vld [vmem:[%s2951_s24 + $0x1e0] sm:$0xff]  ;;  %vm1418_vm5 = vcmp.ge.s32.totalorder %v2961_v39, %v3253_v37 }
 0x104   : > { %1046 = vst [vmem:[%s3086_s29 + $0x98] sm:$0xff] %v3249_v36  ;;  %v2621_v21 = vpop.f32.mrf.mxu0  ;;  %v919_v49 = vpop.f32.mrf.mxu1  ;;  %vm1488_vm2 = vcmp.le.s32.totalorder %v2953_v34, %v3255_v44  ;;  %vm1486_vm4 = vcmp.le.s32.totalorder %v2955_v35, %v3255_v44  ;;  %vm1487_vm6 = vcmp.le.s32.totalorder %v2961_v39, %v3255_v44  ;;  %vm1420_vm7 = vcmp.ge.s32.totalorder %v2959_v38, %v3253_v37 }
 0x105   : > { %v3258_v27 = vpop.permute.xlu1 %1405  ;;  %v3260_v26 = vpop.permute.xlu0 %1402  ;;  %1044 = vst [vmem:[%s3086_s29 + $0x88] sm:$0xff] %v3265_v41  ;;  %1066 = vst [vmem:[%s3086_s29 + $0x138] sm:$0xff] %v928_v20  ;;  %v920_v60 = vadd.f32 %v3076_v4, %v919_v49  ;;  %vm1489_vm8 = vcmp.le.s32.totalorder %v2959_v38, %v3255_v44  ;;  %vm1422_vm9 = vcmp.ge.s32.totalorder %v2965_v42, %v3253_v37 }
 0x106   : > { %4802 = vst [vmem:[#allocation35_spill] sm:$0xff] %v3258_v27  ;;  %4803 = vst [vmem:[#allocation36_spill] sm:$0xff] %v3260_v26  ;;  %1792 = vperm.xlu1 %2675, %v1214_v31   ;;  %1789 = vperm.xlu0 %2674, %v1213_v1   ;;  %v3273_v26 = vadd.f32 %v2621_v21, %v3076_v4  ;;  %v852_v31 = vpop.f32.mrf.mxu0  ;;  %v2641_v52 = vpop.f32.mrf.mxu1  ;;  %v3307_v27 = vrot.slane %v1938_v40, %v1415_v8 }
 0x107   : > { %v3295_v20 = vadd.f32 %v3076_v4, %v852_v31  ;;  %1064 = vst [vmem:[%s3086_s29 + $0x128] sm:$0xff] %v920_v60  ;;  %v941_v21 = vadd.f32 %v2641_v52, %v3076_v4  ;;  %vm1491_vm10 = vcmp.le.s32.totalorder %v2965_v42, %v3255_v44  ;;  %vm1421_vm11 = vcmp.ge.s32.totalorder %v2967_v43, %v3253_v37  ;;  %vm3321_vm12 = vmand %vm1417_vm3, %vm1486_vm4  ;;  %v1217_v60 = vld [vmem:[%s2951_s24 + $0x1f0] sm:$0xff] }
 0x108   : > { %4804 = vst [vmem:[#allocation37_spill] sm:$0xff] %v3273_v26  ;;  %1049 = vst [vmem:[%s3086_s29 + $0xb0] sm:$0xff] %v3273_v26  ;;  %v2622_v31 = vpop.f32.mrf.mxu0  ;;  %v932_v40 = vpop.f32.mrf.mxu1  ;;  %vm1490_vm13 = vcmp.le.s32.totalorder %v2967_v43, %v3255_v44  ;;  %vm1493_vm15 = vcmp.le.s32.totalorder %v2971_v46, %v3255_v44 }
 0x109   : > { %v3290_v1 = vpop.permute.xlu1 %1411  ;;  %v3303_v49 = vpop.permute.xlu0 %1408  ;;  %1047 = vst [vmem:[%s3086_s29 + $0xa0] sm:$0xff] %v3295_v20  ;;  %1069 = vst [vmem:[%s3086_s29 + $0x150] sm:$0xff] %v941_v21  ;;  %v933_v21 = vadd.f32 %v3076_v4, %v932_v40 }
 0x10a   : > { %4805 = vst [vmem:[#allocation38_spill] sm:$0xff] %v3290_v1  ;;  %4806 = vst [vmem:[#allocation39_spill] sm:$0xff] %v3303_v49  ;;  %1798 = vperm.xlu1 %2675, %v1216_v45   ;;  %v3305_v1 = vrot.slane %v1220_v53, %v1415_v8  ;;  %1795 = vperm.xlu0 %2674, %v1215_v30   ;;  %v1218_v8 = vld [vmem:[%s2951_s24 + $0x1f8] sm:$0xff]  ;;  %v3329_v53 = vadd.f32 %v2622_v31, %v3076_v4  ;;  %v855_v52 = vpop.f32.mrf.mxu0  ;;  %v2642_v40 = vpop.f32.mrf.mxu1 }
 0x10b   : > { %vm3344_vm0 = vmand %vm1418_vm5, %vm1487_vm6  ;;  %v3379_v31 = vadd.f32 %v3076_v4, %v855_v52  ;;  %1067 = vst [vmem:[%s3086_s29 + $0x140] sm:$0xff] %v933_v21  ;;  %v944_v26 = vadd.f32 %v2642_v40, %v3076_v4 }
 0x10c   : > { %vm3355_vm3 = vmand %vm1419_vm1, %vm1488_vm2  ;;  %1050 = vst [vmem:[%s3086_s29 + $0xb8] sm:$0xff] %v3329_v53  ;;  %v2625_v52 = vpop.f32.mrf.mxu0 }
 0x10d   : > { %v1619_v39 = vpop.permute.xlu1 %1618  ;;  %vm3372_vm1 = vmand %vm1420_vm7, %vm1489_vm8  ;;  %v1616_v49 = vpop.permute.xlu0 %1615  ;;  %1048 = vst [vmem:[%s3086_s29 + $0xa8] sm:$0xff] %v3379_v31  ;;  %v3406_v42 = vadd.f32 %v2625_v52, %v3076_v4 }
 0x10e   : > { %vm1811_vm6 = vcmp.ge.s32.totalorder %v1619_v39, %v3305_v1  ;;  %vm1944_vm4 = vcmp.le.s32.totalorder %v1619_v39, %v3307_v27  ;;  %1804 = vperm.xlu1 %2675, %v1218_v8   ;;  %vm3391_vm7 = vmand %vm1422_vm9, %vm1491_vm10  ;;  %vm1810_vm5 = vcmp.ge.s32.totalorder %v1616_v49, %v3305_v1  ;;  %vm1943_vm14 = vcmp.le.s32.totalorder %v1616_v49, %v3307_v27  ;;  %v935_v8 = vpop.f32.mrf.mxu1 }
 0x10f   : > { %vm1875_vm2 = vmand %vm3344_vm0, %vm1811_vm6  ;;  %1801 = vperm.xlu0 %2674, %v1217_v60   ;;  %4817 = vst [vmem:[#allocation40_spill] sm:$0xff] %v3406_v42  ;;  %vm1494_vm9 = vcmp.le.s32.totalorder %v2979_v51, %v3255_v44  ;;  %vm1497_vm0 = vcmp.le.s32.totalorder %v2983_v54, %v3255_v44  ;;  %v868_v60 = vpop.f32.mrf.mxu0  ;;  %v936_v21 = vadd.f32 %v3076_v4, %v935_v8 }
 0x110   : > { %vm2008_vm6 = vmand %vm1875_vm2, %vm1944_vm4  ;;  %1070 = vst [vmem:[%s3086_s29 + $0x158] sm:$0xff] %v944_v26  ;;  %v3440_v26 = vadd.f32 %v3076_v4, %v868_v60  ;;  %v2645_v40 = vpop.f32.mrf.mxu1 }
 0x111   : > { %vm3422_vm8 = vmand %vm1421_vm11, %vm1490_vm13  ;;  %v2072_v39 = vsel %vm2008_vm6, %v3116_v48, 0.0  ;;  %v1625_v43 = vpop.permute.xlu1 %1624  ;;  %1053 = vst [vmem:[%s3086_s29 + $0xd0] sm:$0xff] %v3406_v42  ;;  %v1622_v48 = vpop.permute.xlu0 %1621  ;;  %v957_v49 = vadd.f32 %v2645_v40, %v3076_v4 }
 0x112   : > { %vm1874_vm11 = vmand %vm3321_vm12, %vm1810_vm5  ;;  %4820 = vst [vmem:[#allocation41_spill] sm:$0xff] %v3440_v26  ;;  %v2205_v52 = vmul.f32 %v2072_v39, %v2072_v39  ;;  %vm1813_vm2 = vcmp.ge.s32.totalorder %v1625_v43, %v3305_v1  ;;  %vm1946_vm6 = vcmp.le.s32.totalorder %v1625_v43, %v3307_v27  ;;  %vm4821_vm12 = vcmp.ge.s32.totalorder %v2971_v46, %v3253_v37  ;;  %v2626_v8 = vpop.f32.mrf.mxu0  ;;  %v948_v42 = vpop.f32.mrf.mxu1 }
 0x113   : > { %vm2007_vm13 = vmand %vm1874_vm11, %vm1943_vm14  ;;  %1068 = vst [vmem:[%s3086_s29 + $0x148] sm:$0xff] %v936_v21  ;;  %vm1812_vm11 = vcmp.ge.s32.totalorder %v1622_v48, %v3305_v1  ;;  %vm1945_vm10 = vcmp.le.s32.totalorder %v1622_v48, %v3307_v27  ;;  %v3466_v46 = vadd.f32 %v2626_v8, %v3076_v4  ;;  %v949_v40 = vadd.f32 %v3076_v4, %v948_v42 }
 0x114   : > { %vm3452_vm5 = vmand %vm4821_vm12, %vm1493_vm15  ;;  %v2071_v60 = vsel %vm2007_vm13, %v3100_v24, 0.0  ;;  %1051 = vst [vmem:[%s3086_s29 + $0xc0] sm:$0xff] %v3440_v26  ;;  %vm4826_vm12 = vcmp.ge.s32.totalorder %v2973_v47, %v3253_v37  ;;  %v871_v21 = vpop.f32.mrf.mxu0  ;;  %v2646_v42 = vpop.f32.mrf.mxu1 }
 0x115   : > { %vm1877_vm14 = vmand %vm3372_vm1, %vm1813_vm2  ;;  %4824 = vst [vmem:[#allocation42_spill] sm:$0xff] %v3466_v46  ;;  %v2204_v24 = vmul.f32 %v2071_v60, %v2071_v60  ;;  %vm4825_vm2 = vcmp.le.s32.totalorder %v2973_v47, %v3255_v44  ;;  %v2135_v43 = vadd.f32 %v2072_v39, %v2071_v60  ;;  %v1631_v47 = vpop.permute.xlu1 %1630  ;;  %v3497_v8 = vadd.f32 %v3076_v4, %v871_v21  ;;  %v1628_v30 = vpop.permute.xlu0 %1627 }
 0x116   : > { %vm2010_vm1 = vmand %vm1877_vm14, %vm1946_vm6  ;;  %1073 = vst [vmem:[%s3086_s29 + $0x170] sm:$0xff] %v957_v49  ;;  %vm1948_vm15 = vcmp.le.s32.totalorder %v1631_v47, %v3307_v27  ;;  %vm1814_vm13 = vcmp.ge.s32.totalorder %v1628_v30, %v3305_v1  ;;  %v951_v48 = vpop.f32.mrf.mxu1  ;;  %v960_v21 = vadd.f32 %v2646_v42, %v3076_v4 }
 0x117   : > { %vm3480_vm4 = vmand %vm4826_vm12, %vm4825_vm2  ;;  %1054 = vst [vmem:[%s3086_s29 + $0xd8] sm:$0xff] %v3466_v46  ;;  %v2268_v49 = vadd.f32 %v2205_v52, %v2204_v24  ;;  %v2074_v26 = vsel %vm2010_vm1, %v3106_v29, 0.0  ;;  %vm1815_vm12 = vcmp.ge.s32.totalorder %v1631_v47, %v3305_v1  ;;  %v2629_v52 = vpop.f32.mrf.mxu0  ;;  %vm1501_vm1 = vcmp.le.s32.totalorder %v2995_v62, %v3255_v44 }
 0x118   : > { %vm1876_vm14 = vmand %vm3355_vm3, %vm1812_vm11  ;;  %vm4829_vm3 = vcmp.le.s32.totalorder %v2977_v50, %v3255_v44  ;;  %vm4830_vm11 = vcmp.ge.s32.totalorder %v2977_v50, %v3253_v37  ;;  %1071 = vst [vmem:[%s3086_s29 + $0x160] sm:$0xff] %v949_v40  ;;  %v3527_v50 = vadd.f32 %v2629_v52, %v3076_v4  ;;  %v952_v40 = vadd.f32 %v3076_v4, %v951_v48  ;;  %v2649_v42 = vpop.f32.mrf.mxu1 }
 0x119   : > { %vm2009_vm2 = vmand %vm1876_vm14, %vm1945_vm10  ;;  %vm1432_vm10 = vcmp.ge.s32.totalorder %v2995_v62, %v3253_v37  ;;  %1052 = vst [vmem:[%s3086_s29 + $0xc8] sm:$0xff] %v3497_v8  ;;  %v884_v38 = vpop.f32.mrf.mxu0  ;;  %v1634_v46 = vpop.permute.xlu0 %1633 }
 0x11a   : > { %vm3510_vm6 = vmand %vm4830_vm11, %vm4829_vm3  ;;  %v2073_v29 = vsel %vm2009_vm2, %v3090_v13, 0.0  ;;  %vm1947_vm3 = vcmp.le.s32.totalorder %v1628_v30, %v3307_v27  ;;  %1057 = vst [vmem:[%s3086_s29 + $0xf0] sm:$0xff] %v3527_v50  ;;  %v3554_v47 = vadd.f32 %v3076_v4, %v884_v38 }
 0x11b   : > { %vm1879_vm14 = vmand %vm3391_vm7, %vm1815_vm12  ;;  %v2136_v60 = vadd.f32 %v2135_v43, %v2073_v29  ;;  %v2206_v24 = vmul.f32 %v2073_v29, %v2073_v29  ;;  %vm4833_vm7 = vcmp.ge.s32.totalorder %v2979_v51, %v3253_v37  ;;  %v2207_v43 = vmul.f32 %v2074_v26, %v2074_v26  ;;  %v1637_v51 = vpop.permute.xlu1 %1636  ;;  %1074 = vst [vmem:[%s3086_s29 + $0x178] sm:$0xff] %v960_v21 }
 0x11c   : > { %vm2012_vm11 = vmand %vm1879_vm14, %vm1948_vm15  ;;  %1072 = vst [vmem:[%s3086_s29 + $0x168] sm:$0xff] %v952_v40  ;;  %vm1950_vm12 = vcmp.le.s32.totalorder %v1637_v51, %v3307_v27  ;;  %v973_v40 = vadd.f32 %v2649_v42, %v3076_v4  ;;  %vm1504_vm15 = vcmp.le.s32.totalorder %v3009_v7, %v3255_v44 }
 0x11d   : > { %vm3537_vm2 = vmand %vm4833_vm7, %vm1494_vm9  ;;  %v2269_v52 = vadd.f32 %v2268_v49, %v2206_v24  ;;  %v2076_v29 = vsel %vm2012_vm11, %v3148_v56, 0.0  ;;  %v2137_v48 = vadd.f32 %v2136_v60, %v2074_v26  ;;  %vm1817_vm7 = vcmp.ge.s32.totalorder %v1637_v51, %v3305_v1  ;;  %v2630_v49 = vpop.f32.mrf.mxu0  ;;  %1055 = vst [vmem:[%s3086_s29 + $0xe0] sm:$0xff] %v3554_v47 }
 0x11e   : > { %vm1878_vm9 = vmand %vm3422_vm8, %vm1814_vm13  ;;  %vm4836_vm8 = vcmp.ge.s32.totalorder %v2983_v54, %v3253_v37  ;;  %v964_v54 = vpop.f32.mrf.mxu1  ;;  %vm4839_vm11 = vcmp.le.s32.totalorder %v2985_v55, %v3255_v44  ;;  %v3595_v45 = vadd.f32 %v2630_v49, %v3076_v4  ;;  %v2209_v38 = vmul.f32 %v2076_v29, %v2076_v29  ;;  %v1640_v49 = vpop.permute.xlu0 %1639  ;;  %1077 = vst [vmem:[%s3086_s29 + $0x190] sm:$0xff] %v973_v40 }
 0x11f   : > { %vm2011_vm14 = vmand %vm1878_vm9, %vm1947_vm3  ;;  %v2270_v60 = vadd.f32 %v2269_v52, %v2207_v43  ;;  %v887_v24 = vpop.f32.mrf.mxu0  ;;  %v965_v43 = vadd.f32 %v3076_v4, %v964_v54 }
 0x120   : > { %vm3566_vm13 = vmand %vm4836_vm8, %vm1497_vm0  ;;  %v2075_v56 = vsel %vm2011_vm14, %v3132_v16, 0.0  ;;  %vm1816_vm0 = vcmp.ge.s32.totalorder %v1634_v46, %v3305_v1  ;;  %vm1949_vm8 = vcmp.le.s32.totalorder %v1634_v46, %v3307_v27  ;;  %vm4840_vm14 = vcmp.ge.s32.totalorder %v2985_v55, %v3253_v37  ;;  %v1643_v55 = vpop.permute.xlu1 %1642  ;;  %v2650_v51 = vpop.f32.mrf.mxu1  ;;  %1058 = vst [vmem:[%s3086_s29 + $0xf8] sm:$0xff] %v3595_v45 }
 0x121   : > { %vm1881_vm9 = vmand %vm3452_vm5, %vm1817_vm7  ;;  %v2138_v26 = vadd.f32 %v2137_v48, %v2075_v56  ;;  %v2208_v30 = vmul.f32 %v2075_v56, %v2075_v56  ;;  %v3604_v21 = vadd.f32 %v3076_v4, %v887_v24  ;;  %1075 = vst [vmem:[%s3086_s29 + $0x180] sm:$0xff] %v965_v43  ;;  %v976_v39 = vadd.f32 %v2650_v51, %v3076_v4 }
 0x122   : > { %vm2014_vm3 = vmand %vm1881_vm9, %vm1950_vm12  ;;  %vm1952_vm12 = vcmp.le.s32.totalorder %v1643_v55, %v3307_v27 }
 0x123   : > { %vm3590_vm5 = vmand %vm4840_vm14, %vm4839_vm11  ;;  %v2271_v52 = vadd.f32 %v2270_v60, %v2208_v30  ;;  %v2078_v48 = vsel %vm2014_vm3, %v3138_v28, 0.0  ;;  %v2139_v34 = vadd.f32 %v2138_v26, %v2076_v29  ;;  %vm4844_vm14 = vcmp.ge.s32.totalorder %v2989_v58, %v3253_v37  ;;  %1056 = vst [vmem:[%s3086_s29 + $0xe8] sm:$0xff] %v3604_v21 }
 0x124   : > { %vm1880_vm9 = vmand %vm3480_vm4, %vm1816_vm0  ;;  %vm1819_vm4 = vcmp.ge.s32.totalorder %v1643_v55, %v3305_v1  ;;  %vm4843_vm0 = vcmp.le.s32.totalorder %v2989_v58, %v3255_v44  ;;  %v967_v58 = vpop.f32.mrf.mxu1  ;;  %v2211_v54 = vmul.f32 %v2078_v48, %v2078_v48  ;;  %v1646_v55 = vpop.permute.xlu0 %1645  ;;  %1078 = vst [vmem:[%s3086_s29 + $0x198] sm:$0xff] %v976_v39 }
 0x125   : > { %vm2013_vm11 = vmand %vm1880_vm9, %vm1949_vm8  ;;  %v2272_v56 = vadd.f32 %v2271_v52, %v2209_v38  ;;  %vm1435_vm8 = vcmp.ge.s32.totalorder %v3009_v7, %v3253_v37  ;;  %v3658_v26 = vadd.f32 %v3076_v4, %v967_v58 }
 0x126   : > { %vm3618_vm7 = vmand %vm4844_vm14, %vm4843_vm0  ;;  %v2077_v28 = vsel %vm2013_vm11, %v3122_v57, 0.0  ;;  %vm1818_vm0 = vcmp.ge.s32.totalorder %v1640_v49, %v3305_v1  ;;  %vm1951_vm14 = vcmp.le.s32.totalorder %v1640_v49, %v3307_v27  ;;  %vm4847_vm11 = vcmp.le.s32.totalorder %v2991_v59, %v3255_v44  ;;  %v2653_v30 = vpop.f32.mrf.mxu1 }
 0x127   : > { %vm1883_vm9 = vmand %vm3510_vm6, %vm1819_vm4  ;;  %v2140_v46 = vadd.f32 %v2139_v34, %v2077_v28  ;;  %v2210_v29 = vmul.f32 %v2077_v28, %v2077_v28  ;;  %vm4848_vm6 = vcmp.ge.s32.totalorder %v2991_v59, %v3253_v37  ;;  %v1649_v59 = vpop.permute.xlu1 %1648  ;;  %1076 = vst [vmem:[%s3086_s29 + $0x188] sm:$0xff] %v3658_v26  ;;  %v989_v35 = vadd.f32 %v2653_v30, %v3076_v4 }
 0x128   : > { %vm2016_vm3 = vmand %vm1883_vm9, %vm1952_vm12  ;;  %v980_v62 = vpop.f32.mrf.mxu1 }
 0x129   : > { %vm3644_vm4 = vmand %vm4848_vm6, %vm4847_vm11  ;;  %v2273_v60 = vadd.f32 %v2272_v56, %v2210_v29  ;;  %v2080_v24 = vsel %vm2016_vm3, %v3180_v12, 0.0  ;;  %v2141_v38 = vadd.f32 %v2140_v46, %v2078_v48  ;;  %vm1821_vm11 = vcmp.ge.s32.totalorder %v1649_v59, %v3305_v1  ;;  %v1652_v46 = vpop.permute.xlu0 %1651  ;;  %1081 = vst [vmem:[%s3086_s29 + $0x1b0] sm:$0xff] %v989_v35 }
 0x12a   : > { %vm1882_vm12 = vmand %vm3537_vm2, %vm1818_vm0  ;;  %vm1954_vm6 = vcmp.le.s32.totalorder %v1649_v59, %v3307_v27  ;;  %vm4853_vm3 = vcmp.le.s32.totalorder %v2997_v63, %v3255_v44  ;;  %v2213_v52 = vmul.f32 %v2080_v24, %v2080_v24  ;;  %v2654_v34 = vpop.f32.mrf.mxu1  ;;  %vm1822_vm0 = vcmp.ge.s32.totalorder %v1652_v46, %v3305_v1 }
 0x12b   : > { %vm2015_vm9 = vmand %vm1882_vm12, %vm1951_vm14  ;;  %vm1820_vm12 = vcmp.ge.s32.totalorder %v1646_v55, %v3305_v1  ;;  %v2274_v51 = vadd.f32 %v2273_v60, %v2211_v54  ;;  %v1655_v48 = vpop.permute.xlu1 %1654  ;;  %v992_v42 = vadd.f32 %v2654_v34, %v3076_v4 }
 0x12c   : > { %vm3670_vm2 = vmand %vm1432_vm10, %vm1501_vm1  ;;  %v2079_v12 = vsel %vm2015_vm9, %v3164_v25, 0.0  ;;  %vm1953_vm10 = vcmp.le.s32.totalorder %v1646_v55, %v3307_v27  ;;  %vm4854_vm9 = vcmp.ge.s32.totalorder %v2997_v63, %v3253_v37  ;;  %v981_v63 = vadd.f32 %v3076_v4, %v980_v62 }
 0x12d   : > { %vm1885_vm14 = vmand %vm3566_vm13, %vm1821_vm11  ;;  %v2142_v40 = vadd.f32 %v2141_v38, %v2079_v12  ;;  %v2212_v43 = vmul.f32 %v2079_v12, %v2079_v12  ;;  %vm1956_vm11 = vcmp.le.s32.totalorder %v1655_v48, %v3307_v27  ;;  %v1658_v55 = vpop.permute.xlu0 %1657  ;;  %1082 = vst [vmem:[%s3086_s29 + $0x1b8] sm:$0xff] %v992_v42 }
 0x12e   : > { %vm2018_vm1 = vmand %vm1885_vm14, %vm1954_vm6  ;;  %vm1823_vm6 = vcmp.ge.s32.totalorder %v1655_v48, %v3305_v1  ;;  %1079 = vst [vmem:[%s3086_s29 + $0x1a0] sm:$0xff] %v981_v63 }
 0x12f   : > { %vm3693_vm13 = vmand %vm4854_vm9, %vm4853_vm3  ;;  %v2275_v49 = vadd.f32 %v2274_v51, %v2212_v43  ;;  %v2082_v28 = vsel %vm2018_vm1, %v3170_v0, 0.0  ;;  %v2143_v58 = vadd.f32 %v2142_v40, %v2080_v24  ;;  %vm4857_vm9 = vcmp.le.s32.totalorder %v3001_v2, %v3255_v44  ;;  %v1661_v59 = vpop.permute.xlu1 %1660 }
 0x130   : > { %vm1884_vm14 = vmand %vm3590_vm5, %vm1820_vm12  ;;  %vm4858_vm5 = vcmp.ge.s32.totalorder %v3001_v2, %v3253_v37  ;;  %v983_v2 = vpop.f32.mrf.mxu1  ;;  %vm4861_vm1 = vcmp.le.s32.totalorder %v3003_v3, %v3255_v44  ;;  %v2215_v54 = vmul.f32 %v2082_v28, %v2082_v28 }
 0x131   : > { %vm2017_vm3 = vmand %vm1884_vm14, %vm1953_vm10  ;;  %v2276_v39 = vadd.f32 %v2275_v49, %v2213_v52  ;;  %v1664_v34 = vpop.permute.xlu0 %1663 }
 0x132   : > { %vm3715_vm12 = vmand %vm4858_vm5, %vm4857_vm9  ;;  %v2081_v0 = vsel %vm2017_vm3, %v3154_v17, 0.0  ;;  %vm1955_vm9 = vcmp.le.s32.totalorder %v1652_v46, %v3307_v27  ;;  %vm4862_vm3 = vcmp.ge.s32.totalorder %v3003_v3, %v3253_v37  ;;  %v3749_v3 = vadd.f32 %v3076_v4, %v983_v2  ;;  %v2657_v30 = vpop.f32.mrf.mxu1  ;;  %v4905_v17 = vld [vmem:[#allocation37_spill] sm:$0xff] }
 0x133   : > { %vm1887_vm14 = vmand %vm3618_vm7, %vm1823_vm6  ;;  %v2144_v29 = vadd.f32 %v2143_v58, %v2081_v0  ;;  %v2214_v56 = vmul.f32 %v2081_v0, %v2081_v0  ;;  %vm1958_vm7 = vcmp.le.s32.totalorder %v1661_v59, %v3307_v27  ;;  %vm1824_vm6 = vcmp.ge.s32.totalorder %v1658_v55, %v3305_v1  ;;  %v1667_v51 = vpop.permute.xlu1 %1666 }
 0x134   : > { %vm2020_vm5 = vmand %vm1887_vm14, %vm1956_vm11  ;;  %vm1825_vm14 = vcmp.ge.s32.totalorder %v1661_v59, %v3305_v1  ;;  %1080 = vst [vmem:[%s3086_s29 + $0x1a8] sm:$0xff] %v3749_v3  ;;  %v1005_v13 = vadd.f32 %v2657_v30, %v3076_v4 }
 0x135   : > { %vm3737_vm10 = vmand %vm4862_vm3, %vm4861_vm1  ;;  %v2277_v60 = vadd.f32 %v2276_v39, %v2214_v56  ;;  %v2084_v24 = vsel %vm2020_vm5, %v3218_v61, 0.0  ;;  %v2145_v38 = vadd.f32 %v2144_v29, %v2082_v28  ;;  %vm4865_vm3 = vcmp.le.s32.totalorder %v3007_v6, %v3255_v44  ;;  %v1670_v42 = vpop.permute.xlu0 %1669 }
 0x136   : > { %vm1886_vm11 = vmand %vm3644_vm4, %vm1822_vm0  ;;  %vm4866_vm4 = vcmp.ge.s32.totalorder %v3007_v6, %v3253_v37  ;;  %vm1442_vm5 = vcmp.ge.s32.totalorder %v3025_v18, %v3253_v37  ;;  %v996_v6 = vpop.f32.mrf.mxu1  ;;  %v2217_v43 = vmul.f32 %v2084_v24, %v2084_v24  ;;  %1085 = vst [vmem:[%s3086_s29 + $0x1d0] sm:$0xff] %v1005_v13 }
 0x137   : > { %vm2019_vm1 = vmand %vm1886_vm11, %vm1955_vm9  ;;  %vm1511_vm9 = vcmp.le.s32.totalorder %v3025_v18, %v3255_v44  ;;  %v2278_v40 = vadd.f32 %v2277_v60, %v2215_v54  ;;  %v3796_v7 = vadd.f32 %v3076_v4, %v996_v6  ;;  %v1673_v0 = vpop.permute.xlu1 %1672 }
 0x138   : > { %vm3761_vm0 = vmand %vm4866_vm4, %vm4865_vm3  ;;  %v2083_v61 = vsel %vm2019_vm1, %v3196_v9, 0.0  ;;  %vm1957_vm3 = vcmp.le.s32.totalorder %v1658_v55, %v3307_v27  ;;  %v2658_v35 = vpop.f32.mrf.mxu1  ;;  %vm1959_vm1 = vcmp.le.s32.totalorder %v1664_v34, %v3307_v27 }
 0x139   : > { %vm1889_vm11 = vmand %vm3670_vm2, %vm1825_vm14  ;;  %v2146_v12 = vadd.f32 %v2145_v38, %v2083_v61  ;;  %v2216_v62 = vmul.f32 %v2083_v61, %v2083_v61  ;;  %vm1510_vm14 = vcmp.le.s32.totalorder %v3027_v19, %v3255_v44  ;;  %1083 = vst [vmem:[%s3086_s29 + $0x1c0] sm:$0xff] %v3796_v7  ;;  %v3832_v46 = vadd.f32 %v2658_v35, %v3076_v4 }
 0x13a   : > { %vm2022_vm4 = vmand %vm1889_vm11, %vm1958_vm7  ;;  %vm4871_vm11 = vcmp.le.s32.totalorder %v3013_v10, %v3255_v44  ;;  %v999_v49 = vpop.f32.mrf.mxu1 }
 0x13b   : > { %vm3784_vm2 = vmand %vm1435_vm8, %vm1504_vm15  ;;  %v2279_v52 = vadd.f32 %v2278_v40, %v2216_v62  ;;  %v2086_v48 = vsel %vm2022_vm4, %v3203_v5, 0.0  ;;  %v2147_v63 = vadd.f32 %v2146_v12, %v2084_v24  ;;  %vm1827_vm8 = vcmp.ge.s32.totalorder %v1667_v51, %v3305_v1  ;;  %1086 = vst [vmem:[%s3086_s29 + $0x1d8] sm:$0xff] %v3832_v46  ;;  %v1679_v38 = vpop.permute.xlu1 %1678  ;;  %v1676_v12 = vpop.permute.xlu0 %1675 }
 0x13c   : > { %vm1888_vm7 = vmand %vm3693_vm13, %vm1824_vm6  ;;  %vm4872_vm13 = vcmp.ge.s32.totalorder %v3013_v10, %v3253_v37  ;;  %vm1960_vm4 = vcmp.le.s32.totalorder %v1667_v51, %v3307_v27  ;;  %v2219_v16 = vmul.f32 %v2086_v48, %v2086_v48  ;;  %v2661_v2 = vpop.f32.mrf.mxu1 }
 0x13d   : > { %vm2021_vm15 = vmand %vm1888_vm7, %vm1957_vm3  ;;  %vm1826_vm7 = vcmp.ge.s32.totalorder %v1664_v34, %v3305_v1  ;;  %v2280_v58 = vadd.f32 %v2279_v52, %v2217_v43  ;;  %v3878_v60 = vadd.f32 %v2661_v2, %v3076_v4  ;;  %v4893_v52 = vld [vmem:[#allocation2_spill] sm:$0xff] }
 0x13e   : > { %vm3808_vm6 = vmand %vm4872_vm13, %vm4871_vm11  ;;  %v2085_v5 = vsel %vm2021_vm15, %v3186_v32, 0.0  ;;  %vm4875_vm13 = vcmp.le.s32.totalorder %v3015_v11, %v3255_v44  ;;  %vm4876_vm15 = vcmp.ge.s32.totalorder %v3015_v11, %v3253_v37  ;;  %v3841_v11 = vadd.f32 %v3076_v4, %v999_v49 }
 0x13f   : > { %vm1891_vm3 = vmand %vm3715_vm12, %vm1827_vm8  ;;  %v2148_v10 = vadd.f32 %v2147_v63, %v2085_v5  ;;  %v2218_v28 = vmul.f32 %v2085_v5, %v2085_v5  ;;  %vm4879_vm8 = vcmp.le.s32.totalorder %v3019_v14, %v3255_v44  ;;  %1089 = vst [vmem:[%s3086_s29 + $0x1f0] sm:$0xff] %v3878_v60  ;;  %v1685_v63 = vpop.permute.xlu1 %1684  ;;  %v1682_v49 = vpop.permute.xlu0 %1681 }
 0x140   : > { %vm2024_vm11 = vmand %vm1891_vm3, %vm1960_vm4  ;;  %vm1961_vm3 = vcmp.le.s32.totalorder %v1670_v42, %v3307_v27  ;;  %1084 = vst [vmem:[%s3086_s29 + $0x1c8] sm:$0xff] %v3841_v11 }
 0x141   : > { %vm3827_vm12 = vmand %vm4876_vm15, %vm4875_vm13  ;;  %v2281_v29 = vadd.f32 %v2280_v58, %v2218_v28  ;;  %v2088_v56 = vsel %vm2024_vm11, %v3265_v41, 0.0  ;;  %v2149_v39 = vadd.f32 %v2148_v10, %v2086_v48  ;;  %vm1829_vm15 = vcmp.ge.s32.totalorder %v1673_v0, %v3305_v1 }
 0x142   : > { %vm1890_vm4 = vmand %vm3737_vm10, %vm1826_vm7  ;;  %vm4880_vm10 = vcmp.ge.s32.totalorder %v3019_v14, %v3253_v37  ;;  %vm1962_vm11 = vcmp.le.s32.totalorder %v1673_v0, %v3307_v27  ;;  %v1012_v14 = vpop.f32.mrf.mxu1  ;;  %v2221_v24 = vmul.f32 %v2088_v56, %v2088_v56 }
 0x143   : > { %vm2023_vm13 = vmand %vm1890_vm4, %vm1959_vm1  ;;  %vm1828_vm4 = vcmp.ge.s32.totalorder %v1670_v42, %v3305_v1  ;;  %v2282_v30 = vadd.f32 %v2281_v29, %v2219_v16  ;;  %v4901_v16 = vld [vmem:[#allocation4_spill] sm:$0xff]  ;;  %v1691_v2 = vpop.permute.xlu1 %1690 }
 0x144   : > { %vm3853_vm7 = vmand %vm4880_vm10, %vm4879_vm8  ;;  %v2087_v41 = vsel %vm2023_vm13, %v3238_v33, 0.0  ;;  %vm4883_vm10 = vcmp.le.s32.totalorder %v3021_v15, %v3255_v44  ;;  %vm4884_vm13 = vcmp.ge.s32.totalorder %v3021_v15, %v3253_v37  ;;  %v2709_v15 = vld [vmem:[%s4720_s2] ss:$0 sm:$0xff]  ;;  %v2662_v4 = vpop.f32.mrf.mxu1 }
 0x145   : > { %vm1893_vm1 = vmand %vm3761_vm0, %vm1829_vm15  ;;  %v2150_v54 = vadd.f32 %v2149_v39, %v2087_v41  ;;  %v2220_v59 = vmul.f32 %v2087_v41, %v2087_v41  ;;  %vm1443_vm15 = vcmp.ge.s32.totalorder %v3033_v23, %v3253_v37  ;;  %v3889_v55 = vadd.f32 %v2709_v15, %v1012_v14  ;;  %v1688_v39 = vpop.permute.xlu0 %1687  ;;  %v4910_v33 = vld [vmem:[#allocation6_spill] sm:$0xff] }
 0x146   : > { %vm2026_vm8 = vmand %vm1893_vm1, %vm1962_vm11  ;;  %vm1512_vm1 = vcmp.le.s32.totalorder %v3033_v23, %v3255_v44  ;;  %v1015_v18 = vpop.f32.mrf.mxu1  ;;  %v3925_v35 = vadd.f32 %v2709_v15, %v2662_v4 }
 0x147   : > { %vm3873_vm0 = vmand %vm4884_vm13, %vm4883_vm10  ;;  %v2283_v57 = vadd.f32 %v2282_v30, %v2220_v59  ;;  %v2090_v61 = vsel %vm2026_vm8, %v3249_v36, 0.0  ;;  %v2151_v6 = vadd.f32 %v2150_v54, %v2088_v56  ;;  %vm1831_vm13 = vcmp.ge.s32.totalorder %v1679_v38, %v3305_v1  ;;  %v4889_v36 = vld [vmem:[#allocation32_spill] sm:$0xff]  ;;  %1087 = vst [vmem:[%s3086_s29 + $0x1e0] sm:$0xff] %v3889_v55 }
 0x148   : > { %vm1892_vm11 = vmand %vm3784_vm2, %vm1828_vm4  ;;  %vm1964_vm4 = vcmp.le.s32.totalorder %v1679_v38, %v3307_v27  ;;  %vm1830_vm8 = vcmp.ge.s32.totalorder %v1676_v12, %v3305_v1  ;;  %v2223_v48 = vmul.f32 %v2090_v61, %v2090_v61  ;;  %1090 = vst [vmem:[%s3086_s29 + $0x1f8] sm:$0xff] %v3925_v35  ;;  %v1697_v38 = vpop.permute.xlu1 %1696 }
 0x149   : > { %vm2025_vm10 = vmand %vm1892_vm11, %vm1961_vm3  ;;  %vm1963_vm11 = vcmp.le.s32.totalorder %v1676_v12, %v3307_v27  ;;  %v2284_v43 = vadd.f32 %v2283_v57, %v2221_v24  ;;  %v4914_v12 = vld [vmem:[#allocation41_spill] sm:$0xff] }
 0x14a   : > { %vm3901_vm2 = vmand %vm1442_vm5, %vm1511_vm9  ;;  %v2089_v40 = vsel %vm2025_vm10, %v4889_v36, 0.0  ;;  %vm4890_vm9 = vcmp.ge.s32.totalorder %v3027_v19, %v3253_v37  ;;  %v3933_v19 = vadd.f32 %v2709_v15, %v1015_v18  ;;  %vm1965_vm10 = vcmp.le.s32.totalorder %v1682_v49, %v3307_v27  ;;  %v4918_v36 = vld [vmem:[#allocation7_spill] sm:$0xff] }
 0x14b   : > { %vm1895_vm3 = vmand %vm3808_vm6, %vm1831_vm13  ;;  %v2152_v9 = vadd.f32 %v2151_v6, %v2089_v40  ;;  %v2222_v13 = vmul.f32 %v2089_v40, %v2089_v40  ;;  %vm1515_vm13 = vcmp.le.s32.totalorder %v4893_v52, %v3255_v44  ;;  %v1694_v6 = vpop.permute.xlu0 %1693 }
 0x14c   : > { %vm2028_vm5 = vmand %vm1895_vm3, %vm1964_vm4  ;;  %vm1833_vm4 = vcmp.ge.s32.totalorder %v1685_v63, %v3305_v1  ;;  %1088 = vst [vmem:[%s3086_s29 + $0x1e8] sm:$0xff] %v3933_v19  ;;  %v1703_v51 = vpop.permute.xlu1 %1702 }
 0x14d   : > { %vm3921_vm6 = vmand %vm4890_vm9, %vm1510_vm14  ;;  %v2285_v34 = vadd.f32 %v2284_v43, %v2222_v13  ;;  %v2092_v25 = vsel %vm2028_vm5, %v3379_v31, 0.0  ;;  %v2153_v5 = vadd.f32 %v2152_v9, %v2090_v61  ;;  %vm4894_vm9 = vcmp.le.s32.totalorder %v3031_v22, %v3255_v44  ;;  %v4919_v13 = vld [vmem:[#allocation8_spill] sm:$0xff] }
 0x14e   : > { %vm1894_vm3 = vmand %vm3827_vm12, %vm1830_vm8  ;;  %vm4895_vm12 = vcmp.ge.s32.totalorder %v3031_v22, %v3253_v37  ;;  %vm1966_vm5 = vcmp.le.s32.totalorder %v1685_v63, %v3307_v27  ;;  %v4898_v22 = vld [vmem:[#allocation3_spill] sm:$0xff]  ;;  %v2225_v0 = vmul.f32 %v2092_v25, %v2092_v25  ;;  %v4923_v63 = vld [vmem:[#allocation42_spill] sm:$0xff] }
 0x14f   : > { %vm2027_vm14 = vmand %vm1894_vm3, %vm1963_vm11  ;;  %vm1832_vm3 = vcmp.ge.s32.totalorder %v1682_v49, %v3305_v1  ;;  %v2286_v32 = vadd.f32 %v2285_v34, %v2223_v48  ;;  %v4925_v49 = vld [vmem:[#allocation40_spill] sm:$0xff] }
 0x150   : > { %vm3945_vm8 = vmand %vm4895_vm12, %vm4894_vm9  ;;  %v2091_v31 = vsel %vm2027_vm14, %v3295_v20, 0.0  ;;  %vm1514_vm14 = vcmp.le.s32.totalorder %v4898_v22, %v3255_v44  ;;  %vm1517_vm9 = vcmp.le.s32.totalorder %v4901_v16, %v3255_v44  ;;  %v4929_v20 = vld [vmem:[#allocation10_spill] sm:$0xff] }
 0x151   : > { %vm1897_vm11 = vmand %vm3853_vm7, %vm1833_vm4  ;;  %v2154_v28 = vadd.f32 %v2153_v5, %v2091_v31  ;;  %v2224_v58 = vmul.f32 %v2091_v31, %v2091_v31  ;;  %v1700_v5 = vpop.permute.xlu0 %1699 }
 0x152   : > { %vm2030_vm12 = vmand %vm1897_vm11, %vm1966_vm5  ;;  %vm4902_vm5 = vcmp.ge.s32.totalorder %v4893_v52, %v3253_v37 }
 0x153   : > { %vm3967_vm7 = vmand %vm1443_vm15, %vm1512_vm1  ;;  %v2287_v29 = vadd.f32 %v2286_v32, %v2224_v58  ;;  %v2094_v23 = vsel %vm2030_vm12, %v3329_v53, 0.0  ;;  %v2155_v56 = vadd.f32 %v2154_v28, %v2092_v25  ;;  %vm1835_vm1 = vcmp.ge.s32.totalorder %v1691_v2, %v3305_v1  ;;  %v4906_v53 = vld [vmem:[#allocation5_spill] sm:$0xff] }
 0x154   : > { %vm1896_vm11 = vmand %vm3873_vm0, %vm1832_vm3  ;;  %vm1834_vm3 = vcmp.ge.s32.totalorder %v1688_v39, %v3305_v1  ;;  %vm1967_vm12 = vcmp.le.s32.totalorder %v1688_v39, %v3307_v27  ;;  %v2227_v24 = vmul.f32 %v2094_v23, %v2094_v23 }
 0x155   : > { %vm2029_vm15 = vmand %vm1896_vm11, %vm1965_vm10  ;;  %vm1968_vm10 = vcmp.le.s32.totalorder %v1691_v2, %v3307_v27  ;;  %v2288_v59 = vadd.f32 %v2287_v29, %v2225_v0  ;;  %vm1519_vm11 = vcmp.le.s32.totalorder %v4910_v33, %v3255_v44  ;;  %v1709_v0 = vpop.permute.xlu1 %1708  ;;  %v1706_v39 = vpop.permute.xlu0 %1705 }
 0x156   : > { %vm3989_vm4 = vmand %vm4902_vm5, %vm1515_vm13  ;;  %v2093_v41 = vsel %vm2029_vm15, %v4905_v17, 0.0  ;;  %vm4907_vm15 = vcmp.ge.s32.totalorder %v4898_v22, %v3253_v37  ;;  %vm1971_vm5 = vcmp.le.s32.totalorder %v1700_v5, %v3307_v27  ;;  %v4928_v22 = vld [vmem:[#allocation9_spill] sm:$0xff] }
 0x157   : > { %vm1899_vm0 = vmand %vm3901_vm2, %vm1835_vm1  ;;  %v2156_v14 = vadd.f32 %v2155_v56, %v2093_v41  ;;  %v2226_v54 = vmul.f32 %v2093_v41, %v2093_v41  ;;  %vm1516_vm1 = vcmp.le.s32.totalorder %v4906_v53, %v3255_v44 }
 0x158   : > { %vm2032_vm13 = vmand %vm1899_vm0, %vm1968_vm10 }
 0x159   : > { %vm4007_vm2 = vmand %vm4907_vm15, %vm1514_vm14  ;;  %vm4911_vm14 = vcmp.ge.s32.totalorder %v4901_v16, %v3253_v37  ;;  %v2289_v4 = vadd.f32 %v2288_v59, %v2226_v54  ;;  %v2096_v57 = vsel %vm2032_vm13, %v3497_v8, 0.0  ;;  %v2157_v61 = vadd.f32 %v2156_v14, %v2094_v23  ;;  %v4937_v14 = vld [vmem:[#allocation12_spill] sm:$0xff]  ;;  %v1715_v59 = vpop.permute.xlu1 %1714  ;;  %v1712_v15 = vpop.permute.xlu0 %1711 }
 0x15a   : > { %vm1898_vm0 = vmand %vm3921_vm6, %vm1834_vm3  ;;  %vm1837_vm6 = vcmp.ge.s32.totalorder %v1697_v38, %v3305_v1  ;;  %v2229_v43 = vmul.f32 %v2096_v57, %v2096_v57 }
 0x15b   : > { %vm4025_vm10 = vmand %vm4911_vm14, %vm1517_vm9  ;;  %vm1970_vm9 = vcmp.le.s32.totalorder %v1697_v38, %v3307_v27  ;;  %vm1836_vm14 = vcmp.ge.s32.totalorder %v1694_v6, %v3305_v1  ;;  %v2290_v9 = vadd.f32 %v2289_v4, %v2227_v24 }
 0x15c   : > { %vm2031_vm15 = vmand %vm1898_vm0, %vm1967_vm12  ;;  %vm4915_vm12 = vcmp.ge.s32.totalorder %v4906_v53, %v3253_v37  ;;  %vm1449_vm0 = vcmp.ge.s32.totalorder %v4918_v36, %v3253_v37 }
 0x15d   : > { %v2095_v62 = vsel %vm2031_vm15, %v4914_v12, 0.0  ;;  %vm1901_vm3 = vmand %vm3945_vm8, %vm1837_vm6  ;;  %vm1518_vm15 = vcmp.le.s32.totalorder %v4918_v36, %v3255_v44  ;;  %v4945_v12 = vld [vmem:[#allocation14_spill] sm:$0xff]  ;;  %v1721_v8 = vpop.permute.xlu1 %1720 }
 0x15e   : > { %vm4045_vm13 = vmand %vm4915_vm12, %vm1516_vm1  ;;  %v2158_v40 = vadd.f32 %v2157_v61, %v2095_v62  ;;  %v2228_v18 = vmul.f32 %v2095_v62, %v2095_v62  ;;  %vm4924_vm12 = vcmp.le.s32.totalorder %v1694_v6, %v3307_v27 }
 0x15f   : > { %vm2034_vm8 = vmand %vm1901_vm3, %vm1970_vm9  ;;  %vm4920_vm3 = vcmp.ge.s32.totalorder %v4910_v33, %v3253_v37 }
 0x160   : > { %vm1900_vm1 = vmand %vm3967_vm7, %vm1836_vm14  ;;  %v2291_v48 = vadd.f32 %v2290_v9, %v2228_v18  ;;  %v2098_v34 = vsel %vm2034_vm8, %v4923_v63, 0.0  ;;  %v2159_v25 = vadd.f32 %v2158_v40, %v2096_v57  ;;  %vm1839_vm7 = vcmp.ge.s32.totalorder %v1703_v51, %v3305_v1  ;;  %v2710_v18 = vld [vmem:[%s3086_s29 + $0x108] sm:$0xff] }
 0x161   : > { %vm4065_vm9 = vmand %vm4920_vm3, %vm1519_vm11  ;;  %vm1972_vm11 = vcmp.le.s32.totalorder %v1703_v51, %v3307_v27  ;;  %vm1838_vm3 = vcmp.ge.s32.totalorder %v1700_v5, %v3305_v1  ;;  %v2231_v16 = vmul.f32 %v2098_v34, %v2098_v34  ;;  %v2711_v51 = vld [vmem:[%s3086_s29 + $0x100] sm:$0xff]  ;;  %v4952_v63 = vld [vmem:[#allocation15_spill] sm:$0xff]  ;;  %v1727_v31 = vpop.permute.xlu1 %1726 }
 0x162   : > { %vm2033_vm6 = vmand %vm1900_vm1, %vm4924_vm12  ;;  %v2292_v32 = vadd.f32 %v2291_v48, %v2229_v43  ;;  %vm1520_vm1 = vcmp.le.s32.totalorder %v4928_v22, %v3255_v44  ;;  %v1718_v43 = vpop.permute.xlu0 %1717 }
 0x163   : > { %v2097_v10 = vsel %vm2033_vm6, %v4925_v49, 0.0  ;;  %vm1903_vm14 = vmand %vm3989_vm4, %vm1839_vm7  ;;  %vm1451_vm6 = vcmp.ge.s32.totalorder %v4928_v22, %v3253_v37  ;;  %vm1973_vm7 = vcmp.le.s32.totalorder %v1706_v39, %v3307_v27  ;;  %v4953_v49 = vld [vmem:[#allocation16_spill] sm:$0xff] }
 0x164   : > { %vm4085_vm8 = vmand %vm1449_vm0, %vm1518_vm15  ;;  %v2160_v28 = vadd.f32 %v2159_v25, %v2097_v10  ;;  %v2230_v58 = vmul.f32 %v2097_v10, %v2097_v10  ;;  %vm4930_vm15 = vcmp.le.s32.totalorder %v4919_v13, %v3255_v44 }
 0x165   : > { %vm2036_vm4 = vmand %vm1903_vm14, %vm1972_vm11  ;;  %vm4931_vm14 = vcmp.ge.s32.totalorder %v4919_v13, %v3253_v37 }
 0x166   : > { %vm1902_vm0 = vmand %vm4007_vm2, %vm1838_vm3  ;;  %v2293_v29 = vadd.f32 %v2292_v32, %v2230_v58  ;;  %v2100_v23 = vsel %vm2036_vm4, %v3604_v21, 0.0  ;;  %v2161_v56 = vadd.f32 %v2160_v28, %v2098_v34  ;;  %vm1841_vm2 = vcmp.ge.s32.totalorder %v1709_v0, %v3305_v1  ;;  %v2712_v58 = vld [vmem:[%s3086_s29 + $0x118] sm:$0xff]  ;;  %v4961_v21 = vld [vmem:[#allocation18_spill] sm:$0xff] }
 0x167   : > { %vm4105_vm11 = vmand %vm4931_vm14, %vm4930_vm15  ;;  %vm1974_vm15 = vcmp.le.s32.totalorder %v1709_v0, %v3307_v27  ;;  %vm1840_vm14 = vcmp.ge.s32.totalorder %v1706_v39, %v3305_v1  ;;  %v2233_v54 = vmul.f32 %v2100_v23, %v2100_v23  ;;  %v2713_v0 = vld [vmem:[%s3086_s29 + $0x110] sm:$0xff] }
 0x168   : > { %vm2035_vm12 = vmand %vm1902_vm0, %vm1971_vm5  ;;  %v2294_v53 = vadd.f32 %v2293_v29, %v2231_v16  ;;  %v1724_v16 = vpop.permute.xlu0 %1723 }
 0x169   : > { %v2099_v42 = vsel %vm2035_vm12, %v3554_v47, 0.0  ;;  %vm1905_vm3 = vmand %vm4025_vm10, %vm1841_vm2  ;;  %v4936_v47 = vld [vmem:[#allocation11_spill] sm:$0xff]  ;;  %vm1975_vm2 = vcmp.le.s32.totalorder %v1712_v15, %v3307_v27 }
 0x16a   : > { %vm4125_vm5 = vmand %vm1451_vm6, %vm1520_vm1  ;;  %vm1453_vm4 = vcmp.ge.s32.totalorder %v4936_v47, %v3253_v37  ;;  %v2162_v17 = vadd.f32 %v2161_v56, %v2099_v42  ;;  %v2232_v41 = vmul.f32 %v2099_v42, %v2099_v42  ;;  %vm1522_vm12 = vcmp.le.s32.totalorder %v4936_v47, %v3255_v44 }
 0x16b   : > { %vm2038_vm10 = vmand %vm1905_vm3, %vm1974_vm15  ;;  %vm4938_vm1 = vcmp.le.s32.totalorder %v4929_v20, %v3255_v44  ;;  %vm4939_vm3 = vcmp.ge.s32.totalorder %v4929_v20, %v3253_v37 }
 0x16c   : > { %vm1904_vm6 = vmand %vm4045_vm13, %vm1840_vm14  ;;  %v2295_v33 = vadd.f32 %v2294_v53, %v2232_v41  ;;  %v2102_v24 = vsel %vm2038_vm10, %v3595_v45, 0.0  ;;  %v2163_v38 = vadd.f32 %v2162_v17, %v2100_v23  ;;  %vm1843_vm13 = vcmp.ge.s32.totalorder %v1715_v59, %v3305_v1  ;;  %v4960_v23 = vld [vmem:[#allocation17_spill] sm:$0xff]  ;;  %v1733_v17 = vpop.permute.xlu1 %1732  ;;  %v1730_v30 = vpop.permute.xlu0 %1729 }
 0x16d   : > { %vm4145_vm15 = vmand %vm4939_vm3, %vm4938_vm1  ;;  %vm1976_vm1 = vcmp.le.s32.totalorder %v1715_v59, %v3307_v27  ;;  %vm1842_vm3 = vcmp.ge.s32.totalorder %v1712_v15, %v3305_v1  ;;  %v2235_v62 = vmul.f32 %v2102_v24, %v2102_v24  ;;  %v4968_v15 = vld [vmem:[#allocation19_spill] sm:$0xff] }
 0x16e   : > { %vm2037_vm0 = vmand %vm1904_vm6, %vm1973_vm7  ;;  %v2296_v6 = vadd.f32 %v2295_v33, %v2233_v54  ;;  %v2715_v33 = vld [vmem:[%s3086_s29 + $0x120] sm:$0xff] }
 0x16f   : > { %v2101_v4 = vsel %vm2037_vm0, %v3527_v50, 0.0  ;;  %vm1907_vm14 = vmand %vm4065_vm9, %vm1843_vm13  ;;  %v4944_v50 = vld [vmem:[#allocation13_spill] sm:$0xff]  ;;  %vm4946_vm13 = vcmp.le.s32.totalorder %v4937_v14, %v3255_v44 }
 0x170   : > { %vm4165_vm7 = vmand %vm1453_vm4, %vm1522_vm12  ;;  %vm1455_vm9 = vcmp.ge.s32.totalorder %v4944_v50, %v3253_v37  ;;  %v2164_v57 = vadd.f32 %v2163_v38, %v2101_v4  ;;  %v2234_v61 = vmul.f32 %v2101_v4, %v2101_v4  ;;  %vm1524_vm0 = vcmp.le.s32.totalorder %v4944_v50, %v3255_v44 }
 0x171   : > { %vm2040_vm10 = vmand %vm1907_vm14, %vm1976_vm1  ;;  %vm4947_vm14 = vcmp.ge.s32.totalorder %v4937_v14, %v3253_v37  ;;  %vm1977_vm4 = vcmp.le.s32.totalorder %v1718_v43, %v3307_v27  ;;  %v2714_v14 = vld [vmem:[%s3086_s29 + $0x128] sm:$0xff] }
 0x172   : > { %vm1906_vm12 = vmand %vm4085_vm8, %vm1842_vm3  ;;  %v2297_v40 = vadd.f32 %v2296_v6, %v2234_v61  ;;  %v2104_v9 = vsel %vm2040_vm10, %v2710_v18, 0.0  ;;  %v2165_v13 = vadd.f32 %v2164_v57, %v2102_v24  ;;  %vm1845_vm8 = vcmp.ge.s32.totalorder %v1721_v8, %v3305_v1  ;;  %v4969_v57 = vld [vmem:[#allocation20_spill] sm:$0xff]  ;;  %v1739_v6 = vpop.permute.xlu1 %1738  ;;  %v1736_v18 = vpop.permute.xlu0 %1735 }
 0x173   : > { %vm4185_vm1 = vmand %vm4947_vm14, %vm4946_vm13  ;;  %vm1978_vm13 = vcmp.le.s32.totalorder %v1721_v8, %v3307_v27  ;;  %vm1844_vm14 = vcmp.ge.s32.totalorder %v1718_v43, %v3305_v1  ;;  %v2237_v10 = vmul.f32 %v2104_v9, %v2104_v9  ;;  %v2716_v8 = vld [vmem:[%s3086_s29 + $0x138] sm:$0xff] }
 0x174   : > { %vm2039_vm6 = vmand %vm1906_vm12, %vm1975_vm2  ;;  %v2298_v5 = vadd.f32 %v2297_v40, %v2235_v62 }
 0x175   : > { %v2103_v52 = vsel %vm2039_vm6, %v2711_v51, 0.0  ;;  %vm1909_vm3 = vmand %vm4105_vm11, %vm1845_vm8  ;;  %vm1457_vm11 = vcmp.ge.s32.totalorder %v4952_v63, %v3253_v37  ;;  %vm1526_vm6 = vcmp.le.s32.totalorder %v4952_v63, %v3255_v44  ;;  %vm4954_vm8 = vcmp.le.s32.totalorder %v4945_v12, %v3255_v44  ;;  %v4976_v51 = vld [vmem:[#allocation21_spill] sm:$0xff] }
 0x176   : > { %vm4205_vm2 = vmand %vm1455_vm9, %vm1524_vm0  ;;  %v2166_v34 = vadd.f32 %v2165_v13, %v2103_v52  ;;  %v2236_v25 = vmul.f32 %v2103_v52, %v2103_v52  ;;  %vm1979_vm9 = vcmp.le.s32.totalorder %v1724_v16, %v3307_v27 }
 0x177   : > { %vm2042_vm10 = vmand %vm1909_vm3, %vm1978_vm13  ;;  %vm4955_vm3 = vcmp.ge.s32.totalorder %v4945_v12, %v3253_v37 }
 0x178   : > { %vm1908_vm0 = vmand %vm4125_vm5, %vm1844_vm14  ;;  %v2299_v28 = vadd.f32 %v2298_v5, %v2236_v25  ;;  %v2106_v32 = vsel %vm2042_vm10, %v2712_v58, 0.0  ;;  %v2167_v20 = vadd.f32 %v2166_v34, %v2104_v9  ;;  %vm1847_vm5 = vcmp.ge.s32.totalorder %v1727_v31, %v3305_v1  ;;  %v2717_v9 = vld [vmem:[%s3086_s29 + $0x130] sm:$0xff]  ;;  %v4977_v34 = vld [vmem:[#allocation22_spill] sm:$0xff]  ;;  %v1745_v5 = vpop.permute.xlu1 %1744  ;;  %v1742_v58 = vpop.permute.xlu0 %1741 }
 0x179   : > { %vm4225_vm13 = vmand %vm4955_vm3, %vm4954_vm8  ;;  %vm1980_vm8 = vcmp.le.s32.totalorder %v1727_v31, %v3307_v27  ;;  %vm1846_vm3 = vcmp.ge.s32.totalorder %v1724_v16, %v3305_v1  ;;  %v2239_v47 = vmul.f32 %v2106_v32, %v2106_v32  ;;  %v2718_v31 = vld [vmem:[%s3086_s29 + $0x148] sm:$0xff] }
 0x17a   : > { %vm2041_vm12 = vmand %vm1908_vm0, %vm1977_vm4  ;;  %v2300_v42 = vadd.f32 %v2299_v28, %v2237_v10 }
 0x17b   : > { %v2105_v2 = vsel %vm2041_vm12, %v2713_v0, 0.0  ;;  %vm1911_vm14 = vmand %vm4145_vm15, %vm1847_vm5  ;;  %vm1459_vm15 = vcmp.ge.s32.totalorder %v4960_v23, %v3253_v37  ;;  %vm1528_vm12 = vcmp.le.s32.totalorder %v4960_v23, %v3255_v44  ;;  %vm4962_vm5 = vcmp.le.s32.totalorder %v4953_v49, %v3255_v44  ;;  %v4984_v0 = vld [vmem:[#allocation23_spill] sm:$0xff] }
 0x17c   : > { %vm4245_vm4 = vmand %vm1457_vm11, %vm1526_vm6  ;;  %v2168_v56 = vadd.f32 %v2167_v20, %v2105_v2  ;;  %v2238_v39 = vmul.f32 %v2105_v2, %v2105_v2  ;;  %vm1981_vm11 = vcmp.le.s32.totalorder %v1730_v30, %v3307_v27 }
 0x17d   : > { %vm2044_vm10 = vmand %vm1911_vm14, %vm1980_vm8  ;;  %vm4963_vm14 = vcmp.ge.s32.totalorder %v4953_v49, %v3253_v37 }
 0x17e   : > { %vm1910_vm6 = vmand %vm4165_vm7, %vm1846_vm3  ;;  %v2301_v53 = vadd.f32 %v2300_v42, %v2238_v39  ;;  %v2108_v54 = vsel %vm2044_vm10, %v2714_v14, 0.0  ;;  %v2169_v59 = vadd.f32 %v2168_v56, %v2106_v32  ;;  %vm1849_vm7 = vcmp.ge.s32.totalorder %v1733_v17, %v3305_v1  ;;  %v2719_v32 = vld [vmem:[%s3086_s29 + $0x140] sm:$0xff]  ;;  %v4985_v56 = vld [vmem:[#allocation24_spill] sm:$0xff]  ;;  %v1751_v42 = vpop.permute.xlu1 %1750  ;;  %v1748_v14 = vpop.permute.xlu0 %1747 }
 0x17f   : > { %vm4265_vm8 = vmand %vm4963_vm14, %vm4962_vm5  ;;  %vm1982_vm5 = vcmp.le.s32.totalorder %v1733_v17, %v3307_v27  ;;  %vm1848_vm14 = vcmp.ge.s32.totalorder %v1730_v30, %v3305_v1  ;;  %v2241_v61 = vmul.f32 %v2108_v54, %v2108_v54  ;;  %v2720_v17 = vld [vmem:[%s3086_s29 + $0x158] sm:$0xff] }
 0x180   : > { %vm2043_vm0 = vmand %vm1910_vm6, %vm1979_vm9  ;;  %v2302_v50 = vadd.f32 %v2301_v53, %v2239_v47  ;;  %v5017_v30 = vld [vmem:[#allocation33_spill] sm:$0xff] }
 0x181   : > { %v2107_v24 = vsel %vm2043_vm0, %v2715_v33, 0.0  ;;  %vm1913_vm3 = vmand %vm4185_vm1, %vm1849_vm7  ;;  %vm1461_vm1 = vcmp.ge.s32.totalorder %v4968_v15, %v3253_v37  ;;  %vm1530_vm0 = vcmp.le.s32.totalorder %v4968_v15, %v3255_v44  ;;  %vm4970_vm7 = vcmp.le.s32.totalorder %v4961_v21, %v3255_v44  ;;  %v4992_v33 = vld [vmem:[#allocation25_spill] sm:$0xff] }
 0x182   : > { %vm4285_vm9 = vmand %vm1459_vm15, %vm1528_vm12  ;;  %v2170_v4 = vadd.f32 %v2169_v59, %v2107_v24  ;;  %v2240_v45 = vmul.f32 %v2107_v24, %v2107_v24  ;;  %vm1983_vm15 = vcmp.le.s32.totalorder %v1736_v18, %v3307_v27 }
 0x183   : > { %vm2046_vm10 = vmand %vm1913_vm3, %vm1982_vm5  ;;  %vm4971_vm3 = vcmp.ge.s32.totalorder %v4961_v21, %v3253_v37 }
 0x184   : > { %vm1912_vm12 = vmand %vm4205_vm2, %vm1848_vm14  ;;  %v2303_v62 = vadd.f32 %v2302_v50, %v2240_v45  ;;  %v2110_v36 = vsel %vm2046_vm10, %v2716_v8, 0.0  ;;  %v2171_v40 = vadd.f32 %v2170_v4, %v2108_v54  ;;  %vm1851_vm2 = vcmp.ge.s32.totalorder %v1739_v6, %v3305_v1  ;;  %v2721_v54 = vld [vmem:[%s3086_s29 + $0x150] sm:$0xff]  ;;  %v4993_v4 = vld [vmem:[#allocation26_spill] sm:$0xff]  ;;  %v1757_v50 = vpop.permute.xlu1 %1756  ;;  %v1754_v8 = vpop.permute.xlu0 %1753 }
 0x185   : > { %vm4305_vm5 = vmand %vm4971_vm3, %vm4970_vm7  ;;  %vm1984_vm7 = vcmp.le.s32.totalorder %v1739_v6, %v3307_v27  ;;  %vm1850_vm3 = vcmp.ge.s32.totalorder %v1736_v18, %v3305_v1  ;;  %v2243_v25 = vmul.f32 %v2110_v36, %v2110_v36  ;;  %v2722_v6 = vld [vmem:[%s3086_s29 + $0x168] sm:$0xff] }
 0x186   : > { %vm2045_vm6 = vmand %vm1912_vm12, %vm1981_vm11  ;;  %v2304_v63 = vadd.f32 %v2303_v62, %v2241_v61  ;;  %v5025_v18 = vld [vmem:[#allocation35_spill] sm:$0xff] }
 0x187   : > { %v2109_v13 = vsel %vm2045_vm6, %v2717_v9, 0.0  ;;  %vm1915_vm14 = vmand %vm4225_vm13, %vm1851_vm2  ;;  %vm1463_vm13 = vcmp.ge.s32.totalorder %v4976_v51, %v3253_v37  ;;  %vm1532_vm6 = vcmp.le.s32.totalorder %v4976_v51, %v3255_v44  ;;  %vm4978_vm2 = vcmp.le.s32.totalorder %v4969_v57, %v3255_v44  ;;  %v5000_v9 = vld [vmem:[#allocation27_spill] sm:$0xff] }
 0x188   : > { %vm4325_vm11 = vmand %vm1461_vm1, %vm1530_vm0  ;;  %v2172_v52 = vadd.f32 %v2171_v40, %v2109_v13  ;;  %v2242_v48 = vmul.f32 %v2109_v13, %v2109_v13  ;;  %vm1985_vm1 = vcmp.le.s32.totalorder %v1742_v58, %v3307_v27 }
 0x189   : > { %vm2048_vm10 = vmand %vm1915_vm14, %vm1984_vm7  ;;  %vm4979_vm14 = vcmp.ge.s32.totalorder %v4969_v57, %v3253_v37 }
 0x18a   : > { %vm1914_vm0 = vmand %vm4245_vm4, %vm1850_vm3  ;;  %v2305_v10 = vadd.f32 %v2304_v63, %v2242_v48  ;;  %v2112_v22 = vsel %vm2048_vm10, %v2718_v31, 0.0  ;;  %v2173_v28 = vadd.f32 %v2172_v52, %v2110_v36  ;;  %vm1853_vm4 = vcmp.ge.s32.totalorder %v1745_v5, %v3305_v1  ;;  %v2723_v36 = vld [vmem:[%s3086_s29 + $0x160] sm:$0xff]  ;;  %v5001_v52 = vld [vmem:[#allocation28_spill] sm:$0xff]  ;;  %v1763_v63 = vpop.permute.xlu1 %1762  ;;  %v1760_v31 = vpop.permute.xlu0 %1759 }
 0x18b   : > { %vm4345_vm7 = vmand %vm4979_vm14, %vm4978_vm2  ;;  %vm1986_vm2 = vcmp.le.s32.totalorder %v1745_v5, %v3307_v27  ;;  %vm1852_vm14 = vcmp.ge.s32.totalorder %v1742_v58, %v3305_v1  ;;  %v2245_v39 = vmul.f32 %v2112_v22, %v2112_v22  ;;  %v2724_v5 = vld [vmem:[%s3086_s29 + $0x178] sm:$0xff] }
 0x18c   : > { %vm2047_vm12 = vmand %vm1914_vm0, %vm1983_vm15  ;;  %v2306_v23 = vadd.f32 %v2305_v10, %v2243_v25 }
 0x18d   : > { %v2111_v20 = vsel %vm2047_vm12, %v2719_v32, 0.0  ;;  %vm1917_vm3 = vmand %vm4265_vm8, %vm1853_vm4  ;;  %vm1465_vm8 = vcmp.ge.s32.totalorder %v4984_v0, %v3253_v37  ;;  %vm1534_vm12 = vcmp.le.s32.totalorder %v4984_v0, %v3255_v44  ;;  %vm4986_vm4 = vcmp.le.s32.totalorder %v4977_v34, %v3255_v44  ;;  %v5008_v32 = vld [vmem:[#allocation29_spill] sm:$0xff] }
 0x18e   : > { %vm4365_vm15 = vmand %vm1463_vm13, %vm1532_vm6  ;;  %v2174_v2 = vadd.f32 %v2173_v28, %v2111_v20  ;;  %v2244_v29 = vmul.f32 %v2111_v20, %v2111_v20  ;;  %vm1987_vm13 = vcmp.le.s32.totalorder %v1748_v14, %v3307_v27 }
 0x18f   : > { %vm2050_vm10 = vmand %vm1917_vm3, %vm1986_vm2  ;;  %vm4987_vm3 = vcmp.ge.s32.totalorder %v4977_v34, %v3253_v37  ;;  %v2729_v34 = vld [vmem:[%s3086_s29 + $0x1a0] sm:$0xff] }
 0x190   : > { %vm1916_vm6 = vmand %vm4285_vm9, %vm1852_vm14  ;;  %v2307_v47 = vadd.f32 %v2306_v23, %v2244_v29  ;;  %v2114_v41 = vsel %vm2050_vm10, %v2720_v17, 0.0  ;;  %v2175_v53 = vadd.f32 %v2174_v2, %v2112_v22  ;;  %vm1855_vm9 = vcmp.ge.s32.totalorder %v1751_v42, %v3305_v1  ;;  %v2725_v22 = vld [vmem:[%s3086_s29 + $0x170] sm:$0xff]  ;;  %v5009_v2 = vld [vmem:[#allocation30_spill] sm:$0xff]  ;;  %v1769_v23 = vpop.permute.xlu1 %1768 }
 0x191   : > { %vm4385_vm2 = vmand %vm4987_vm3, %vm4986_vm4  ;;  %vm1988_vm4 = vcmp.le.s32.totalorder %v1751_v42, %v3307_v27  ;;  %vm1854_vm3 = vcmp.ge.s32.totalorder %v1748_v14, %v3305_v1  ;;  %v2247_v45 = vmul.f32 %v2114_v41, %v2114_v41  ;;  %v2726_v17 = vld [vmem:[%s3086_s29 + $0x180] sm:$0xff] }
 0x192   : > { %vm2049_vm0 = vmand %vm1916_vm6, %vm1985_vm1  ;;  %v2308_v15 = vadd.f32 %v2307_v47, %v2245_v39  ;;  %v1766_v47 = vpop.permute.xlu0 %1765 }
 0x193   : > { %v2113_v59 = vsel %vm2049_vm0, %v2721_v54, 0.0  ;;  %vm1919_vm14 = vmand %vm4305_vm5, %vm1855_vm9  ;;  %vm1467_vm5 = vcmp.ge.s32.totalorder %v4992_v33, %v3253_v37  ;;  %vm1536_vm0 = vcmp.le.s32.totalorder %v4992_v33, %v3255_v44  ;;  %vm4994_vm9 = vcmp.le.s32.totalorder %v4985_v56, %v3255_v44 }
 0x194   : > { %vm4405_vm1 = vmand %vm1465_vm8, %vm1534_vm12  ;;  %v2176_v24 = vadd.f32 %v2175_v53, %v2113_v59  ;;  %v2246_v38 = vmul.f32 %v2113_v59, %v2113_v59  ;;  %vm1989_vm8 = vcmp.le.s32.totalorder %v1754_v8, %v3307_v27  ;;  %v5016_v53 = vld [vmem:[#allocation31_spill] sm:$0xff] }
 0x195   : > { %vm2052_vm10 = vmand %vm1919_vm14, %vm1988_vm4  ;;  %vm4995_vm14 = vcmp.ge.s32.totalorder %v4985_v56, %v3253_v37 }
 0x196   : > { %vm1918_vm12 = vmand %vm4325_vm11, %vm1854_vm3  ;;  %v2309_v61 = vadd.f32 %v2308_v15, %v2246_v38  ;;  %v2116_v12 = vsel %vm2052_vm10, %v2722_v6, 0.0  ;;  %v2177_v62 = vadd.f32 %v2176_v24, %v2114_v41  ;;  %vm1857_vm11 = vcmp.ge.s32.totalorder %v1757_v50, %v3305_v1  ;;  %v1775_v24 = vpop.permute.xlu1 %1774  ;;  %v1772_v57 = vpop.permute.xlu0 %1771 }
 0x197   : > { %vm4425_vm4 = vmand %vm4995_vm14, %vm4994_vm9  ;;  %vm1990_vm9 = vcmp.le.s32.totalorder %v1757_v50, %v3307_v27  ;;  %vm1856_vm14 = vcmp.ge.s32.totalorder %v1754_v8, %v3305_v1  ;;  %v2249_v48 = vmul.f32 %v2116_v12, %v2116_v12 }
 0x198   : > { %vm2051_vm6 = vmand %vm1918_vm12, %vm1987_vm13  ;;  %v2310_v51 = vadd.f32 %v2309_v61, %v2247_v45  ;;  %v2728_v61 = vld [vmem:[%s3086_s29 + $0x190] sm:$0xff] }
 0x199   : > { %v2115_v40 = vsel %vm2051_vm6, %v2723_v36, 0.0  ;;  %vm1921_vm3 = vmand %vm4345_vm7, %vm1857_vm11  ;;  %vm1469_vm7 = vcmp.ge.s32.totalorder %v5000_v9, %v3253_v37  ;;  %vm1538_vm6 = vcmp.le.s32.totalorder %v5000_v9, %v3255_v44  ;;  %vm5002_vm11 = vcmp.le.s32.totalorder %v4993_v4, %v3255_v44 }
 0x19a   : > { %vm4445_vm13 = vmand %vm1467_vm5, %vm1536_vm0  ;;  %v2178_v13 = vadd.f32 %v2177_v62, %v2115_v40  ;;  %v2248_v43 = vmul.f32 %v2115_v40, %v2115_v40  ;;  %vm1991_vm5 = vcmp.le.s32.totalorder %v1760_v31, %v3307_v27  ;;  %v5024_v62 = vld [vmem:[#allocation34_spill] sm:$0xff] }
 0x19b   : > { %vm2054_vm10 = vmand %vm1921_vm3, %vm1990_vm9  ;;  %vm5003_vm3 = vcmp.ge.s32.totalorder %v4993_v4, %v3253_v37  ;;  %v2727_v4 = vld [vmem:[%s3086_s29 + $0x198] sm:$0xff] }
 0x19c   : > { %vm1920_vm0 = vmand %vm4365_vm15, %vm1856_vm14  ;;  %v2311_v25 = vadd.f32 %v2310_v51, %v2248_v43  ;;  %v2118_v49 = vsel %vm2054_vm10, %v2724_v5, 0.0  ;;  %v2179_v10 = vadd.f32 %v2178_v13, %v2116_v12  ;;  %vm1859_vm15 = vcmp.ge.s32.totalorder %v1763_v63, %v3305_v1  ;;  %v1781_v13 = vpop.permute.xlu1 %1780  ;;  %v5032_v5 = vld [vmem:[#allocation36_spill] sm:$0xff] }
 0x19d   : > { %vm4465_vm9 = vmand %vm5003_vm3, %vm5002_vm11  ;;  %vm1992_vm11 = vcmp.le.s32.totalorder %v1763_v63, %v3307_v27  ;;  %vm1858_vm3 = vcmp.ge.s32.totalorder %v1760_v31, %v3305_v1  ;;  %vm1471_vm10 = vcmp.ge.s32.totalorder %v5008_v32, %v3253_v37  ;;  %v2251_v29 = vmul.f32 %v2118_v49, %v2118_v49  ;;  %v1778_v63 = vpop.permute.xlu0 %1777 }
 0x19e   : > { %vm2053_vm12 = vmand %vm1920_vm0, %vm1989_vm8  ;;  %v2312_v0 = vadd.f32 %v2311_v25, %v2249_v48 }
 0x19f   : > { %v2117_v28 = vsel %vm2053_vm12, %v2725_v22, 0.0  ;;  %vm1923_vm14 = vmand %vm4385_vm2, %vm1859_vm15  ;;  %vm1540_vm12 = vcmp.le.s32.totalorder %v5008_v32, %v3255_v44  ;;  %vm5010_vm15 = vcmp.le.s32.totalorder %v5001_v52, %v3255_v44  ;;  %v5033_v22 = vld [vmem:[#allocation38_spill] sm:$0xff] }
 0x1a0   : > { %vm4485_vm8 = vmand %vm1469_vm7, %vm1538_vm6  ;;  %v2180_v20 = vadd.f32 %v2179_v10, %v2117_v28  ;;  %v2250_v16 = vmul.f32 %v2117_v28, %v2117_v28  ;;  %vm1993_vm7 = vcmp.le.s32.totalorder %v1766_v47, %v3307_v27  ;;  %v1787_v58 = vpop.permute.xlu1 %1786 }
 0x1a1   : > { %vm2056_vm2 = vmand %vm1923_vm14, %vm1992_vm11  ;;  %vm5011_vm14 = vcmp.ge.s32.totalorder %v5001_v52, %v3253_v37 }
 0x1a2   : > { %vm1922_vm6 = vmand %vm4405_vm1, %vm1858_vm3  ;;  %v2313_v39 = vadd.f32 %v2312_v0, %v2250_v16  ;;  %v2120_v42 = vsel %vm2056_vm2, %v3658_v26, 0.0  ;;  %v2181_v21 = vadd.f32 %v2180_v20, %v2118_v49  ;;  %vm1861_vm1 = vcmp.ge.s32.totalorder %v1769_v23, %v3305_v1  ;;  %v2730_v16 = vld [vmem:[%s3086_s29 + $0x1b8] sm:$0xff] }
 0x1a3   : > { %vm4505_vm11 = vmand %vm5011_vm14, %vm5010_vm15  ;;  %vm1994_vm15 = vcmp.le.s32.totalorder %v1769_v23, %v3307_v27  ;;  %vm1860_vm14 = vcmp.ge.s32.totalorder %v1766_v47, %v3305_v1  ;;  %v2253_v33 = vmul.f32 %v2120_v42, %v2120_v42  ;;  %v2731_v23 = vld [vmem:[%s3086_s29 + $0x1b0] sm:$0xff] }
 0x1a4   : > { %vm2055_vm0 = vmand %vm1922_vm6, %vm1991_vm5  ;;  %v2314_v59 = vadd.f32 %v2313_v39, %v2251_v29  ;;  %v1784_v29 = vpop.permute.xlu0 %1783  ;;  %v1793_v26 = vpop.permute.xlu1 %1792 }
 0x1a5   : > { %v2119_v41 = vsel %vm2055_vm0, %v2726_v17, 0.0  ;;  %vm1925_vm3 = vmand %vm4425_vm4, %vm1861_vm1  ;;  %vm1473_vm4 = vcmp.ge.s32.totalorder %v5016_v53, %v3253_v37  ;;  %vm1542_vm0 = vcmp.le.s32.totalorder %v5016_v53, %v3255_v44  ;;  %vm5018_vm1 = vcmp.le.s32.totalorder %v5009_v2, %v3255_v44  ;;  %v5040_v17 = vld [vmem:[#allocation39_spill] sm:$0xff] }
 0x1a6   : > { %vm4525_vm5 = vmand %vm1471_vm10, %vm1540_vm12  ;;  %v2182_v14 = vadd.f32 %v2181_v21, %v2119_v41  ;;  %v2252_v54 = vmul.f32 %v2119_v41, %v2119_v41  ;;  %vm1995_vm10 = vcmp.le.s32.totalorder %v1772_v57, %v3307_v27 }
 0x1a7   : > { %vm2058_vm2 = vmand %vm1925_vm3, %vm1994_vm15  ;;  %vm5019_vm3 = vcmp.ge.s32.totalorder %v5009_v2, %v3253_v37 }
 0x1a8   : > { %vm1924_vm12 = vmand %vm4445_vm13, %vm1860_vm14  ;;  %v2315_v15 = vadd.f32 %v2314_v59, %v2252_v54  ;;  %v2122_v45 = vsel %vm2058_vm2, %v2727_v4, 0.0  ;;  %v2183_v50 = vadd.f32 %v2182_v14, %v2120_v42  ;;  %vm1863_vm13 = vcmp.ge.s32.totalorder %v1775_v24, %v3305_v1  ;;  %v1790_v59 = vpop.permute.xlu0 %1789  ;;  %v1799_v4 = vpop.permute.xlu1 %1798 }
 0x1a9   : > { %vm4545_vm15 = vmand %vm5019_vm3, %vm5018_vm1  ;;  %vm1996_vm1 = vcmp.le.s32.totalorder %v1775_v24, %v3307_v27  ;;  %vm1862_vm3 = vcmp.ge.s32.totalorder %v1772_v57, %v3305_v1  ;;  %vm1475_vm2 = vcmp.ge.s32.totalorder %v5024_v62, %v3253_v37  ;;  %v2255_v9 = vmul.f32 %v2122_v45, %v2122_v45 }
 0x1aa   : > { %vm2057_vm6 = vmand %vm1924_vm12, %vm1993_vm7  ;;  %v2316_v40 = vadd.f32 %v2315_v15, %v2253_v33 }
 0x1ab   : > { %v2121_v6 = vsel %vm2057_vm6, %v2728_v61, 0.0  ;;  %vm1927_vm14 = vmand %vm4465_vm9, %vm1863_vm13  ;;  %vm1544_vm6 = vcmp.le.s32.totalorder %v5024_v62, %v3255_v44  ;;  %vm5026_vm13 = vcmp.le.s32.totalorder %v5017_v30, %v3255_v44  ;;  %v2732_v61 = vld [vmem:[%s3086_s29 + $0x1d0] sm:$0xff] }
 0x1ac   : > { %vm4565_vm7 = vmand %vm1473_vm4, %vm1542_vm0  ;;  %v2184_v8 = vadd.f32 %v2183_v50, %v2121_v6  ;;  %v2254_v36 = vmul.f32 %v2121_v6, %v2121_v6  ;;  %vm1997_vm4 = vcmp.le.s32.totalorder %v1778_v63, %v3307_v27 }
 0x1ad   : > { %vm2060_vm9 = vmand %vm1927_vm14, %vm1996_vm1  ;;  %vm5027_vm14 = vcmp.ge.s32.totalorder %v5017_v30, %v3253_v37 }
 0x1ae   : > { %vm1926_vm0 = vmand %vm4485_vm8, %vm1862_vm3  ;;  %v2317_v51 = vadd.f32 %v2316_v40, %v2254_v36  ;;  %v2124_v52 = vsel %vm2060_vm9, %v3749_v3, 0.0  ;;  %v2185_v48 = vadd.f32 %v2184_v8, %v2122_v45  ;;  %vm1865_vm8 = vcmp.ge.s32.totalorder %v1781_v13, %v3305_v1  ;;  %v1805_v8 = vpop.permute.xlu1 %1804 }
 0x1af   : > { %vm4585_vm1 = vmand %vm5027_vm14, %vm5026_vm13  ;;  %vm1998_vm13 = vcmp.le.s32.totalorder %v1781_v13, %v3307_v27  ;;  %vm1864_vm14 = vcmp.ge.s32.totalorder %v1778_v63, %v3305_v1  ;;  %v2257_v28 = vmul.f32 %v2124_v52, %v2124_v52 }
 0x1b0   : > { %vm2059_vm12 = vmand %vm1926_vm0, %vm1995_vm10  ;;  %v2318_v31 = vadd.f32 %v2317_v51, %v2255_v9 }
 0x1b1   : > { %v2123_v25 = vsel %vm2059_vm12, %v2729_v34, 0.0  ;;  %vm1929_vm3 = vmand %vm4505_vm11, %vm1865_vm8  ;;  %vm1477_vm11 = vcmp.ge.s32.totalorder %v5032_v5, %v3253_v37  ;;  %vm1546_vm12 = vcmp.le.s32.totalorder %v5032_v5, %v3255_v44  ;;  %vm5034_vm8 = vcmp.le.s32.totalorder %v5025_v18, %v3255_v44 }
 0x1b2   : > { %vm4605_vm10 = vmand %vm1475_vm2, %vm1544_vm6  ;;  %v2186_v49 = vadd.f32 %v2185_v48, %v2123_v25  ;;  %v2256_v10 = vmul.f32 %v2123_v25, %v2123_v25  ;;  %vm1999_vm2 = vcmp.le.s32.totalorder %v1784_v29, %v3307_v27 }
 0x1b3   : > { %vm2062_vm9 = vmand %vm1929_vm3, %vm1998_vm13  ;;  %vm5035_vm3 = vcmp.ge.s32.totalorder %v5025_v18, %v3253_v37 }
 0x1b4   : > { %vm1928_vm6 = vmand %vm4525_vm5, %vm1864_vm14  ;;  %v2319_v20 = vadd.f32 %v2318_v31, %v2256_v10  ;;  %v2126_v0 = vsel %vm2062_vm9, %v2730_v16, 0.0  ;;  %v2187_v2 = vadd.f32 %v2186_v49, %v2124_v52  ;;  %vm1867_vm5 = vcmp.ge.s32.totalorder %v1787_v58, %v3305_v1 }
 0x1b5   : > { %vm4625_vm13 = vmand %vm5035_vm3, %vm5034_vm8  ;;  %vm2000_vm8 = vcmp.le.s32.totalorder %v1787_v58, %v3307_v27  ;;  %vm1866_vm3 = vcmp.ge.s32.totalorder %v1784_v29, %v3305_v1  ;;  %vm1479_vm9 = vcmp.ge.s32.totalorder %v5040_v17, %v3253_v37  ;;  %v2259_v41 = vmul.f32 %v2126_v0, %v2126_v0 }
 0x1b6   : > { %vm2061_vm0 = vmand %vm1928_vm6, %vm1997_vm4  ;;  %v2320_v47 = vadd.f32 %v2319_v20, %v2257_v28 }
 0x1b7   : > { %v2125_v56 = vsel %vm2061_vm0, %v2731_v23, 0.0  ;;  %vm1931_vm14 = vmand %vm4545_vm15, %vm1867_vm5  ;;  %vm1548_vm0 = vcmp.le.s32.totalorder %v5040_v17, %v3255_v44  ;;  %vm5041_vm5 = vcmp.le.s32.totalorder %v5033_v22, %v3255_v44  ;;  %v1796_v44 = vpop.permute.xlu0 %1795 }
 0x1b8   : > { %vm4645_vm4 = vmand %vm1477_vm11, %vm1546_vm12  ;;  %v2188_v42 = vadd.f32 %v2187_v2, %v2125_v56  ;;  %v2258_v21 = vmul.f32 %v2125_v56, %v2125_v56  ;;  %vm1869_vm12 = vcmp.ge.s32.totalorder %v1793_v26, %v3305_v1 }
 0x1b9   : > { %vm2064_vm15 = vmand %vm1931_vm14, %vm2000_vm8  ;;  %vm5042_vm14 = vcmp.ge.s32.totalorder %v5033_v22, %v3253_v37 }
 0x1ba   : > { %vm1930_vm6 = vmand %vm4565_vm7, %vm1866_vm3  ;;  %v2321_v53 = vadd.f32 %v2320_v47, %v2258_v21  ;;  %v2128_v14 = vsel %vm2064_vm15, %v3841_v11, 0.0  ;;  %v2189_v54 = vadd.f32 %v2188_v42, %v2126_v0  ;;  %vm1868_vm3 = vcmp.ge.s32.totalorder %v1790_v59, %v3305_v1 }
 0x1bb   : > { %vm2063_vm11 = vmand %vm1930_vm6, %vm1999_vm2  ;;  %vm2002_vm2 = vcmp.le.s32.totalorder %v1793_v26, %v3307_v27  ;;  %vm2001_vm15 = vcmp.le.s32.totalorder %v1790_v59, %v3307_v27  ;;  %v2261_v15 = vmul.f32 %v2128_v14, %v2128_v14  ;;  %v1802_v9 = vpop.permute.xlu0 %1801 }
 0x1bc   : > { %vm4663_vm8 = vmand %vm5042_vm14, %vm5041_vm5  ;;  %v2127_v33 = vsel %vm2063_vm11, %v3796_v7, 0.0  ;;  %v2322_v38 = vadd.f32 %v2321_v53, %v2259_v41  ;;  %vm1871_vm5 = vcmp.ge.s32.totalorder %v1799_v4, %v3305_v1  ;;  %vm1870_vm14 = vcmp.ge.s32.totalorder %v1796_v44, %v3305_v1 }
 0x1bd   : > { %vm1933_vm7 = vmand %vm4585_vm1, %vm1869_vm12  ;;  %v2190_v11 = vadd.f32 %v2189_v54, %v2127_v33  ;;  %v2260_v24 = vmul.f32 %v2127_v33, %v2127_v33 }
 0x1be   : > { %vm2066_vm6 = vmand %vm1933_vm7, %vm2002_vm2 }
 0x1bf   : > { %vm4679_vm11 = vmand %vm1479_vm9, %vm1548_vm0  ;;  %v2323_v45 = vadd.f32 %v2322_v38, %v2260_v24  ;;  %v2130_v50 = vsel %vm2066_vm6, %v3832_v46, 0.0  ;;  %v2191_v57 = vadd.f32 %v2190_v11, %v2128_v14  ;;  %vm2004_vm0 = vcmp.le.s32.totalorder %v1799_v4, %v3307_v27 }
 0x1c0   : > { %vm1932_vm1 = vmand %vm4605_vm10, %vm1868_vm3  ;;  %vm2003_vm10 = vcmp.le.s32.totalorder %v1796_v44, %v3307_v27  ;;  %v2263_v46 = vmul.f32 %v2130_v50, %v2130_v50  ;;  %vm2006_vm6 = vcmp.le.s32.totalorder %v1805_v8, %v3307_v27 }
 0x1c1   : > { %vm2065_vm12 = vmand %vm1932_vm1, %vm2001_vm15  ;;  %v2324_v62 = vadd.f32 %v2323_v45, %v2261_v15  ;;  %vm1872_vm1 = vcmp.ge.s32.totalorder %v1802_v9, %v3305_v1 }
 0x1c2   : > { %v2129_v6 = vsel %vm2065_vm12, %v2732_v61, 0.0  ;;  %vm1935_vm9 = vmand %vm4625_vm13, %vm1871_vm5  ;;  %vm1873_vm13 = vcmp.ge.s32.totalorder %v1805_v8, %v3305_v1 }
 0x1c3   : > { %v2192_v37 = vadd.f32 %v2191_v57, %v2129_v6  ;;  %v2262_v12 = vmul.f32 %v2129_v6, %v2129_v6  ;;  %vm2068_vm7 = vmand %vm1935_vm9, %vm2004_vm0 }
 0x1c4   : > { %vm1934_vm2 = vmand %vm4645_vm4, %vm1870_vm14  ;;  %v2132_v40 = vsel %vm2068_vm7, %v3933_v19, 0.0  ;;  %vm2005_vm4 = vcmp.le.s32.totalorder %v1802_v9, %v3307_v27 }
 0x1c5   : > { %v2325_v36 = vadd.f32 %v2324_v62, %v2262_v12  ;;  %vm2067_vm3 = vmand %vm1934_vm2, %vm2003_vm10  ;;  %v2193_v18 = vadd.f32 %v2192_v37, %v2130_v50  ;;  %v2265_v52 = vmul.f32 %v2132_v40, %v2132_v40 }
 0x1c6   : > { %v2131_v13 = vsel %vm2067_vm3, %v3889_v55, 0.0  ;;  %vm1937_vm15 = vmand %vm4663_vm8, %vm1873_vm13 }
 0x1c7   : > { %v2194_v43 = vadd.f32 %v2193_v18, %v2131_v13  ;;  %v2264_v51 = vmul.f32 %v2131_v13, %v2131_v13  ;;  %v2326_v19 = vadd.f32 %v2325_v36, %v2263_v46  ;;  %vm2070_vm12 = vmand %vm1937_vm15, %vm2006_vm6 }
 0x1c8   : > { %vm1936_vm5 = vmand %vm4679_vm11, %vm1872_vm1  ;;  %v2134_v63 = vsel %vm2070_vm12, %v3925_v35, 0.0 }
 0x1c9   : > { %v2327_v55 = vadd.f32 %v2326_v19, %v2264_v51  ;;  %vm2069_vm9 = vmand %vm1936_vm5, %vm2005_vm4  ;;  %v2195_v48 = vadd.f32 %v2194_v43, %v2132_v40  ;;  %v2267_v3 = vmul.f32 %v2134_v63, %v2134_v63 }
 0x1ca   : > { %v2133_v34 = vsel %vm2069_vm9, %v3878_v60, 0.0 }
 0x1cb   : > { %v2196_v1 = vadd.f32 %v2195_v48, %v2133_v34  ;;  %v2266_v25 = vmul.f32 %v2133_v34, %v2133_v34  ;;  %v2328_v27 = vadd.f32 %v2327_v55, %v2265_v52 }
 0x1cd   : > { %v2197_v5 = vadd.f32 %v2196_v1, %v2134_v63  ;;  %v2329_v49 = vadd.f32 %v2328_v27, %v2266_v25 }
 0x1cf   : > { %v2198_v10 = vrot.slane %v2197_v5, 4  ;;  %v2330_v31 = vadd.f32 %v2329_v49, %v2267_v3 }
 0x1d1   : > { %v2199_v22 = vadd.f32 %v2198_v10, %v2197_v5  ;;  %v2331_v28 = vrot.slane %v2330_v31, 4 }
 0x1d3   : > { %v2200_v58 = vrot.slane %v2199_v22, 2  ;;  %v2332_v32 = vadd.f32 %v2331_v28, %v2330_v31 }
 0x1d5   : > { %v2201_v20 = vadd.f32 %v2200_v58, %v2199_v22  ;;  %v2333_v16 = vrot.slane %v2332_v32, 2 }
 0x1d7   : > { %v2202_v35 = vrot.slane %v2201_v20, 1  ;;  %v2334_v0 = vadd.f32 %v2333_v16, %v2332_v32 }
 0x1d9   : > { %v2203_v60 = vadd.f32 %v2202_v35, %v2201_v20  ;;  %v2335_v2 = vrot.slane %v2334_v0, 1 }
 0x1db   : > { %v2336_v29 = vadd.f32 %v2335_v2, %v2334_v0  ;;  %2337 = vst [vmem:[%s396_s20] sm:$0xff] %v2203_v60 }
 0x1dd   : > { %2338 = vst [vmem:[%s400_s23] sm:$0xff] %v2336_v29 }
 0x1de PF: > { %s20_s30 = sadd.s32 1, %s2739_s30  }
 0x1df   : > { %p17_p5 = scmp.ge.s32.totalorder %s20_s30, 4  }
 0x1e1   :  { %19 = sbr.rel (!%p17_p5) target bundleno = 1 (0x1), region = 108 }

</bundles_post_ra>
